<compile_context>
chip_gen: v7x
topology: tpu7x:2x2x1
jax: 0.10.0
libtpu: 0.0.40
codegen_flags: <defaults>
</compile_context>

<pallas_src>
import jax
import jax.numpy as jnp
from jax import lax
from jax.experimental import pallas as pl
from jax.experimental.pallas import tpu as pltpu


def _downsample_kernel(xph_ref, w1_ref, b1_ref, w2_ref, b2_ref, out_ref, pad_ref):
    NB = xph_ref.shape[0]
    Hout = xph_ref.shape[2] - 1
    Wout = xph_ref.shape[3] - 1
    C = xph_ref.shape[4]
    M = NB * Hout * Wout

    # ---- conv #1: 3x3, stride 2, pad 1  ->  single im2col matmul ----------
    # Input was pre-padded and phase-split so every tap (dh, dw) is a
    # contiguous (NB, Hout, Wout, C) slice of one phase plane.
    taps = []
    for dh in range(3):
        ph, oh = dh % 2, dh // 2
        for dw in range(3):
            pw, ow = dw % 2, dw // 2
            taps.append(
                xph_ref[:, 2 * ph + pw, pl.ds(oh, Hout), pl.ds(ow, Wout), :])
    patch1 = jnp.concatenate(taps, axis=-1).reshape(M, 9 * C)   # bf16 (M, 9C)
    acc1 = jnp.dot(patch1, w1_ref[...], preferred_element_type=jnp.float32)
    h1 = acc1 + b1_ref[...]                                     # f32 (M, C)

    # ---- stage padded intermediate in VMEM (bf16) --------------------------
    # Only the 1-wide halo border needs zeroing; the interior is fully
    # overwritten.  (Zeroed every step, so the grid axis can be "parallel".)
    zrow = jnp.zeros((NB, 1, Wout + 2, C), pad_ref.dtype)
    zcol = jnp.zeros((NB, Hout + 2, 1, C), pad_ref.dtype)
    pad_ref[:, pl.ds(0, 1), :, :] = zrow
    pad_ref[:, pl.ds(Hout + 1, 1), :, :] = zrow
    pad_ref[:, :, pl.ds(0, 1), :] = zcol
    pad_ref[:, :, pl.ds(Wout + 1, 1), :] = zcol
    pad_ref[:, pl.ds(1, Hout), pl.ds(1, Wout), :] = (
        h1.reshape(NB, Hout, Wout, C).astype(pad_ref.dtype))

    # ---- conv #2: 3x3, stride 1, pad 1  ->  single im2col matmul ----------
    taps2 = [pad_ref[:, pl.ds(dh, Hout), pl.ds(dw, Wout), :]
             for dh in range(3) for dw in range(3)]
    patch2 = jnp.concatenate(taps2, axis=-1).reshape(M, 9 * C)  # bf16 (M, 9C)
    acc2 = jnp.dot(patch2, w2_ref[...], preferred_element_type=jnp.float32)
    out_ref[...] = (acc2 + b2_ref[...]).astype(out_ref.dtype)   # (M, Cout)


def _pick_batch_block(N, HW):
    """Largest divisor of N that keeps the matmul M dim well fed but bounded."""
    best = 1
    for cand in range(1, N + 1):
        if N % cand:
            continue
        if cand * HW > 2048:
            continue
        if cand == N or (cand * HW) % 8 == 0:   # keep out-block sublane-aligned
            best = cand
    return best


def downsample(x_nchw, w1, b1, w2, b2):
    N, C, H, W = x_nchw.shape
    assert H % 2 == 0 and W % 2 == 0, "even spatial dims expected"
    Hout, Wout = H // 2, W // 2
    HW = Hout * Wout
    Cout = w2.shape[-1]
    out_dtype = x_nchw.dtype

    # Layout plumbing in bf16 (halves its HBM round trip).
    # TODO(synk): read stride-2 taps straight from x_pad in-kernel (or use
    # allow_input_fusion) to remove this extra HBM pass entirely.
    x = jnp.transpose(x_nchw, (0, 2, 3, 1)).astype(jnp.bfloat16)   # NHWC
    x_pad = jnp.pad(x, ((0, 0), (1, 1), (1, 1), (0, 0)))           # (N,H+2,W+2,C)
    # Phase split: xph[n, 2*ph+pw, i, j, c] = x_pad[n, 2*i+ph, 2*j+pw, c]
    xph = x_pad.reshape(N, Hout + 1, 2, Wout + 1, 2, C)
    xph = xph.transpose(0, 2, 4, 1, 3, 5).reshape(N, 4, Hout + 1, Wout + 1, C)

    w1f = w1.reshape(9 * C, C).astype(jnp.bfloat16)
    w2f = w2.reshape(9 * C, Cout).astype(jnp.bfloat16)
    b1f = b1.reshape(1, C).astype(jnp.float32)
    b2f = b2.reshape(1, Cout).astype(jnp.float32)

    NB = _pick_batch_block(N, HW)
    grid = (N // NB,)

    # Rough per-step VMEM need (double-buffered inputs/outputs + scratch +
    # in-kernel patch temporaries) -> explicit scoped limit.
    est = (2 * (NB * 4 * (Hout + 1) * (Wout + 1) * C * 2
                + 9 * C * (C + Cout) * 2
                + NB * HW * Cout * 4)
           + NB * (Hout + 2) * (Wout + 2) * C * 2
           + 2 * NB * HW * 9 * C * 2
           + 2 * NB * HW * max(C, Cout) * 4)
    vmem_limit = int(min(100 * 2**20, max(32 * 2**20, 3 * est)))
    # TODO(synk): for large H*W*C on v7x (64 MiB VMEM) add a row-block grid
    # axis with a 1-row halo instead of raising the VMEM limit further.

    out2d = pl.pallas_call(
        _downsample_kernel,
        out_shape=jax.ShapeDtypeStruct((N * HW, Cout), out_dtype),
        grid_spec=pltpu.PrefetchScalarGridSpec(
            num_scalar_prefetch=0,
            grid=grid,
            in_specs=[
                pl.BlockSpec((NB, 4, Hout + 1, Wout + 1, C),
                             lambda n: (n, 0, 0, 0, 0)),
                pl.BlockSpec((9 * C, C), lambda n: (0, 0)),
                pl.BlockSpec((1, C), lambda n: (0, 0)),
                pl.BlockSpec((9 * C, Cout), lambda n: (0, 0)),
                pl.BlockSpec((1, Cout), lambda n: (0, 0)),
            ],
            out_specs=pl.BlockSpec((NB * HW, Cout), lambda n: (n, 0)),
            scratch_shapes=[
                pltpu.VMEM((NB, Hout + 2, Wout + 2, C), jnp.bfloat16)],
        ),
        compiler_params=pltpu.CompilerParams(
            dimension_semantics=("parallel",),
            vmem_limit_bytes=vmem_limit,
        ),
    )(xph, w1f, b1f, w2f, b2f)

    out = out2d.reshape(N, Hout, Wout, Cout)
    return jnp.transpose(out, (0, 3, 1, 2))                      # back to NCHW


def downsample_ref(x_nchw, w1, b1, w2, b2):
    """Pure-JAX f32 reference with identical semantics (for verification)."""
    N, C, H, W = x_nchw.shape
    Cout = w2.shape[-1]
    x = jnp.transpose(x_nchw, (0, 2, 3, 1))
    dn = ("NHWC", "HWIO", "NHWC")
    y = lax.conv_general_dilated(x, w1.reshape(3, 3, C, C), (2, 2),
                                 ((1, 1), (1, 1)), dimension_numbers=dn) + b1
    z = lax.conv_general_dilated(y, w2.reshape(3, 3, C, Cout), (1, 1),
                                 ((1, 1), (1, 1)), dimension_numbers=dn) + b2
    return jnp.transpose(z, (0, 3, 1, 2))


if __name__ == "__main__":
    # DownSample(dim=4, dim_out=8): down = Conv2d(4,4,3,2,1), conv = Conv2d(4,8,3,1,1)
    N, dim, dim_out, H, W = 2, 4, 8, 16, 16
    key = jax.random.PRNGKey(0)
    kx, k1, k2, k3, k4 = jax.random.split(key, 5)
    x = jax.random.normal(kx, (N, dim, H, W), jnp.float32)
    w1 = jax.random.normal(k1, (9, dim, dim), jnp.float32) * 0.1
    b1 = jax.random.normal(k2, (dim,), jnp.float32) * 0.1
    w2 = jax.random.normal(k3, (9, dim, dim_out), jnp.float32) * 0.1
    b2 = jax.random.normal(k4, (dim_out,), jnp.float32) * 0.1

    out = jax.block_until_ready(jax.jit(downsample)(x, w1, b1, w2, b2))
    ref = downsample_ref(x, w1, b1, w2, b2)

    assert out.shape == (N, dim_out, H // 2, W // 2), out.shape
    max_err = float(jnp.abs(out - ref).max())
    # bf16 MXU operands with f32 accumulation -> relaxed (but bug-catching) tol.
    assert max_err < 5e-2, max_err
    print("KERNEL_OK")
</pallas_src>

<mosaic_0001>
module attributes {stable_mosaic.version = 11 : i64} {
  func.func @_downsample_kernel(%arg0: i32, %arg1: memref<2x4x9x9x4xbf16, #tpu.memory_space<vmem>>, %arg2: memref<36x4xbf16, #tpu.memory_space<vmem>>, %arg3: memref<1x4xf32, #tpu.memory_space<vmem>>, %arg4: memref<36x8xbf16, #tpu.memory_space<vmem>>, %arg5: memref<1x8xf32, #tpu.memory_space<vmem>>, %arg6: memref<128x8xf32, #tpu.memory_space<vmem>>, %arg7: memref<2x10x10x4xbf16, #tpu.memory_space<vmem>>) attributes {dimension_semantics = [#tpu.dimension_semantics<parallel>], iteration_bounds = array<i64: 1>, scalar_prefetch = 0 : i64, scratch_operands = 1 : i64, tpu.core_type = #tpu.core_type<tc>, window_params = [{transform_indices = @transform_0, window_bounds = array<i64: 2, 4, 9, 9, 4>}, {pipeline_mode = #tpu.pipeline_mode<synchronous>, transform_indices = @transform_1, window_bounds = array<i64: 36, 4>}, {pipeline_mode = #tpu.pipeline_mode<synchronous>, transform_indices = @transform_2, window_bounds = array<i64: 1, 4>}, {pipeline_mode = #tpu.pipeline_mode<synchronous>, transform_indices = @transform_3, window_bounds = array<i64: 36, 8>}, {pipeline_mode = #tpu.pipeline_mode<synchronous>, transform_indices = @transform_4, window_bounds = array<i64: 1, 8>}, {transform_indices = @transform_5, window_bounds = array<i64: 128, 8>}]} {
    %c0 = arith.constant 0 : index
    %c0_0 = arith.constant 0 : index
    %c0_1 = arith.constant 0 : index
    %c0_2 = arith.constant 0 : index
    %c0_3 = arith.constant 0 : index
    %0 = vector.load %arg1[%c0, %c0_0, %c0_1, %c0_2, %c0_3] : memref<2x4x9x9x4xbf16, #tpu.memory_space<vmem>>, vector<2x1x8x8x4xbf16>
    %1 = vector.shape_cast %0 : vector<2x1x8x8x4xbf16> to vector<2x8x8x4xbf16>
    %c0_4 = arith.constant 0 : index
    %c1 = arith.constant 1 : index
    %c0_5 = arith.constant 0 : index
    %c0_6 = arith.constant 0 : index
    %c0_7 = arith.constant 0 : index
    %2 = vector.load %arg1[%c0_4, %c1, %c0_5, %c0_6, %c0_7] : memref<2x4x9x9x4xbf16, #tpu.memory_space<vmem>>, vector<2x1x8x8x4xbf16>
    %3 = vector.shape_cast %2 : vector<2x1x8x8x4xbf16> to vector<2x8x8x4xbf16>
    %c0_8 = arith.constant 0 : index
    %c0_9 = arith.constant 0 : index
    %c0_10 = arith.constant 0 : index
    %c1_11 = arith.constant 1 : index
    %c0_12 = arith.constant 0 : index
    %4 = vector.load %arg1[%c0_8, %c0_9, %c0_10, %c1_11, %c0_12] : memref<2x4x9x9x4xbf16, #tpu.memory_space<vmem>>, vector<2x1x8x8x4xbf16>
    %5 = vector.shape_cast %4 : vector<2x1x8x8x4xbf16> to vector<2x8x8x4xbf16>
    %c0_13 = arith.constant 0 : index
    %c2 = arith.constant 2 : index
    %c0_14 = arith.constant 0 : index
    %c0_15 = arith.constant 0 : index
    %c0_16 = arith.constant 0 : index
    %6 = vector.load %arg1[%c0_13, %c2, %c0_14, %c0_15, %c0_16] : memref<2x4x9x9x4xbf16, #tpu.memory_space<vmem>>, vector<2x1x8x8x4xbf16>
    %7 = vector.shape_cast %6 : vector<2x1x8x8x4xbf16> to vector<2x8x8x4xbf16>
    %c0_17 = arith.constant 0 : index
    %c3 = arith.constant 3 : index
    %c0_18 = arith.constant 0 : index
    %c0_19 = arith.constant 0 : index
    %c0_20 = arith.constant 0 : index
    %8 = vector.load %arg1[%c0_17, %c3, %c0_18, %c0_19, %c0_20] : memref<2x4x9x9x4xbf16, #tpu.memory_space<vmem>>, vector<2x1x8x8x4xbf16>
    %9 = vector.shape_cast %8 : vector<2x1x8x8x4xbf16> to vector<2x8x8x4xbf16>
    %c0_21 = arith.constant 0 : index
    %c2_22 = arith.constant 2 : index
    %c0_23 = arith.constant 0 : index
    %c1_24 = arith.constant 1 : index
    %c0_25 = arith.constant 0 : index
    %10 = vector.load %arg1[%c0_21, %c2_22, %c0_23, %c1_24, %c0_25] : memref<2x4x9x9x4xbf16, #tpu.memory_space<vmem>>, vector<2x1x8x8x4xbf16>
    %11 = vector.shape_cast %10 : vector<2x1x8x8x4xbf16> to vector<2x8x8x4xbf16>
    %c0_26 = arith.constant 0 : index
    %c0_27 = arith.constant 0 : index
    %c1_28 = arith.constant 1 : index
    %c0_29 = arith.constant 0 : index
    %c0_30 = arith.constant 0 : index
    %12 = vector.load %arg1[%c0_26, %c0_27, %c1_28, %c0_29, %c0_30] : memref<2x4x9x9x4xbf16, #tpu.memory_space<vmem>>, vector<2x1x8x8x4xbf16>
    %13 = vector.shape_cast %12 : vector<2x1x8x8x4xbf16> to vector<2x8x8x4xbf16>
    %c0_31 = arith.constant 0 : index
    %c1_32 = arith.constant 1 : index
    %c1_33 = arith.constant 1 : index
    %c0_34 = arith.constant 0 : index
    %c0_35 = arith.constant 0 : index
    %14 = vector.load %arg1[%c0_31, %c1_32, %c1_33, %c0_34, %c0_35] : memref<2x4x9x9x4xbf16, #tpu.memory_space<vmem>>, vector<2x1x8x8x4xbf16>
    %15 = vector.shape_cast %14 : vector<2x1x8x8x4xbf16> to vector<2x8x8x4xbf16>
    %c0_36 = arith.constant 0 : index
    %c0_37 = arith.constant 0 : index
    %c1_38 = arith.constant 1 : index
    %c1_39 = arith.constant 1 : index
    %c0_40 = arith.constant 0 : index
    %16 = vector.load %arg1[%c0_36, %c0_37, %c1_38, %c1_39, %c0_40] : memref<2x4x9x9x4xbf16, #tpu.memory_space<vmem>>, vector<2x1x8x8x4xbf16>
    %17 = vector.shape_cast %16 : vector<2x1x8x8x4xbf16> to vector<2x8x8x4xbf16>
    %18 = tpu.concatenate %1, %3, %5, %7, %9, %11, %13, %15, %17 in 3 : vector<2x8x8x4xbf16>, vector<2x8x8x4xbf16>, vector<2x8x8x4xbf16>, vector<2x8x8x4xbf16>, vector<2x8x8x4xbf16>, vector<2x8x8x4xbf16>, vector<2x8x8x4xbf16>, vector<2x8x8x4xbf16>, vector<2x8x8x4xbf16> -> vector<2x8x8x36xbf16>
    %19 = vector.shape_cast %18 : vector<2x8x8x36xbf16> to vector<128x36xbf16>
    %c0_41 = arith.constant 0 : index
    %c0_42 = arith.constant 0 : index
    %20 = vector.load %arg2[%c0_41, %c0_42] : memref<36x4xbf16, #tpu.memory_space<vmem>>, vector<36x4xbf16>
    %cst = arith.constant dense<0.000000e+00> : vector<128x4xf32>
    %21 = tpu.matmul %19, %20, %cst {dimension_numbers = #tpu.dot_dimension_numbers<[1], [0], [0], [1], [0, 0, 1, 1], [], []>} : vector<128x36xbf16>, vector<36x4xbf16>, vector<128x4xf32> -> vector<128x4xf32>
    %c0_43 = arith.constant 0 : index
    %c0_44 = arith.constant 0 : index
    %22 = vector.load %arg3[%c0_43, %c0_44] : memref<1x4xf32, #tpu.memory_space<vmem>>, vector<1x4xf32>
    %23 = vector.broadcast %22 : vector<1x4xf32> to vector<128x4xf32>
    %24 = arith.addf %21, %23 : vector<128x4xf32>
    %cst_45 = arith.constant 0.000000e+00 : bf16
    %25 = vector.broadcast %cst_45 : bf16 to vector<2x1x10x4xbf16>
    %cst_46 = arith.constant 0.000000e+00 : bf16
    %26 = vector.broadcast %cst_46 : bf16 to vector<2x10x1x4xbf16>
    %c0_47 = arith.constant 0 : index
    %c0_48 = arith.constant 0 : index
    %c0_49 = arith.constant 0 : index
    %c0_50 = arith.constant 0 : index
    %27 = vector.load %arg7[%c0_47, %c0_48, %c0_49, %c0_50] : memref<2x10x10x4xbf16, #tpu.memory_space<vmem>>, vector<2x1x10x4xbf16>
    tpu.vector_store %arg7[%c0_47, %c0_48, %c0_49, %c0_50], %25 {strides = array<i32>} : memref<2x10x10x4xbf16, #tpu.memory_space<vmem>>, vector<2x1x10x4xbf16>,
    %c0_51 = arith.constant 0 : index
    %c9 = arith.constant 9 : index
    %c0_52 = arith.constant 0 : index
    %c0_53 = arith.constant 0 : index
    %28 = vector.load %arg7[%c0_51, %c9, %c0_52, %c0_53] : memref<2x10x10x4xbf16, #tpu.memory_space<vmem>>, vector<2x1x10x4xbf16>
    tpu.vector_store %arg7[%c0_51, %c9, %c0_52, %c0_53], %25 {strides = array<i32>} : memref<2x10x10x4xbf16, #tpu.memory_space<vmem>>, vector<2x1x10x4xbf16>,
    %c0_54 = arith.constant 0 : index
    %c0_55 = arith.constant 0 : index
    %c0_56 = arith.constant 0 : index
    %c0_57 = arith.constant 0 : index
    %29 = vector.load %arg7[%c0_54, %c0_55, %c0_56, %c0_57] : memref<2x10x10x4xbf16, #tpu.memory_space<vmem>>, vector<2x10x1x4xbf16>
    tpu.vector_store %arg7[%c0_54, %c0_55, %c0_56, %c0_57], %26 {strides = array<i32>} : memref<2x10x10x4xbf16, #tpu.memory_space<vmem>>, vector<2x10x1x4xbf16>,
    %c0_58 = arith.constant 0 : index
    %c0_59 = arith.constant 0 : index
    %c9_60 = arith.constant 9 : index
    %c0_61 = arith.constant 0 : index
    %30 = vector.load %arg7[%c0_58, %c0_59, %c9_60, %c0_61] : memref<2x10x10x4xbf16, #tpu.memory_space<vmem>>, vector<2x10x1x4xbf16>
    tpu.vector_store %arg7[%c0_58, %c0_59, %c9_60, %c0_61], %26 {strides = array<i32>} : memref<2x10x10x4xbf16, #tpu.memory_space<vmem>>, vector<2x10x1x4xbf16>,
    %31 = vector.shape_cast %24 : vector<128x4xf32> to vector<2x8x8x4xf32>
    %32 = arith.truncf %31 : vector<2x8x8x4xf32> to vector<2x8x8x4xbf16>
    %c0_62 = arith.constant 0 : index
    %c1_63 = arith.constant 1 : index
    %c1_64 = arith.constant 1 : index
    %c0_65 = arith.constant 0 : index
    %33 = vector.load %arg7[%c0_62, %c1_63, %c1_64, %c0_65] : memref<2x10x10x4xbf16, #tpu.memory_space<vmem>>, vector<2x8x8x4xbf16>
    tpu.vector_store %arg7[%c0_62, %c1_63, %c1_64, %c0_65], %32 {strides = array<i32>} : memref<2x10x10x4xbf16, #tpu.memory_space<vmem>>, vector<2x8x8x4xbf16>,
    %c0_66 = arith.constant 0 : index
    %c0_67 = arith.constant 0 : index
    %c0_68 = arith.constant 0 : index
    %c0_69 = arith.constant 0 : index
    %34 = vector.load %arg7[%c0_66, %c0_67, %c0_68, %c0_69] : memref<2x10x10x4xbf16, #tpu.memory_space<vmem>>, vector<2x8x8x4xbf16>
    %c0_70 = arith.constant 0 : index
    %c0_71 = arith.constant 0 : index
    %c1_72 = arith.constant 1 : index
    %c0_73 = arith.constant 0 : index
    %35 = vector.load %arg7[%c0_70, %c0_71, %c1_72, %c0_73] : memref<2x10x10x4xbf16, #tpu.memory_space<vmem>>, vector<2x8x8x4xbf16>
    %c0_74 = arith.constant 0 : index
    %c0_75 = arith.constant 0 : index
    %c2_76 = arith.constant 2 : index
    %c0_77 = arith.constant 0 : index
    %36 = vector.load %arg7[%c0_74, %c0_75, %c2_76, %c0_77] : memref<2x10x10x4xbf16, #tpu.memory_space<vmem>>, vector<2x8x8x4xbf16>
    %c0_78 = arith.constant 0 : index
    %c1_79 = arith.constant 1 : index
    %c0_80 = arith.constant 0 : index
    %c0_81 = arith.constant 0 : index
    %37 = vector.load %arg7[%c0_78, %c1_79, %c0_80, %c0_81] : memref<2x10x10x4xbf16, #tpu.memory_space<vmem>>, vector<2x8x8x4xbf16>
    %c0_82 = arith.constant 0 : index
    %c1_83 = arith.constant 1 : index
    %c1_84 = arith.constant 1 : index
    %c0_85 = arith.constant 0 : index
    %38 = vector.load %arg7[%c0_82, %c1_83, %c1_84, %c0_85] : memref<2x10x10x4xbf16, #tpu.memory_space<vmem>>, vector<2x8x8x4xbf16>
    %c0_86 = arith.constant 0 : index
    %c1_87 = arith.constant 1 : index
    %c2_88 = arith.constant 2 : index
    %c0_89 = arith.constant 0 : index
    %39 = vector.load %arg7[%c0_86, %c1_87, %c2_88, %c0_89] : memref<2x10x10x4xbf16, #tpu.memory_space<vmem>>, vector<2x8x8x4xbf16>
    %c0_90 = arith.constant 0 : index
    %c2_91 = arith.constant 2 : index
    %c0_92 = arith.constant 0 : index
    %c0_93 = arith.constant 0 : index
    %40 = vector.load %arg7[%c0_90, %c2_91, %c0_92, %c0_93] : memref<2x10x10x4xbf16, #tpu.memory_space<vmem>>, vector<2x8x8x4xbf16>
    %c0_94 = arith.constant 0 : index
    %c2_95 = arith.constant 2 : index
    %c1_96 = arith.constant 1 : index
    %c0_97 = arith.constant 0 : index
    %41 = vector.load %arg7[%c0_94, %c2_95, %c1_96, %c0_97] : memref<2x10x10x4xbf16, #tpu.memory_space<vmem>>, vector<2x8x8x4xbf16>
    %c0_98 = arith.constant 0 : index
    %c2_99 = arith.constant 2 : index
    %c2_100 = arith.constant 2 : index
    %c0_101 = arith.constant 0 : index
    %42 = vector.load %arg7[%c0_98, %c2_99, %c2_100, %c0_101] : memref<2x10x10x4xbf16, #tpu.memory_space<vmem>>, vector<2x8x8x4xbf16>
    %43 = tpu.concatenate %34, %35, %36, %37, %38, %39, %40, %41, %42 in 3 : vector<2x8x8x4xbf16>, vector<2x8x8x4xbf16>, vector<2x8x8x4xbf16>, vector<2x8x8x4xbf16>, vector<2x8x8x4xbf16>, vector<2x8x8x4xbf16>, vector<2x8x8x4xbf16>, vector<2x8x8x4xbf16>, vector<2x8x8x4xbf16> -> vector<2x8x8x36xbf16>
    %44 = vector.shape_cast %43 : vector<2x8x8x36xbf16> to vector<128x36xbf16>
    %c0_102 = arith.constant 0 : index
    %c0_103 = arith.constant 0 : index
    %45 = vector.load %arg4[%c0_102, %c0_103] : memref<36x8xbf16, #tpu.memory_space<vmem>>, vector<36x8xbf16>
    %cst_104 = arith.constant dense<0.000000e+00> : vector<128x8xf32>
    %46 = tpu.matmul %44, %45, %cst_104 {dimension_numbers = #tpu.dot_dimension_numbers<[1], [0], [0], [1], [0, 0, 1, 1], [], []>} : vector<128x36xbf16>, vector<36x8xbf16>, vector<128x8xf32> -> vector<128x8xf32>
    %c0_105 = arith.constant 0 : index
    %c0_106 = arith.constant 0 : index
    %47 = vector.load %arg5[%c0_105, %c0_106] : memref<1x8xf32, #tpu.memory_space<vmem>>, vector<1x8xf32>
    %48 = vector.broadcast %47 : vector<1x8xf32> to vector<128x8xf32>
    %49 = arith.addf %46, %48 : vector<128x8xf32>
    %c0_107 = arith.constant 0 : index
    %c0_108 = arith.constant 0 : index
    %50 = vector.load %arg6[%c0_107, %c0_108] : memref<128x8xf32, #tpu.memory_space<vmem>>, vector<128x8xf32>
    tpu.vector_store %arg6[%c0_107, %c0_108], %49 {strides = array<i32>} : memref<128x8xf32, #tpu.memory_space<vmem>>, vector<128x8xf32>,
    return
  }
  func.func @transform_0(%arg0: i32) -> (i32, i32, i32, i32, i32) {
    %c0_i32 = arith.constant 0 : i32
    %c0_i32_0 = arith.constant 0 : i32
    %c0_i32_1 = arith.constant 0 : i32
    %c0_i32_2 = arith.constant 0 : i32
    %c0_i32_3 = arith.constant 0 : i32
    return %arg0, %c0_i32, %c0_i32_0, %c0_i32_1, %c0_i32_2 : i32, i32, i32, i32, i32
  }
  func.func @transform_1(%arg0: i32) -> (i32, i32) {
    %c0_i32 = arith.constant 0 : i32
    %c0_i32_0 = arith.constant 0 : i32
    %c0_i32_1 = arith.constant 0 : i32
    return %c0_i32, %c0_i32_0 : i32, i32
  }
  func.func @transform_2(%arg0: i32) -> (i32, i32) {
    %c0_i32 = arith.constant 0 : i32
    %c0_i32_0 = arith.constant 0 : i32
    %c0_i32_1 = arith.constant 0 : i32
    return %c0_i32, %c0_i32_0 : i32, i32
  }
  func.func @transform_3(%arg0: i32) -> (i32, i32) {
    %c0_i32 = arith.constant 0 : i32
    %c0_i32_0 = arith.constant 0 : i32
    %c0_i32_1 = arith.constant 0 : i32
    return %c0_i32, %c0_i32_0 : i32, i32
  }
  func.func @transform_4(%arg0: i32) -> (i32, i32) {
    %c0_i32 = arith.constant 0 : i32
    %c0_i32_0 = arith.constant 0 : i32
    %c0_i32_1 = arith.constant 0 : i32
    return %c0_i32, %c0_i32_0 : i32, i32
  }
  func.func @transform_5(%arg0: i32) -> (i32, i32) {
    %c0_i32 = arith.constant 0 : i32
    %c0_i32_0 = arith.constant 0 : i32
    return %arg0, %c0_i32 : i32, i32
  }
}

</mosaic_0001>

<bundles_post_ra>
// kernel: downsample.1
= control target key start
LH: loop header
LB: loop body
LE: loop exit
PB: predicated region body
PF: predicated region fallthrough
CT: control target
= control target key end

     0   :  { %s4594_s24 = smov 4   ;;  %s4595_s18 = smov 8   ;;  %vm1550_vm0 = vcmask 1041408   ;;  %vm1178_vm1 = vcmask 31744   ;;  %vm1227_vm2 = vcmask 64512   ;;  %vm1260_vm3 = vcmask 97280   ;;  %s6526_s0 = inlined_call_operand.vmem [shape: bf16[2,4,9,9,4], index: 0, kind: input, shape index: {}]   ;;  %s6527_s1 = inlined_call_operand.vmem [shape: bf16[36,4], index: 1, kind: input, shape index: {}]   ;;  %s6528_s2 = inlined_call_operand.vmem [shape: f32[1,4], index: 2, kind: input, shape index: {}]   ;;  %s6529_s3 = inlined_call_operand.vmem [shape: bf16[36,8], index: 3, kind: input, shape index: {}]   ;;  %s6530_s4 = inlined_call_operand.vmem [shape: f32[1,8], index: 4, kind: input, shape index: {}]   ;;  %s6531_s5 = inlined_call_operand.vmem [shape: f32[128,8], index: 5, kind: output, shape index: {}]  }
   0x1   :  { %v4311_v0 = vld [vmem:[%s6526_s0 + $0x58] ss:$0 sps:$4 sm:$0xff]   ;;  %v4312_v1 = vld [vmem:[%s6526_s0 + $0x48] ss:$0 sps:$4 sm:$0xff]   ;;  %v4313_v2 = vld [vmem:[%s6526_s0 + $0x60] ss:$0 sps:$4 sm:$0xff]  }
   0x2   :  { %222 = vrot.lane.b32.xlu1 %v4311_v0, %s4594_s24  ;;  %v4314_v3 = vld [vmem:[%s6526_s0 + $0x50] ss:$0 sps:$4 sm:$0xff]   ;;  %v4649_v4 = vld [vmem:[%s6526_s0 + $0x8] sm:$0xf]  ;;  %218 = vrot.lane.b32.xlu0 %v4312_v1, %s4594_s24  ;;  %s4596_s7 = smov 12   ;;  %s4597_s19 = smov 16  }
   0x3   :  { %v55_v5 = vld [vmem:[%s6526_s0 + $0xc] sm:$0x1]  ;;  %v4658_v6 = vld [vmem:[%s6526_s0] sm:$0xf]  ;;  %v54_v7 = vld [vmem:[%s6526_s0 + $0x4] sm:$0x1] }
   0x4   :  { %v3923_v8 = vcombine.low %v4649_v4, %v55_v5  ;;  %v3922_v9 = vcombine.low %v4658_v6, %v54_v7  ;;  %v4668_v10 = vld [vmem:[%s6526_s0 + $0x18] sm:$0xf]  ;;  %v57_v11 = vld [vmem:[%s6526_s0 + $0x1c] sm:$0x1]  ;;  %v4676_v12 = vld [vmem:[%s6526_s0 + $0x10] sm:$0xf] }
   0x5   :  { %v3925_v13 = vcombine.low %v4668_v10, %v57_v11  ;;  %v56_v14 = vld [vmem:[%s6526_s0 + $0x14] sm:$0x1]  ;;  %v3811_v32 = vld [vmem:[%s6526_s0 + $0x98] sm:$0xf]  ;;  %v3810_v33 = vld [vmem:[%s6526_s0 + $0x90] sm:$0xf] }
   0x6   :  { %224 = vrot.lane.b32.xlu1 %v4313_v2, %s4594_s24  ;;  %v338_v15 = vshrl.u32 %v3923_v8, 16  ;;  %v340_v16 = vshll.u32 %v3923_v8, 16  ;;  %v331_v17 = vshrl.u32 %v3922_v9, 16  ;;  %v333_v18 = vshll.u32 %v3922_v9, 16  ;;  %220 = vrot.lane.b32.xlu0 %v4314_v3, %s4594_s24  ;;  %v3843_v34 = vld [vmem:[%s6526_s0 + $0x9c] sm:$0x1] }
   0x7   :  { %v354_v19 = vshll.u32 %v3925_v13, 16  ;;  %v3924_v20 = vcombine.low %v4676_v12, %v56_v14  ;;  %v352_v23 = vshrl.u32 %v3925_v13, 16  ;;  %v3939_v35 = vcombine.low %v3811_v32, %v3811_v32  ;;  %v3842_v37 = vld [vmem:[%s6526_s0 + $0x94] sm:$0x1]  ;;  %v3813_v38 = vld [vmem:[%s6526_s0 + $0xa8] sm:$0xf] }
   0x8   :  { %v342_v21 = vrot.slane %v340_v16, 1  ;;  %v335_v22 = vrot.slane %v333_v18, 1  ;;  %v3938_v36 = vcombine.low %v3810_v33, %v3810_v33  ;;  %v3812_v39 = vld [vmem:[%s6526_s0 + $0xa0] sm:$0xf]  ;;  %v3971_v40 = vcombine.low %v3811_v32, %v3843_v34  ;;  %v3845_v44 = vld [vmem:[%s6526_s0 + $0xac] sm:$0x1] }
   0x9   :  { %v356_v24 = vrot.slane %v354_v19, 1  ;;  %v345_v25 = vshrl.u32 %v3924_v20, 16  ;;  %v347_v26 = vshll.u32 %v3924_v20, 16  ;;  %v3970_v41 = vcombine.low %v3810_v33, %v3842_v37  ;;  %v3844_v45 = vld [vmem:[%s6526_s0 + $0xa4] sm:$0x1]  ;;  %s4598_s22 = smov 20  }
   0xa   :  { %v343_v27 = vor.u32 %v342_v21, %v338_v15  ;;  %v336_v28 = vor.u32 %v335_v22, %v331_v17  ;;  %v3941_v42 = vcombine.low %v3813_v38, %v3813_v38  ;;  %v3940_v43 = vcombine.low %v3812_v39, %v3812_v39  ;;  %v4327_v46 = vld [vmem:[%s6526_s0 + $0xe0] ss:$0 sps:$4 sm:$0xff]   ;;  %v4328_v49 = vld [vmem:[%s6526_s0 + $0xd8] ss:$0 sps:$4 sm:$0xff]   ;;  %v4329_v52 = vld [vmem:[%s6526_s0 + $0xf0] ss:$0 sps:$4 sm:$0xff]  }
   0xb   :  { %v349_v29 = vrot.slane %v347_v26, 1  ;;  %v357_v30 = vor.u32 %v356_v24, %v352_v23  ;;  %v3973_v47 = vcombine.low %v3813_v38, %v3845_v44  ;;  %v3972_v48 = vcombine.low %v3812_v39, %v3844_v45  ;;  %v4330_v55 = vld [vmem:[%s6526_s0 + $0xe8] ss:$0 sps:$4 sm:$0xff]   ;;  %v3859_v5 = vld [vmem:[%s6526_s0 + $0x10] sm:$0xf]  ;;  %s4599_s12 = smov 24  }
   0xc   :  { %444 = vrot.lane.b32.xlu1 %v343_v27, %s4595_s18  ;;  %442 = vrot.lane.b32.xlu0 %v336_v28, %s4595_s18  ;;  %v692_v50 = vshll.u32 %v3971_v40, 16  ;;  %v685_v51 = vshll.u32 %v3970_v41, 16  ;;  %v690_v53 = vshrl.u32 %v3971_v40, 16  ;;  %v683_v54 = vshrl.u32 %v3970_v41, 16  ;;  %v3858_v7 = vld [vmem:[%s6526_s0 + $0x8] sm:$0xf] }
   0xd   :  { %v350_v31 = vor.u32 %v349_v29, %v345_v25  ;;  %v706_v58 = vshll.u32 %v3973_v47, 16  ;;  %v699_v59 = vshll.u32 %v3972_v48, 16  ;;  %v704_v60 = vshrl.u32 %v3973_v47, 16  ;;  %v3891_v8 = vld [vmem:[%s6526_s0 + $0x14] sm:$0x1]  ;;  %v4399_v26 = vld [vmem:[%s6527_s1] sm:$0xff]  }
   0xe   :  { %v694_v56 = vrot.slane %v692_v50, 1  ;;  %v687_v57 = vrot.slane %v685_v51, 1  ;;  %v697_v61 = vshrl.u32 %v3972_v48, 16  ;;  %v3987_v9 = vcombine.low %v3859_v5, %v3859_v5  ;;  %v3890_v11 = vld [vmem:[%s6526_s0 + $0xc] sm:$0x1]  ;;  %4256 = vmatprep.subr.bf16.mxu0 %v4399_v26  ;;  %s4600_s29 = smov 28  }
   0xf   :  { %v708_v0 = vrot.slane %v706_v58, 1  ;;  %v701_v1 = vrot.slane %v699_v59, 1  ;;  %v3986_v13 = vcombine.low %v3858_v7, %v3858_v7  ;;  %v3861_v14 = vld [vmem:[%s6526_s0 + $0x20] sm:$0xf]  ;;  %v3860_v15 = vld [vmem:[%s6526_s0 + $0x18] sm:$0xf]  ;;  %v4019_v16 = vcombine.low %v3859_v5, %v3891_v8  ;;  %4257 = vmatpush3.bf16.msra.mxu0 %v4399_v26 }
  0x10   :  { %448 = vrot.lane.b32.xlu1 %v357_v30, %s4595_s18  ;;  %446 = vrot.lane.b32.xlu0 %v350_v31, %s4595_s18  ;;  %v695_v62 = vor.u32 %v694_v56, %v690_v53  ;;  %v688_v63 = vor.u32 %v687_v57, %v683_v54  ;;  %v4018_v17 = vcombine.low %v3858_v7, %v3890_v11  ;;  %v3893_v20 = vld [vmem:[%s6526_s0 + $0x24] sm:$0x1]  ;;  %v3892_v21 = vld [vmem:[%s6526_s0 + $0x1c] sm:$0x1]  ;;  %s4601_s8 = smov 32   ;;  %vm1293_vm4 = vcmask 130048  }
  0x11   :  { %v709_v2 = vor.u32 %v708_v0, %v704_v60  ;;  %v702_v3 = vor.u32 %v701_v1, %v697_v61  ;;  %v3989_v18 = vcombine.low %v3861_v14, %v3861_v14  ;;  %v3988_v19 = vcombine.low %v3860_v15, %v3860_v15  ;;  %v4339_v22 = vld [vmem:[%s6526_s0 + $0x58] ss:$0 sps:$4 sm:$0xff]   ;;  %v4340_v23 = vld [vmem:[%s6526_s0 + $0x50] ss:$0 sps:$4 sm:$0xff]   ;;  %v4341_v29 = vld [vmem:[%s6526_s0 + $0x68] ss:$0 sps:$4 sm:$0xff]  }
  0x12   :  { %v1044_v24 = vshll.u32 %v4019_v16, 16  ;;  %v1037_v25 = vshll.u32 %v4018_v17, 16  ;;  %v4021_v27 = vcombine.low %v3861_v14, %v3893_v20  ;;  %v4020_v28 = vcombine.low %v3860_v15, %v3892_v21  ;;  %v4342_v30 = vld [vmem:[%s6526_s0 + $0x60] ss:$0 sps:$4 sm:$0xff]   ;;  %v4343_v44 = vld [vmem:[%s6526_s0 + $0x70] ss:$0 sps:$4 sm:$0xff]  }
  0x13   :  { %v1042_v31 = vshrl.u32 %v4019_v16, 16  ;;  %v1035_v33 = vshrl.u32 %v4018_v17, 16  ;;  %v25_v37 = vld [vmem:[%s6526_s0 + $0x20] sm:$0xf]  ;;  %v4344_v45 = vld [vmem:[%s6526_s0 + $0x68] ss:$0 sps:$4 sm:$0xff]  }
  0x14   :  { %524 = vrot.lane.b32.xlu1 %v3939_v35, %s4596_s7  ;;  %522 = vrot.lane.b32.xlu0 %v3938_v36, %s4596_s7  ;;  %v1046_v32 = vrot.slane %v1044_v24, 1  ;;  %v1039_v34 = vrot.slane %v1037_v25, 1  ;;  %v26_v35 = vld [vmem:[%s6526_s0 + $0x28] sm:$0xf]  ;;  %v59_v36 = vld [vmem:[%s6526_s0 + $0x2c] sm:$0x1] }
  0x15   :  { %v1058_v40 = vshll.u32 %v4021_v27, 16  ;;  %v1051_v41 = vshll.u32 %v4020_v28, 16  ;;  %v1049_v47 = vshrl.u32 %v4020_v28, 16  ;;  %v3927_v48 = vcombine.low %v26_v35, %v59_v36  ;;  %v28_v50 = vld [vmem:[%s6526_s0 + $0x38] sm:$0xf] }
  0x16   :  { %v1047_v38 = vor.u32 %v1046_v32, %v1042_v31  ;;  %v1040_v39 = vor.u32 %v1039_v34, %v1035_v33  ;;  %v61_v51 = vld [vmem:[%s6526_s0 + $0x3c] sm:$0x1]  ;;  %v27_v54 = vld [vmem:[%s6526_s0 + $0x30] sm:$0xf]  ;;  %v4345_v0 = vld [vmem:[%s6526_s0 + $0x80] ss:$0 sps:$4 sm:$0xff]  }
  0x17   :  { %v1053_v53 = vrot.slane %v1051_v41, 1  ;;  %v368_v56 = vshll.u32 %v3927_v48, 16  ;;  %v3929_v57 = vcombine.low %v28_v50, %v61_v51  ;;  %v4346_v1 = vld [vmem:[%s6526_s0 + $0x78] ss:$0 sps:$4 sm:$0xff]   ;;  %v3814_v21 = vld [vmem:[%s6526_s0 + $0xb0] sm:$0xf] }
  0x18   :  { %528 = vrot.lane.b32.xlu1 %v3941_v42, %s4596_s7  ;;  %526 = vrot.lane.b32.xlu0 %v3940_v43, %s4596_s7  ;;  %v58_v42 = vld [vmem:[%s6526_s0 + $0x24] sm:$0x1]  ;;  %v4404_v43 = vld [vmem:[%s6527_s1 + $0x8] sm:$0xff]   ;;  %v3942_v24 = vcombine.low %v3814_v21, %v3814_v21  ;;  %vm1326_vm5 = vcmask 162816   ;;  %vm1359_vm6 = vcmask 195584   ;;  %vm1392_vm7 = vcmask 228352  }
  0x19   :  { %4258 = vmatprep.subr.bf16.mxu0 %v4404_v43  ;;  %v1054_v61 = vor.u32 %v1053_v53, %v1049_v47  ;;  %v4407_v8 = vld [vmem:[%s6527_s1 + $0x10] ss:$0 sps:$4 sm:$0x33]   ;;  %v380_v11 = vshrl.u32 %v3929_v57, 16  ;;  %v3815_v20 = vld [vmem:[%s6526_s0 + $0xb8] sm:$0xf] }
  0x1a   :  { %4259 = vmatpush3.bf16.msra.mxu0 %v4404_v43  ;;  %v3846_v25 = vld [vmem:[%s6526_s0 + $0xb4] sm:$0x1]  ;;  %v3817_v26 = vld [vmem:[%s6526_s0 + $0xc8] sm:$0xf]  ;;  %v3849_v32 = vld [vmem:[%s6526_s0 + $0xcc] sm:$0x1] }
  0x1b   :  { %4300 = vmatprep.subr.msk.bf16.mxu0 %vm1550_vm0, %v4407_v8  ;;  %v3848_v33 = vld [vmem:[%s6526_s0 + $0xc4] sm:$0x1]  ;;  %v3977_v34 = vcombine.low %v3817_v26, %v3849_v32  ;;  %v4359_v36 = vld [vmem:[%s6526_s0 + $0x100] ss:$0 sps:$4 sm:$0xff]   ;;  %v4362_v43 = vld [vmem:[%s6526_s0 + $0x108] ss:$0 sps:$4 sm:$0xff]  }
  0x1c   :  { %604 = vrot.lane.b32.xlu1 %v4327_v46, %s4597_s19  ;;  %602 = vrot.lane.b32.xlu0 %v4328_v49, %s4597_s19  ;;  %v1056_v46 = vshrl.u32 %v4021_v27, 16  ;;  %v3926_v49 = vcombine.low %v25_v37, %v58_v42  ;;  %v3816_v27 = vld [vmem:[%s6526_s0 + $0xc0] sm:$0xf]  ;;  %v4360_v37 = vld [vmem:[%s6526_s0 + $0xf8] ss:$0 sps:$4 sm:$0xff]   ;;  %vm1425_vm8 = vcmask 261120  }
  0x1d   :  { %v3944_v31 = vcombine.low %v3816_v27, %v3816_v27  ;;  %v3976_v35 = vcombine.low %v3816_v27, %v3848_v33  ;;  %v29_v32 = vld [vmem:[%s6526_s0 + $0x120] sm:$0xf]  ;;  %v62_v33 = vld [vmem:[%s6526_s0 + $0x124] sm:$0x1]  ;;  %vm1525_vm9 = vcmask 293888   ;;  %vm1651_vm10 = vcmask 27648  }
  0x1e   :  { %v361_v58 = vshll.u32 %v3926_v49, 16  ;;  %vm1653_vm11 = vcmask 24576   ;;  %vm1663_vm12 = vsmask.f32 256  ;;  %vm1725_vm13 = vsmask.f32 7938 }
  0x1f   :  { %v727_v47 = vshll.u32 %v3976_v35, 16  ;;  %vm5477_vm14 = vmand %vm1653_vm11, %vm1663_vm12 }
  0x20   :  { %608 = vrot.lane.b32.xlu1 %v4329_v52, %s4597_s19  ;;  %606 = vrot.lane.b32.xlu0 %v4330_v55, %s4597_s19  ;;  %v1060_v52 = vrot.slane %v1058_v40, 1  ;;  %v60_v55 = vld [vmem:[%s6526_s0 + $0x34] sm:$0x1]  ;;  %v363_v5 = vrot.slane %v361_v58, 1  ;;  %v4361_v40 = vld [vmem:[%s6526_s0 + $0x110] ss:$0 sps:$4 sm:$0xff]   ;;  %vm5487_vm15 = vmand %vm1653_vm11, %vm1725_vm13 }
  0x21   :  { %v3928_v59 = vcombine.low %v27_v54, %v60_v55  ;;  %v729_v53 = vrot.slane %v727_v47, 1  ;;  %v3895_v58 = vld [vmem:[%s6526_s0 + $0x34] sm:$0x1] }
  0x22   :  { %v1061_v60 = vor.u32 %v1060_v52, %v1056_v46  ;;  %v734_v46 = vshll.u32 %v3977_v34, 16 }
  0x23   :  { %v375_v7 = vshll.u32 %v3928_v59, 16 }
  0x24   :  { %796 = vrot.lane.b32.xlu1 %v695_v62, %s4598_s22  ;;  %794 = vrot.lane.b32.xlu0 %v688_v63, %s4598_s22  ;;  %v366_v62 = vshrl.u32 %v3927_v48, 16  ;;  %v359_v63 = vshrl.u32 %v3926_v49, 16  ;;  %v732_v48 = vshrl.u32 %v3977_v34, 16  ;;  %v725_v49 = vshrl.u32 %v3976_v35, 16  ;;  %v4375_v34 = vld [vmem:[%s6526_s0 + $0x170] ss:$0 sps:$4 sm:$0xff]  }
  0x25   :  { %v377_v17 = vrot.slane %v375_v7, 1  ;;  %v736_v52 = vrot.slane %v734_v46, 1  ;;  %v3896_v7 = vld [vmem:[%s6526_s0 + $0x3c] sm:$0x1] }
  0x26   :  { %v364_v15 = vor.u32 %v363_v5, %v359_v63  ;;  %v730_v55 = vor.u32 %v729_v53, %v725_v49  ;;  %v3864_v63 = vld [vmem:[%s6526_s0 + $0x38] sm:$0xf]  ;;  %v3897_v5 = vld [vmem:[%s6526_s0 + $0x44] sm:$0x1] }
  0x27   :  { %v737_v54 = vor.u32 %v736_v52, %v732_v48 }
  0x28   :  { %800 = vrot.lane.b32.xlu1 %v709_v2, %s4598_s22  ;;  %798 = vrot.lane.b32.xlu0 %v702_v3, %s4598_s22  ;;  %v370_v2 = vrot.slane %v368_v56, 1  ;;  %v382_v3 = vshll.u32 %v3929_v57, 16  ;;  %v3863_v56 = vld [vmem:[%s6526_s0 + $0x30] sm:$0xf]  ;;  %v3862_v57 = vld [vmem:[%s6526_s0 + $0x28] sm:$0xf] }
  0x2a   :  { %v371_v14 = vor.u32 %v370_v2, %v366_v62  ;;  %v384_v16 = vrot.slane %v382_v3, 1  ;;  %v3865_v62 = vld [vmem:[%s6526_s0 + $0x40] sm:$0xf]  ;;  %v3992_v3 = vcombine.low %v3864_v63, %v3864_v63 }
  0x2b   :  { %v3993_v2 = vcombine.low %v3865_v62, %v3865_v62 }
  0x2c   :  { %876 = vrot.lane.b32.xlu1 %v3987_v9, %s4599_s12  ;;  %874 = vrot.lane.b32.xlu0 %v3986_v13, %s4599_s12  ;;  %v1552_v9 = vsel %vm1550_vm0, %v4407_v8, 0  ;;  %v373_v13 = vshrl.u32 %v3928_v59, 16  ;;  %v3991_v59 = vcombine.low %v3863_v56, %v3863_v56  ;;  %v4371_v8 = vld [vmem:[%s6526_s0 + $0x78] ss:$0 sps:$4 sm:$0xff]  }
  0x2d   :  { %4261 = vmatpush3.bf16.msra.mxu0 %v1552_v9  ;;  %v4372_v9 = vld [vmem:[%s6526_s0 + $0x70] ss:$0 sps:$4 sm:$0xff]  }
  0x30   :  { %880 = vrot.lane.b32.xlu1 %v3989_v18, %s4599_s12  ;;  %878 = vrot.lane.b32.xlu0 %v3988_v19, %s4599_s12  ;;  %v385_v18 = vor.u32 %v384_v16, %v380_v11  ;;  %v378_v19 = vor.u32 %v377_v17, %v373_v13  ;;  %v4373_v16 = vld [vmem:[%s6526_s0 + $0x88] ss:$0 sps:$4 sm:$0xff]  }
  0x34   :  { %956 = vrot.lane.b32.xlu1 %v4339_v22, %s4600_s29  ;;  %954 = vrot.lane.b32.xlu0 %v4340_v23, %s4600_s29  ;;  %v3847_v22 = vld [vmem:[%s6526_s0 + $0xbc] sm:$0x1]  ;;  %v3943_v23 = vcombine.low %v3815_v20, %v3815_v20 }
  0x35   :  { %v3975_v28 = vcombine.low %v3815_v20, %v3847_v22 }
  0x37   :  { %v718_v41 = vshrl.u32 %v3975_v28, 16 }
  0x38   :  { %960 = vrot.lane.b32.xlu1 %v4341_v29, %s4600_s29  ;;  %958 = vrot.lane.b32.xlu0 %v4342_v30, %s4600_s29  ;;  %v3974_v29 = vcombine.low %v3814_v21, %v3846_v25  ;;  %v3945_v30 = vcombine.low %v3817_v26, %v3817_v26 }
  0x3a   :  { %v711_v42 = vshrl.u32 %v3974_v29, 16 }
  0x3c   :  { %1148 = vrot.lane.b32.xlu1 %v1047_v38, %s4601_s8  ;;  %1146 = vrot.lane.b32.xlu0 %v1040_v39, %s4601_s8  ;;  %v720_v38 = vshll.u32 %v3975_v28, 16  ;;  %v713_v39 = vshll.u32 %v3974_v29, 16  ;;  %v30_v29 = vld [vmem:[%s6526_s0 + $0x128] sm:$0xf] }
  0x40   :  { %228 = vrot.lane.b32.xlu1 %v4343_v44, %s4594_s24  ;;  %226 = vrot.lane.b32.xlu0 %v4344_v45, %s4594_s24  ;;  %v722_v44 = vrot.slane %v720_v38, 1  ;;  %v715_v45 = vrot.slane %v713_v39, 1  ;;  %v4376_v39 = vld [vmem:[%s6526_s0 + $0x168] ss:$0 sps:$4 sm:$0xff]  }
  0x42   :  { %v723_v50 = vor.u32 %v722_v44, %v718_v41  ;;  %v716_v51 = vor.u32 %v715_v45, %v711_v42  ;;  %v3930_v41 = vcombine.low %v29_v32, %v62_v33  ;;  %v32_v42 = vld [vmem:[%s6526_s0 + $0x138] sm:$0xf]  ;;  %v31_v44 = vld [vmem:[%s6526_s0 + $0x130] sm:$0xf]  ;;  %v64_v45 = vld [vmem:[%s6526_s0 + $0x134] sm:$0x1] }
  0x43   :  { %v3932_v53 = vcombine.low %v31_v44, %v64_v45 }
  0x44   :  { %1152 = vrot.lane.b32.xlu1 %v1061_v60, %s4601_s8  ;;  %1150 = vrot.lane.b32.xlu0 %v1054_v61, %s4601_s8  ;;  %v3990_v60 = vcombine.low %v3862_v57, %v3862_v57  ;;  %v3894_v61 = vld [vmem:[%s6526_s0 + $0x2c] sm:$0x1] }
  0x48   :  { %232 = vrot.lane.b32.xlu1 %v4345_v0, %s4594_s24  ;;  %230 = vrot.lane.b32.xlu0 %v4346_v1, %s4594_s24  ;;  %v4023_v0 = vcombine.low %v3863_v56, %v3895_v58  ;;  %v4022_v1 = vcombine.low %v3862_v57, %v3894_v61  ;;  %v4377_v56 = vld [vmem:[%s6526_s0 + $0x180] ss:$0 sps:$4 sm:$0xff]   ;;  %v387_v58 = vshrl.u32 %v3930_v41, 16 }
  0x4a   :  { %v1072_v11 = vshll.u32 %v4023_v0, 16  ;;  %v1065_v13 = vshll.u32 %v4022_v1, 16  ;;  %v1063_v21 = vshrl.u32 %v4022_v1, 16 }
  0x4c   :  { %452 = vrot.lane.b32.xlu1 %v371_v14, %s4595_s18  ;;  %450 = vrot.lane.b32.xlu0 %v364_v15, %s4595_s18  ;;  %v4025_v14 = vcombine.low %v3865_v62, %v3897_v5  ;;  %v4024_v15 = vcombine.low %v3864_v63, %v3896_v7  ;;  %v1074_v20 = vrot.slane %v1072_v11, 1  ;;  %v1067_v22 = vrot.slane %v1065_v13, 1 }
  0x4d   :  { %v403_v63 = vshll.u32 %v3932_v53, 16 }
  0x4e   :  { %v1079_v25 = vshll.u32 %v4024_v15, 16  ;;  %v1068_v28 = vor.u32 %v1067_v22, %v1063_v21  ;;  %v1084_v35 = vshrl.u32 %v4025_v14, 16  ;;  %v3851_v21 = vld [vmem:[%s6526_s0 + $0x1bc] sm:$0x1] }
  0x50   :  { %456 = vrot.lane.b32.xlu1 %v385_v18, %s4595_s18  ;;  %454 = vrot.lane.b32.xlu0 %v378_v19, %s4595_s18  ;;  %v4374_v18 = vld [vmem:[%s6526_s0 + $0x80] ss:$0 sps:$4 sm:$0xff]   ;;  %v1070_v19 = vshrl.u32 %v4023_v0, 16  ;;  %v1081_v38 = vrot.slane %v1079_v25, 1  ;;  %v3850_v25 = vld [vmem:[%s6526_s0 + $0x1b4] sm:$0x1] }
  0x52   :  { %v1075_v27 = vor.u32 %v1074_v20, %v1070_v19 }
  0x54   :  { %532 = vrot.lane.b32.xlu1 %v3943_v23, %s4596_s7  ;;  %530 = vrot.lane.b32.xlu0 %v3942_v24, %s4596_s7  ;;  %v1086_v24 = vshll.u32 %v4025_v14, 16 }
  0x58   :  { %536 = vrot.lane.b32.xlu1 %v3945_v30, %s4596_s7  ;;  %534 = vrot.lane.b32.xlu0 %v3944_v31, %s4596_s7  ;;  %v63_v31 = vld [vmem:[%s6526_s0 + $0x12c] sm:$0x1] }
  0x5c   :  { %612 = vrot.lane.b32.xlu1 %v4359_v36, %s4597_s19  ;;  %610 = vrot.lane.b32.xlu0 %v4360_v37, %s4597_s19  ;;  %v1088_v36 = vrot.slane %v1086_v24, 1  ;;  %v1077_v37 = vshrl.u32 %v4024_v15, 16 }
  0x5e   :  { %v1089_v48 = vor.u32 %v1088_v36, %v1084_v35  ;;  %v1082_v49 = vor.u32 %v1081_v38, %v1077_v37  ;;  %v3853_v36 = vld [vmem:[%s6526_s0 + $0x1cc] sm:$0x1]  ;;  %v3852_v37 = vld [vmem:[%s6526_s0 + $0x1c4] sm:$0x1] }
  0x60   :  { %616 = vrot.lane.b32.xlu1 %v4361_v40, %s4597_s19  ;;  %614 = vrot.lane.b32.xlu0 %v4362_v43, %s4597_s19  ;;  %v3931_v40 = vcombine.low %v30_v29, %v63_v31  ;;  %v65_v43 = vld [vmem:[%s6526_s0 + $0x13c] sm:$0x1] }
  0x61   :  { %v3933_v52 = vcombine.low %v32_v42, %v65_v43  ;;  %v4391_v42 = vld [vmem:[%s6526_s0 + $0x200] ss:$0 sps:$4 sm:$0xff]   ;;  %v4392_v43 = vld [vmem:[%s6526_s0 + $0x1f8] ss:$0 sps:$4 sm:$0xff]  }
  0x62   :  { %v394_v57 = vshrl.u32 %v3931_v40, 16 }
  0x63   :  { %v410_v62 = vshll.u32 %v3933_v52, 16 }
  0x64   :  { %804 = vrot.lane.b32.xlu1 %v723_v50, %s4598_s22  ;;  %802 = vrot.lane.b32.xlu0 %v716_v51, %s4598_s22  ;;  %v396_v50 = vshll.u32 %v3931_v40, 16  ;;  %v389_v51 = vshll.u32 %v3930_v41, 16 }
  0x66   :  { %v391_v61 = vrot.slane %v389_v51, 1 }
  0x68   :  { %808 = vrot.lane.b32.xlu1 %v737_v54, %s4598_s22  ;;  %806 = vrot.lane.b32.xlu0 %v730_v55, %s4598_s22  ;;  %v392_v7 = vor.u32 %v391_v61, %v387_v58 }
  0x6c   :  { %884 = vrot.lane.b32.xlu1 %v3991_v59, %s4599_s12  ;;  %882 = vrot.lane.b32.xlu0 %v3990_v60, %s4599_s12  ;;  %v4378_v59 = vld [vmem:[%s6526_s0 + $0x178] ss:$0 sps:$4 sm:$0xff]   ;;  %v398_v60 = vrot.slane %v396_v50, 1  ;;  %v4393_v50 = vld [vmem:[%s6526_s0 + $0x210] ss:$0 sps:$4 sm:$0xff]  }
  0x6e   :  { %v399_v5 = vor.u32 %v398_v60, %v394_v57 }
  0x70   :  { %888 = vrot.lane.b32.xlu1 %v3993_v2, %s4599_s12  ;;  %886 = vrot.lane.b32.xlu0 %v3992_v3, %s4599_s12  ;;  %v408_v2 = vshrl.u32 %v3933_v52, 16  ;;  %v401_v3 = vshrl.u32 %v3932_v53, 16  ;;  %v4394_v53 = vld [vmem:[%s6526_s0 + $0x208] ss:$0 sps:$4 sm:$0xff]  }
  0x74   :  { %964 = vrot.lane.b32.xlu1 %v4371_v8, %s4600_s29  ;;  %962 = vrot.lane.b32.xlu0 %v4372_v9, %s4600_s29  ;;  %v4927_v17 = vpop.permute.xlu1 %222  ;;  %v4932_v23 = vpop.permute.xlu0 %218  ;;  %v412_v8 = vrot.slane %v410_v62, 1  ;;  %v405_v9 = vrot.slane %v403_v63, 1 }
  0x76   :  { %v413_v14 = vor.u32 %v412_v8, %v408_v2  ;;  %v406_v15 = vor.u32 %v405_v9, %v401_v3 }
  0x78   :  { %968 = vrot.lane.b32.xlu1 %v4373_v16, %s4600_s29  ;;  %966 = vrot.lane.b32.xlu0 %v4374_v18, %s4600_s29  ;;  %v4936_v26 = vpop.permute.xlu1 %224  ;;  %v4941_v30 = vpop.permute.xlu0 %220  ;;  %v3819_v16 = vld [vmem:[%s6526_s0 + $0x1b8] sm:$0xf]  ;;  %v3818_v18 = vld [vmem:[%s6526_s0 + $0x1b0] sm:$0xf] }
  0x79   :  { %v3947_v22 = vcombine.low %v3819_v16, %v3819_v16  ;;  %v3946_v24 = vcombine.low %v3818_v18, %v3818_v18  ;;  %v3979_v32 = vcombine.low %v3819_v16, %v3851_v21  ;;  %v3978_v33 = vcombine.low %v3818_v18, %v3850_v25  ;;  %v3867_v16 = vld [vmem:[%s6526_s0 + $0x130] sm:$0xf]  ;;  %v3866_v18 = vld [vmem:[%s6526_s0 + $0x128] sm:$0xf] }
  0x7a   :  { %v3995_v25 = vcombine.low %v3867_v16, %v3867_v16 }
  0x7b   :  { %v748_v44 = vshll.u32 %v3979_v32, 16  ;;  %v741_v45 = vshll.u32 %v3978_v33, 16  ;;  %v746_v51 = vshrl.u32 %v3979_v32, 16  ;;  %v739_v52 = vshrl.u32 %v3978_v33, 16  ;;  %v3898_v32 = vld [vmem:[%s6526_s0 + $0x12c] sm:$0x1] }
  0x7c   :  { %1156 = vrot.lane.b32.xlu1 %v1075_v27, %s4601_s8  ;;  %1154 = vrot.lane.b32.xlu0 %v1068_v28, %s4601_s8  ;;  %v3821_v27 = vld [vmem:[%s6526_s0 + $0x1c8] sm:$0xf]  ;;  %v3820_v28 = vld [vmem:[%s6526_s0 + $0x1c0] sm:$0xf]  ;;  %v3994_v33 = vcombine.low %v3866_v18, %v3866_v18 }
  0x7d   :  { %v3948_v35 = vcombine.low %v3820_v28, %v3820_v28  ;;  %v3981_v40 = vcombine.low %v3821_v27, %v3853_v36  ;;  %v3980_v41 = vcombine.low %v3820_v28, %v3852_v37  ;;  %v743_v57 = vrot.slane %v741_v45, 1 }
  0x7e   :  { %v4972_v46 = vpop.permute.xlu1 %444  ;;  %v4974_v47 = vpop.permute.xlu0 %442  ;;  %v1184_v28 = vsel %vm1178_vm1, %v4649_v4, %v4941_v30 }
  0x7f   :  { %v762_v58 = vshll.u32 %v3981_v40, 16  ;;  %v760_v62 = vshrl.u32 %v3981_v40, 16  ;;  %v753_v63 = vshrl.u32 %v3980_v41, 16  ;;  %v744_v3 = vor.u32 %v743_v57, %v739_v52  ;;  %v3901_v52 = vld [vmem:[%s6526_s0 + $0x144] sm:$0x1] }
  0x80   :  { %236 = vrot.lane.b32.xlu1 %v4375_v34, %s4594_s24  ;;  %234 = vrot.lane.b32.xlu0 %v4376_v39, %s4594_s24  ;;  %v3949_v34 = vcombine.low %v3821_v27, %v3821_v27  ;;  %v1181_v27 = vsel %vm1178_vm1, %v4658_v6, %v4932_v23  ;;  %v1231_v6 = vsel %vm1227_vm2, %v1184_v28, %v4972_v46  ;;  %v3868_v23 = vld [vmem:[%s6526_s0 + $0x138] sm:$0xf] }
  0x81   :  { %v1229_v4 = vsel %vm1227_vm2, %v1181_v27, %v4974_v47  ;;  %v1187_v57 = vsel %vm1178_vm1, %v4676_v12, %v4927_v17 }
  0x82   :  { %v4978_v54 = vpop.permute.xlu1 %448  ;;  %v4980_v55 = vpop.permute.xlu0 %446 }
  0x84   :  { %1160 = vrot.lane.b32.xlu1 %v1089_v48, %s4601_s8  ;;  %1158 = vrot.lane.b32.xlu0 %v1082_v49, %s4601_s8 }
  0x86   :  { %v4990_v0 = vpop.permute.xlu1 %524  ;;  %v4992_v1 = vpop.permute.xlu0 %522 }
  0x87   :  { %v1264_v30 = vsel %vm1260_vm3, %v1231_v6, %v4990_v0  ;;  %v67_v6 = vld [vmem:[%s6526_s0 + $0x14c] sm:$0x1] }
  0x88   :  { %240 = vrot.lane.b32.xlu1 %v4377_v56, %s4594_s24  ;;  %238 = vrot.lane.b32.xlu0 %v4378_v59, %s4594_s24  ;;  %v750_v56 = vrot.slane %v748_v44, 1  ;;  %v755_v59 = vshll.u32 %v3980_v41, 16  ;;  %v5110_v41 = vcombine.low %v3866_v18, %v3898_v32 }
  0x8a   :  { %v4996_v11 = vpop.permute.xlu1 %528  ;;  %v4998_v13 = vpop.permute.xlu0 %526  ;;  %v751_v2 = vor.u32 %v750_v56, %v746_v51 }
  0x8c   :  { %460 = vrot.lane.b32.xlu1 %v399_v5, %s4595_s18  ;;  %458 = vrot.lane.b32.xlu0 %v392_v7, %s4595_s18  ;;  %v764_v5 = vrot.slane %v762_v58, 1  ;;  %v757_v7 = vrot.slane %v755_v59, 1  ;;  %v1190_v58 = vsel %vm1178_vm1, %v4668_v10, %v4936_v26  ;;  %v1233_v10 = vsel %vm1227_vm2, %v1187_v57, %v4980_v55 }
  0x8d   :  { %v1235_v12 = vsel %vm1227_vm2, %v1190_v58, %v4978_v54  ;;  %v1266_v26 = vsel %vm1260_vm3, %v1233_v10, %v4998_v13  ;;  %v4412_v58 = vld [vmem:[%s6526_s0 + $0x1a0] ss:$0 sps:$4 sm:$0xff]  }
  0x8e   :  { %v5008_v19 = vpop.permute.xlu1 %604  ;;  %v5010_v20 = vpop.permute.xlu0 %602  ;;  %v1268_v17 = vsel %vm1260_vm3, %v1235_v12, %v4996_v11  ;;  %v1091_v11 = vshrl.u32 %v5110_v41, 16 }
  0x8f   :  { %v1297_v46 = vsel %vm1293_vm4, %v1264_v30, %v5008_v19 }
  0x90   :  { %464 = vrot.lane.b32.xlu1 %v413_v14, %s4595_s18  ;;  %462 = vrot.lane.b32.xlu0 %v406_v15, %s4595_s18  ;;  %v765_v14 = vor.u32 %v764_v5, %v760_v62  ;;  %v758_v15 = vor.u32 %v757_v7, %v753_v63  ;;  %v1093_v62 = vshll.u32 %v5110_v41, 16  ;;  %v4411_v41 = vld [vmem:[%s6526_s0 + $0x188] ss:$0 sps:$4 sm:$0xff]  }
  0x92   :  { %v5026_v29 = vpop.permute.xlu1 %608  ;;  %v5028_v31 = vpop.permute.xlu0 %606 }
  0x93   :  { %v1301_v54 = vsel %vm1293_vm4, %v1268_v17, %v5026_v29  ;;  %v1299_v55 = vsel %vm1293_vm4, %v1266_v26, %v5028_v31  ;;  %v4408_v29 = vld [vmem:[%s6526_s0 + $0x188] ss:$0 sps:$4 sm:$0xff]   ;;  %v4409_v31 = vld [vmem:[%s6526_s0 + $0x180] ss:$0 sps:$4 sm:$0xff]  }
  0x94   :  { %540 = vrot.lane.b32.xlu1 %v3947_v22, %s4596_s7  ;;  %538 = vrot.lane.b32.xlu0 %v3946_v24, %s4596_s7  ;;  %v3899_v24 = vld [vmem:[%s6526_s0 + $0x134] sm:$0x1] }
  0x95   :  { %v5104_v40 = vcombine.low %v3867_v16, %v3899_v24  ;;  %v1095_v16 = vrot.slane %v1093_v62, 1 }
  0x96   :  { %v5038_v38 = vpop.permute.xlu1 %796  ;;  %v5040_v39 = vpop.permute.xlu0 %794 }
  0x97   :  { %v1330_v0 = vsel %vm1326_vm5, %v1297_v46, %v5038_v38  ;;  %v1100_v56 = vshll.u32 %v5104_v40, 16  ;;  %v1098_v7 = vshrl.u32 %v5104_v40, 16 }
  0x98   :  { %544 = vrot.lane.b32.xlu1 %v3949_v34, %s4596_s7  ;;  %542 = vrot.lane.b32.xlu0 %v3948_v35, %s4596_s7  ;;  %v3869_v34 = vld [vmem:[%s6526_s0 + $0x140] sm:$0xf]  ;;  %v1262_v35 = vsel %vm1260_vm3, %v1229_v4, %v4992_v1 }
  0x99   :  { %v1295_v47 = vsel %vm1293_vm4, %v1262_v35, %v5010_v20  ;;  %v4029_v63 = vcombine.low %v3869_v34, %v3901_v52  ;;  %v5198_v4 = vld [vmem:[%s6526_s0 + $0x140] sm:$0xf] }
  0x9a   :  { %v5050_v48 = vpop.permute.xlu1 %800  ;;  %v5052_v49 = vpop.permute.xlu0 %798  ;;  %v1328_v1 = vsel %vm1326_vm5, %v1295_v47, %v5040_v39 }
  0x9b   :  { %v1334_v13 = vsel %vm1326_vm5, %v1301_v54, %v5050_v48  ;;  %v1114_v28 = vshll.u32 %v4029_v63, 16 }
  0x9c   :  { %620 = vrot.lane.b32.xlu1 %v4391_v42, %s4597_s19  ;;  %618 = vrot.lane.b32.xlu0 %v4392_v43, %s4597_s19  ;;  %v3997_v42 = vcombine.low %v3869_v34, %v3869_v34  ;;  %v3996_v43 = vcombine.low %v3868_v23, %v3868_v23  ;;  %v1096_v34 = vor.u32 %v1095_v16, %v1091_v11  ;;  %v3823_v16 = vld [vmem:[%s6526_s0 + $0x1d8] sm:$0xf] }
  0x9d   :  { %v1116_v40 = vrot.slane %v1114_v28, 1  ;;  %v3824_v28 = vld [vmem:[%s6526_s0 + $0x1e0] sm:$0xf] }
  0x9e   :  { %v877_v60 = vpop.permute.xlu1 %876  ;;  %v875_v61 = vpop.permute.xlu0 %874 }
  0x9f   :  { %v1363_v19 = vsel %vm1359_vm6, %v1330_v0, %v877_v60  ;;  %v1361_v44 = vsel %vm1359_vm6, %v1328_v1, %v875_v61  ;;  %v4405_v60 = vld [vmem:[%s6526_s0 + $0x178] ss:$0 sps:$4 sm:$0xff]   ;;  %v4406_v61 = vld [vmem:[%s6526_s0 + $0x170] ss:$0 sps:$4 sm:$0xff]  }
  0xa0   :  { %624 = vrot.lane.b32.xlu1 %v4393_v50, %s4597_s19  ;;  %622 = vrot.lane.b32.xlu0 %v4394_v53, %s4597_s19  ;;  %v3900_v53 = vld [vmem:[%s6526_s0 + $0x13c] sm:$0x1]  ;;  %v5221_v1 = vld [vmem:[%s6526_s0 + $0x158] sm:$0xf] }
  0xa2   :  { %v5064_v8 = vpop.permute.xlu1 %880  ;;  %v5066_v9 = vpop.permute.xlu0 %878 }
  0xa3   :  { %v1367_v48 = vsel %vm1359_vm6, %v1334_v13, %v5064_v8 }
  0xa4   :  { %812 = vrot.lane.b32.xlu1 %v751_v2, %s4598_s22  ;;  %810 = vrot.lane.b32.xlu0 %v744_v3, %s4598_s22  ;;  %v4028_v2 = vcombine.low %v3868_v23, %v3900_v53  ;;  %v66_v23 = vld [vmem:[%s6526_s0 + $0x144] sm:$0x1] }
  0xa5   :  { %v3934_v0 = vcombine.low %v5198_v4, %v66_v23  ;;  %v3952_v23 = vcombine.low %v3824_v28, %v3824_v28 }
  0xa6   :  { %v957_v21 = vpop.permute.xlu1 %956  ;;  %v955_v22 = vpop.permute.xlu0 %954  ;;  %v1107_v32 = vshll.u32 %v4028_v2, 16  ;;  %v1105_v46 = vshrl.u32 %v4028_v2, 16 }
  0xa7   :  { %v1396_v20 = vsel %vm1392_vm7, %v1363_v19, %v957_v21  ;;  %v1394_v45 = vsel %vm1392_vm7, %v1361_v44, %v955_v22  ;;  %v5229_v19 = vld [vmem:[%s6526_s0 + $0x150] sm:$0xf]  ;;  %v68_v44 = vld [vmem:[%s6526_s0 + $0x154] sm:$0x1] }
  0xa8   :  { %816 = vrot.lane.b32.xlu1 %v765_v14, %s4598_s22  ;;  %814 = vrot.lane.b32.xlu0 %v758_v15, %s4598_s22  ;;  %v1332_v14 = vsel %vm1326_vm5, %v1299_v55, %v5052_v49  ;;  %v1102_v15 = vrot.slane %v1100_v56, 1  ;;  %v1109_v47 = vrot.slane %v1107_v32, 1  ;;  %v3936_v53 = vcombine.low %v5229_v19, %v68_v44  ;;  %v4427_v44 = vld [vmem:[%s6526_s0 + $0x218] ss:$0 sps:$4 sm:$0xff]  }
  0xa9   :  { %v1365_v49 = vsel %vm1359_vm6, %v1332_v14, %v5066_v9  ;;  %v5190_v9 = vld [vmem:[%s6526_s0 + $0x148] sm:$0xf] }
  0xaa   :  { %v961_v36 = vpop.permute.xlu1 %960  ;;  %v959_v37 = vpop.permute.xlu0 %958  ;;  %v1103_v8 = vor.u32 %v1102_v15, %v1098_v7  ;;  %v431_v17 = vshll.u32 %v3936_v53, 16  ;;  %v429_v54 = vshrl.u32 %v3936_v53, 16 }
  0xab   :  { %v1400_v18 = vsel %vm1392_vm7, %v1367_v48, %v961_v36  ;;  %v1398_v21 = vsel %vm1392_vm7, %v1365_v49, %v959_v37  ;;  %v4410_v36 = vld [vmem:[%s6526_s0 + $0x190] ss:$0 sps:$4 sm:$0xff]   ;;  %v1112_v37 = vshrl.u32 %v4029_v63, 16 }
  0xac   :  { %892 = vrot.lane.b32.xlu1 %v3995_v25, %s4599_s12  ;;  %890 = vrot.lane.b32.xlu0 %v3994_v33, %s4599_s12  ;;  %v433_v13 = vrot.slane %v431_v17, 1  ;;  %v3822_v48 = vld [vmem:[%s6526_s0 + $0x1d0] sm:$0xf] }
  0xae   :  { %v1149_v50 = vpop.permute.xlu1 %1148  ;;  %v1147_v51 = vpop.permute.xlu0 %1146  ;;  %v434_v15 = vor.u32 %v433_v13, %v429_v54 }
  0xaf   :  { %v1429_v38 = vsel %vm1425_vm8, %v1396_v20, %v1149_v50  ;;  %v1427_v39 = vsel %vm1425_vm8, %v1394_v45, %v1147_v51  ;;  %v1117_v50 = vor.u32 %v1116_v40, %v1112_v37  ;;  %v1110_v51 = vor.u32 %v1109_v47, %v1105_v46  ;;  %v3856_v37 = vld [vmem:[%s6526_s0 + $0x1e4] sm:$0x1] }
  0xb0   :  { %896 = vrot.lane.b32.xlu1 %v3997_v42, %s4599_s12  ;;  %894 = vrot.lane.b32.xlu0 %v3996_v43, %s4599_s12  ;;  %v4035_v59 = vcombine.low %v1427_v39, %v1429_v38  ;;  %v3935_v42 = vcombine.low %v5190_v9, %v67_v6  ;;  %v69_v43 = vld [vmem:[%s6526_s0 + $0x15c] sm:$0x1]  ;;  %v417_v39 = vshll.u32 %v3934_v0, 16 }
  0xb1   :  { %v3937_v52 = vcombine.low %v5221_v1, %v69_v43  ;;  %v4426_v43 = vld [vmem:[%s6526_s0 + $0x220] ss:$0 sps:$4 sm:$0xff]  }
  0xb2   :  { %v5154_v3 = vpop.permute.xlu1 %228  ;;  %4262 = vmatprep.mubr.msk.bf16.mxu0 %vm1525_vm9, %v4035_v59  ;;  %v5157_v5 = vpop.permute.xlu0 %226  ;;  %v424_v38 = vshll.u32 %v3935_v42, 16  ;;  %v422_v59 = vshrl.u32 %v3935_v42, 16  ;;  %v419_v12 = vrot.slane %v417_v39, 1 }
  0xb3   :  { %v438_v10 = vshll.u32 %v3937_v52, 16  ;;  %v436_v2 = vshrl.u32 %v3937_v52, 16 }
  0xb4   :  { %972 = vrot.lane.b32.xlu1 %v4405_v60, %s4600_s29  ;;  %970 = vrot.lane.b32.xlu0 %v4406_v61, %s4600_s29  ;;  %v415_v60 = vshrl.u32 %v3934_v0, 16  ;;  %v4413_v61 = vld [vmem:[%s6526_s0 + $0x198] ss:$0 sps:$4 sm:$0xff]   ;;  %v426_v62 = vrot.slane %v424_v38, 1  ;;  %v3984_v0 = vcombine.low %v3824_v28, %v3856_v37 }
  0xb5   :  { %v440_v11 = vrot.slane %v438_v10, 1 }
  0xb6   :  { %v1153_v22 = vpop.permute.xlu1 %1152  ;;  %v1151_v24 = vpop.permute.xlu0 %1150  ;;  %v427_v55 = vor.u32 %v426_v62, %v422_v59  ;;  %v420_v7 = vor.u32 %v419_v12, %v415_v60  ;;  %v4429_v59 = vld [vmem:[%s6526_s0 + $0x228] ss:$0 sps:$4 sm:$0xff]  }
  0xb7   :  { %v1433_v25 = vsel %vm1425_vm8, %v1400_v18, %v1153_v22  ;;  %v1431_v27 = vsel %vm1425_vm8, %v1398_v21, %v1151_v24  ;;  %v3855_v21 = vld [vmem:[%s6526_s0 + $0x1dc] sm:$0x1]  ;;  %v3951_v22 = vcombine.low %v3823_v16, %v3823_v16  ;;  %v3854_v24 = vld [vmem:[%s6526_s0 + $0x1d4] sm:$0x1] }
  0xb8   :  { %v4036_v33 = vcombine.low %v1431_v27, %v1433_v25  ;;  %976 = vrot.lane.b32.xlu1 %v4408_v29, %s4600_s29  ;;  %974 = vrot.lane.b32.xlu0 %v4409_v31, %s4600_s29  ;;  %v441_v31 = vor.u32 %v440_v11, %v436_v2  ;;  %v3950_v25 = vcombine.low %v3822_v48, %v3822_v48  ;;  %v3825_v27 = vld [vmem:[%s6526_s0 + $0x1e8] sm:$0xf] }
  0xb9   :  { %v3953_v6 = vcombine.low %v3825_v27, %v3825_v27 }
  0xba   :  { %v5203_v30 = vpop.permute.xlu1 %232  ;;  %4263 = vmatmul.mubr.msk.bf16.vlgmr.msra.gmra.mrb[0].mxu0 %vm1525_vm9, %v4036_v33  ;;  %v5206_v35 = vpop.permute.xlu0 %230 }
  0xbc   :  { %1164 = vrot.lane.b32.xlu1 %v1103_v8, %s4601_s8  ;;  %1162 = vrot.lane.b32.xlu0 %v1096_v34, %s4601_s8  ;;  %v3983_v8 = vcombine.low %v3823_v16, %v3855_v21  ;;  %v3982_v34 = vcombine.low %v3822_v48, %v3854_v24  ;;  %v3871_v16 = vld [vmem:[%s6526_s0 + $0x150] sm:$0xf]  ;;  %v3870_v48 = vld [vmem:[%s6526_s0 + $0x148] sm:$0xf] }
  0xbd   :  { %v3903_v24 = vld [vmem:[%s6526_s0 + $0x154] sm:$0x1] }
  0xbe   :  { %v5234_v20 = vpop.permute.xlu1 %452  ;;  %v5236_v45 = vpop.permute.xlu0 %450  ;;  %v776_v47 = vshll.u32 %v3983_v8, 16  ;;  %v774_v38 = vshrl.u32 %v3983_v8, 16  ;;  %v767_v52 = vshrl.u32 %v3982_v34, 16  ;;  %v4573_v8 = vld [vmem:[%s6526_s0 + $0x20] sm:$0xf] }
  0xc0   :  { %244 = vrot.lane.b32.xlu1 %v4410_v36, %s4594_s24  ;;  %242 = vrot.lane.b32.xlu0 %v4411_v41, %s4594_s24  ;;  %v3857_v36 = vld [vmem:[%s6526_s0 + $0x1ec] sm:$0x1]  ;;  %v769_v41 = vshll.u32 %v3982_v34, 16  ;;  %v778_v39 = vrot.slane %v776_v47, 1  ;;  %v1193_v34 = vsel %vm1178_vm1, %v4573_v8, %v5157_v5  ;;  %v3872_v5 = vld [vmem:[%s6526_s0 + $0x158] sm:$0xf] }
  0xc1   :  { %v3985_v42 = vcombine.low %v3825_v27, %v3857_v36  ;;  %v4572_v27 = vld [vmem:[%s6526_s0 + $0x28] sm:$0xf]  ;;  %v1237_v37 = vsel %vm1227_vm2, %v1193_v34, %v5236_v45 }
  0xc2   :  { %v5242_v56 = vpop.permute.xlu1 %456  ;;  %v5244_v57 = vpop.permute.xlu0 %454  ;;  %v771_v53 = vrot.slane %v769_v41, 1  ;;  %v779_v10 = vor.u32 %v778_v39, %v774_v38  ;;  %v1196_v28 = vsel %vm1178_vm1, %v4572_v27, %v5154_v3  ;;  %v3873_v3 = vld [vmem:[%s6526_s0 + $0x160] sm:$0xf]  ;;  %v3905_v38 = vld [vmem:[%s6526_s0 + $0x164] sm:$0x1] }
  0xc3   :  { %v790_v60 = vshll.u32 %v3985_v42, 16  ;;  %v788_v2 = vshrl.u32 %v3985_v42, 16  ;;  %v1239_v36 = vsel %vm1227_vm2, %v1196_v28, %v5234_v20  ;;  %v4001_v39 = vcombine.low %v3873_v3, %v3873_v3  ;;  %v4440_v34 = vld [vmem:[%s6526_s0 + $0x1a8] ss:$0 sps:$4 sm:$0xff]  }
  0xc4   :  { %1168 = vrot.lane.b32.xlu1 %v1117_v50, %s4601_s8  ;;  %1166 = vrot.lane.b32.xlu0 %v1110_v51, %s4601_s8  ;;  %v772_v17 = vor.u32 %v771_v53, %v767_v52 }
  0xc5   :  { %v792_v54 = vrot.slane %v790_v60, 1 }
  0xc6   :  { %v5254_v26 = vpop.permute.xlu1 %532  ;;  %v5256_v63 = vpop.permute.xlu0 %530 }
  0xc7   :  { %v1272_v47 = vsel %vm1260_vm3, %v1239_v36, %v5254_v26  ;;  %v1270_v41 = vsel %vm1260_vm3, %v1237_v37, %v5256_v63 }
  0xc8   :  { %248 = vrot.lane.b32.xlu1 %v4412_v58, %s4594_s24  ;;  %246 = vrot.lane.b32.xlu0 %v4413_v61, %s4594_s24  ;;  %v4428_v58 = vld [vmem:[%s6526_s0 + $0x230] ss:$0 sps:$4 sm:$0xff]   ;;  %v783_v61 = vshll.u32 %v3984_v0, 16 }
  0xca   :  { %v5260_v14 = vpop.permute.xlu1 %536  ;;  %v5262_v29 = vpop.permute.xlu0 %534 }
  0xcc   :  { %468 = vrot.lane.b32.xlu1 %v427_v55, %s4595_s18  ;;  %466 = vrot.lane.b32.xlu0 %v420_v7, %s4595_s18  ;;  %v781_v55 = vshrl.u32 %v3984_v0, 16  ;;  %v785_v7 = vrot.slane %v783_v61, 1 }
  0xce   :  { %v5272_v49 = vpop.permute.xlu1 %612  ;;  %v5274_v18 = vpop.permute.xlu0 %610 }
  0xcf   :  { %v1303_v20 = vsel %vm1293_vm4, %v1270_v41, %v5274_v18  ;;  %v4000_v18 = vcombine.low %v3872_v5, %v3872_v5 }
  0xd0   :  { %472 = vrot.lane.b32.xlu1 %v441_v31, %s4595_s18  ;;  %470 = vrot.lane.b32.xlu0 %v434_v15, %s4595_s18  ;;  %v793_v31 = vor.u32 %v792_v54, %v788_v2  ;;  %v786_v15 = vor.u32 %v785_v7, %v781_v55  ;;  %v4575_v55 = vld [vmem:[%s6526_s0 + $0x30] sm:$0xf] }
  0xd1   :  { %v1199_v7 = vsel %vm1178_vm1, %v4575_v55, %v5206_v35 }
  0xd2   :  { %v5290_v32 = vpop.permute.xlu1 %616  ;;  %v5292_v33 = vpop.permute.xlu0 %614 }
  0xd4   :  { %548 = vrot.lane.b32.xlu1 %v3951_v22, %s4596_s7  ;;  %546 = vrot.lane.b32.xlu0 %v3950_v25, %s4596_s7  ;;  %v3999_v25 = vcombine.low %v3871_v16, %v3871_v16 }
  0xd6   :  { %v5302_v40 = vpop.permute.xlu1 %804  ;;  %v5304_v46 = vpop.permute.xlu0 %802 }
  0xd7   :  { %v1336_v63 = vsel %vm1326_vm5, %v1303_v20, %v5304_v46  ;;  %v4033_v46 = vcombine.low %v3873_v3, %v3905_v38 }
  0xd8   :  { %552 = vrot.lane.b32.xlu1 %v3953_v6, %s4596_s7  ;;  %550 = vrot.lane.b32.xlu0 %v3952_v23, %s4596_s7  ;;  %v3902_v6 = vld [vmem:[%s6526_s0 + $0x14c] sm:$0x1]  ;;  %v3998_v23 = vcombine.low %v3870_v48, %v3870_v48 }
  0xd9   :  { %v4030_v45 = vcombine.low %v3870_v48, %v3902_v6  ;;  %v1241_v48 = vsel %vm1227_vm2, %v1199_v7, %v5244_v57 }
  0xda   :  { %v5314_v50 = vpop.permute.xlu1 %808  ;;  %v5316_v51 = vpop.permute.xlu0 %806 }
  0xdb   :  { %v1121_v54 = vshll.u32 %v4030_v45, 16  ;;  %v1119_v28 = vshrl.u32 %v4030_v45, 16 }
  0xdc   :  { %628 = vrot.lane.b32.xlu1 %v4426_v43, %s4597_s19  ;;  %626 = vrot.lane.b32.xlu0 %v4427_v44, %s4597_s19  ;;  %v4031_v43 = vcombine.low %v3871_v16, %v3903_v24  ;;  %v1305_v44 = vsel %vm1293_vm4, %v1272_v47, %v5272_v49  ;;  %v3904_v49 = vld [vmem:[%s6526_s0 + $0x15c] sm:$0x1] }
  0xdd   :  { %v1338_v26 = vsel %vm1326_vm5, %v1305_v44, %v5302_v40  ;;  %v4032_v2 = vcombine.low %v3872_v5, %v3904_v49  ;;  %v1123_v8 = vrot.slane %v1121_v54, 1  ;;  %v1140_v44 = vshrl.u32 %v4033_v46, 16 }
  0xde   :  { %v885_v62 = vpop.permute.xlu1 %884  ;;  %v883_v12 = vpop.permute.xlu0 %882  ;;  %v1128_v61 = vshll.u32 %v4031_v43, 16  ;;  %v4602_v49 = vmov 0  }
  0xdf   :  { %v1371_v52 = vsel %vm1359_vm6, %v1338_v26, %v885_v62  ;;  %v1369_v53 = vsel %vm1359_vm6, %v1336_v63, %v883_v12  ;;  %v4574_v62 = vld [vmem:[%s6526_s0 + $0x38] sm:$0xf]  ;;  %v1135_v6 = vshll.u32 %v4032_v2, 16  ;;  %1658 = vst.msk [vmem:[#allocation2 + $0x48] sm:$0xf] %vm1651_vm10, %v4602_v49 }
  0xe0   :  { %632 = vrot.lane.b32.xlu1 %v4428_v58, %s4597_s19  ;;  %630 = vrot.lane.b32.xlu0 %v4429_v59, %s4597_s19  ;;  %v1202_v12 = vsel %vm1178_vm1, %v4574_v62, %v5203_v30  ;;  %v4439_v30 = vld [vmem:[%s6526_s0 + $0x190] ss:$0 sps:$4 sm:$0xff]   ;;  %v1130_v27 = vrot.slane %v1128_v61, 1  ;;  %1659 = vst.msk [vmem:[#allocation2 + $0x4c] sm:$0x1] %vm1653_vm11, %v4602_v49 }
  0xe1   :  { %v1243_v16 = vsel %vm1227_vm2, %v1202_v12, %v5242_v56  ;;  %v1137_v45 = vrot.slane %v1135_v6, 1  ;;  %1652 = vst.msk [vmem:[#allocation2] sm:$0xf] %vm1651_vm10, %v4602_v49  ;;  %1655 = vst.msk [vmem:[#allocation2 + $0x50] sm:$0xf] %vm1651_vm10, %v4602_v49 }
  0xe2   :  { %v5328_v11 = vpop.permute.xlu1 %888  ;;  %v5330_v13 = vpop.permute.xlu0 %886  ;;  %v1276_v35 = vsel %vm1260_vm3, %v1243_v16, %v5260_v14  ;;  %1654 = vst.msk [vmem:[#allocation2 + $0x4] sm:$0x1] %vm1653_vm11, %v4602_v49  ;;  %1656 = vst.msk [vmem:[#allocation2 + $0x54] sm:$0x1] %vm1653_vm11, %v4602_v49 }
  0xe3   :  { %v1309_v56 = vsel %vm1293_vm4, %v1276_v35, %v5290_v32  ;;  %v4441_v32 = vld [vmem:[%s6526_s0 + $0x1a0] ss:$0 sps:$4 sm:$0xff]   ;;  %1660 = vst.msk [vmem:[#allocation2 + $0x98] sm:$0xf] %vm1651_vm10, %v4602_v49 }
  0xe4   :  { %820 = vrot.lane.b32.xlu1 %v779_v10, %s4598_s22  ;;  %818 = vrot.lane.b32.xlu0 %v772_v17, %s4598_s22  ;;  %v1342_v14 = vsel %vm1326_vm5, %v1309_v56, %v5314_v50  ;;  %1661 = vst.msk [vmem:[#allocation2 + $0x9c] sm:$0x1] %vm1653_vm11, %v4602_v49  ;;  %vm5533_vm11 = vmand %vm1651_vm10, %vm1725_vm13 }
  0xe5   :  { %v1375_v50 = vsel %vm1359_vm6, %v1342_v14, %v5328_v11  ;;  %v1739_v14 = vld [vmem:[#allocation2 + $0x24] sm:$0x1] }
  0xe6   :  { %v965_v21 = vpop.permute.xlu1 %964  ;;  %v963_v22 = vpop.permute.xlu0 %962 }
  0xe7   :  { %v1404_v58 = vsel %vm1392_vm7, %v1371_v52, %v965_v21  ;;  %v1402_v40 = vsel %vm1392_vm7, %v1369_v53, %v963_v22  ;;  %v1274_v21 = vsel %vm1260_vm3, %v1241_v48, %v5262_v29 }
  0xe8   :  { %824 = vrot.lane.b32.xlu1 %v793_v31, %s4598_s22  ;;  %822 = vrot.lane.b32.xlu0 %v786_v15, %s4598_s22  ;;  %v4438_v15 = vld [vmem:[%s6526_s0 + $0x198] ss:$0 sps:$4 sm:$0xff]   ;;  %v1307_v57 = vsel %vm1293_vm4, %v1274_v21, %v5292_v33  ;;  %v1142_v33 = vshll.u32 %v4033_v46, 16  ;;  %v1695_v16 = vld [vmem:[#allocation2 + $0x50] sm:$0x1] }
  0xe9   :  { %v1340_v29 = vsel %vm1326_vm5, %v1307_v57, %v5316_v51  ;;  %v1668_v21 = vld [vmem:[#allocation2 + $0x8] sm:$0x1]  ;;  %v1757_v56 = vld [vmem:[#allocation2 + $0x54] sm:$0x1]  ;;  %v2142_v49 = vld [vmem:[#allocation2] sm:$0xe] }
  0xea   :  { %v969_v42 = vpop.permute.xlu1 %968  ;;  %v967_v0 = vpop.permute.xlu0 %966  ;;  %v1373_v51 = vsel %vm1359_vm6, %v1340_v29, %v5330_v13  ;;  %v1144_v11 = vrot.slane %v1142_v33, 1  ;;  %v1133_v13 = vshrl.u32 %v4032_v2, 16  ;;  %v1754_v2 = vld [vmem:[#allocation2 + $0x4c] sm:$0x1]  ;;  %v1669_v57 = vsel %vm5477_vm14, 0, %v1668_v21 }
  0xeb   :  { %v1406_v3 = vsel %vm1392_vm7, %v1373_v51, %v967_v0  ;;  %v1755_v55 = vsel %vm5487_vm15, 0, %v1754_v2  ;;  %1670 = vst [vmem:[#allocation2 + $0x8] sm:$0x1] %v1669_v57  ;;  %v1733_v33 = vld [vmem:[#allocation2 + $0x14] sm:$0x1] }
  0xec   :  { %900 = vrot.lane.b32.xlu1 %v3999_v25, %s4599_s12  ;;  %898 = vrot.lane.b32.xlu0 %v3998_v23, %s4599_s12  ;;  %v1126_v25 = vshrl.u32 %v4031_v43, 16  ;;  %v1408_v23 = vsel %vm1392_vm7, %v1375_v50, %v969_v42  ;;  %v1124_v43 = vor.u32 %v1123_v8, %v1119_v28  ;;  %v1145_v38 = vor.u32 %v1144_v11, %v1140_v44  ;;  %v1677_v8 = vld [vmem:[#allocation2 + $0x20] sm:$0x1] }
  0xed   :  { %1756 = vst [vmem:[#allocation2 + $0x4c] sm:$0x1] %v1755_v55  ;;  %v1678_v29 = vsel %vm5477_vm14, 0, %v1677_v8 }
  0xee   :  { %v1157_v59 = vpop.permute.xlu1 %1156  ;;  %v1155_v60 = vpop.permute.xlu0 %1154  ;;  %v1131_v5 = vor.u32 %v1130_v27, %v1126_v25  ;;  %v1730_v25 = vld [vmem:[#allocation2 + $0xc] sm:$0x1]  ;;  %1679 = vst [vmem:[#allocation2 + $0x20] sm:$0x1] %v1678_v29 }
  0xef   :  { %v1437_v10 = vsel %vm1425_vm8, %v1404_v58, %v1157_v59  ;;  %v1435_v17 = vsel %vm1425_vm8, %v1402_v40, %v1155_v60  ;;  %v1665_v58 = vld [vmem:[#allocation2] sm:$0x1]  ;;  %v1727_v40 = vld [vmem:[#allocation2 + $0x4] sm:$0x1]  ;;  %v1731_v28 = vsel %vm5487_vm15, 0, %v1730_v25 }
  0xf0   :  { %v4037_v31 = vcombine.low %v1435_v17, %v1437_v10  ;;  %904 = vrot.lane.b32.xlu1 %v4001_v39, %s4599_s12  ;;  %902 = vrot.lane.b32.xlu0 %v4000_v18, %s4599_s12  ;;  %v1138_v39 = vor.u32 %v1137_v45, %v1133_v13  ;;  %v1666_v61 = vsel %vm5477_vm14, 0, %v1665_v58  ;;  %v1728_v10 = vsel %vm5487_vm15, 0, %v1727_v40  ;;  %v1692_v17 = vld [vmem:[#allocation2 + $0x48] sm:$0x1]  ;;  %1732 = vst [vmem:[#allocation2 + $0xc] sm:$0x1] %v1731_v28 }
  0xf1   :  { %1667 = vst [vmem:[#allocation2] sm:$0x1] %v1666_v61  ;;  %1729 = vst [vmem:[#allocation2 + $0x4] sm:$0x1] %v1728_v10  ;;  %v1693_v12 = vsel %vm5477_vm14, 0, %v1692_v17 }
  0xf2   :  { %v5420_v22 = vpop.permute.xlu1 %236  ;;  %4266 = vmatprep.mubr.msk.bf16.mxu0 %vm1525_vm9, %v4037_v31  ;;  %v5423_v24 = vpop.permute.xlu0 %234  ;;  %1694 = vst [vmem:[#allocation2 + $0x48] sm:$0x1] %v1693_v12 }
  0xf4   :  { %980 = vrot.lane.b32.xlu1 %v4438_v15, %s4600_s29  ;;  %978 = vrot.lane.b32.xlu0 %v4439_v30, %s4600_s29  ;;  %v1674_v15 = vld [vmem:[#allocation2 + $0x18] sm:$0x1]  ;;  %v1736_v30 = vld [vmem:[#allocation2 + $0x1c] sm:$0x1] }
  0xf5   :  { %v1675_v48 = vsel %vm5477_vm14, 0, %v1674_v15  ;;  %v1737_v35 = vsel %vm5487_vm15, 0, %v1736_v30  ;;  %v2246_v15 = vld [vmem:[#allocation2 + $0x48] sm:$0xe] }
  0xf6   :  { %v1161_v36 = vpop.permute.xlu1 %1160  ;;  %v1159_v37 = vpop.permute.xlu0 %1158  ;;  %1676 = vst [vmem:[#allocation2 + $0x18] sm:$0x1] %v1675_v48  ;;  %1738 = vst [vmem:[#allocation2 + $0x1c] sm:$0x1] %v1737_v35 }
  0xf7   :  { %v1441_v47 = vsel %vm1425_vm8, %v1408_v23, %v1161_v36  ;;  %v1439_v41 = vsel %vm1425_vm8, %v1406_v3, %v1159_v37  ;;  %v1734_v23 = vsel %vm5487_vm15, 0, %v1733_v33  ;;  %v2230_v36 = vld [vmem:[#allocation2 + $0x4c] sm:$0x1] }
  0xf8   :  { %v4038_v20 = vcombine.low %v1439_v41, %v1441_v47  ;;  %984 = vrot.lane.b32.xlu1 %v4440_v34, %s4600_s29  ;;  %982 = vrot.lane.b32.xlu0 %v4441_v32, %s4600_s29  ;;  %v2110_v27 = vld [vmem:[#allocation2] sm:$0xf]  ;;  %v1740_v34 = vsel %vm5487_vm15, 0, %v1739_v14  ;;  %v1671_v32 = vld [vmem:[#allocation2 + $0x10] sm:$0x1]  ;;  %v1696_v47 = vsel %vm5477_vm14, 0, %v1695_v16  ;;  %v4189_v48 = vcombine.low %v2246_v15, %v2230_v36 }
  0xf9   :  { %1741 = vst [vmem:[#allocation2 + $0x24] sm:$0x1] %v1740_v34  ;;  %v1672_v51 = vsel %vm5477_vm14, 0, %v1671_v32  ;;  %v2214_v3 = vld [vmem:[#allocation2 + $0x48] sm:$0xf] }
  0xfa   :  { %v5451_v42 = vpop.permute.xlu1 %240  ;;  %4267 = vmatmul.mubr.msk.bf16.gmra.mrb[4].mxu0 %vm1525_vm9, %v4038_v20  ;;  %v5454_v0 = vpop.permute.xlu0 %238  ;;  %1673 = vst [vmem:[#allocation2 + $0x10] sm:$0x1] %v1672_v51  ;;  %1735 = vst [vmem:[#allocation2 + $0x14] sm:$0x1] %v1734_v23  ;;  %v4173_v37 = vcombine.low %v2214_v3, %v2230_v36  ;;  %v4157_v44 = vcombine.low %v2214_v3, %v2214_v3  ;;  %v4576_v51 = vld [vmem:[%s6526_s0 + $0x128] sm:$0xf] }
  0xfb   :  { %1697 = vst [vmem:[#allocation2 + $0x50] sm:$0x1] %v1696_v47  ;;  %v1208_v23 = vsel %vm1178_vm1, %v4576_v51, %v5420_v22  ;;  %v4577_v3 = vld [vmem:[%s6526_s0 + $0x120] sm:$0xf] }
  0xfc   :  { %1172 = vrot.lane.b32.xlu1 %v1131_v5, %s4601_s8  ;;  %1170 = vrot.lane.b32.xlu0 %v1124_v43, %s4601_s8  ;;  %v2126_v5 = vld [vmem:[#allocation2 + $0x4] sm:$0x1]  ;;  %v1758_v43 = vsel %vm5487_vm15, 0, %v1757_v56  ;;  %v3123_v20 = vshll.u32 %v4173_v37, 16  ;;  %v3121_v58 = vshrl.u32 %v4173_v37, 16  ;;  %v3270_v56 = vrot.slane %v4189_v48, 1 }
  0xfd   :  { %v4070_v41 = vcombine.low %v2110_v27, %v2126_v5  ;;  %1759 = vst [vmem:[#allocation2 + $0x54] sm:$0x1] %v1758_v43  ;;  %v4086_v10 = vcombine.low %v2142_v49, %v2126_v5  ;;  %v1205_v36 = vsel %vm1178_vm1, %v4577_v3, %v5423_v24  ;;  %v1748_v3 = vld [vmem:[#allocation2 + $0x3c] sm:$0x1] }
  0xfe   :  { %v5458_v26 = vpop.permute.xlu1 %460  ;;  %v5460_v63 = vpop.permute.xlu0 %458  ;;  %v3125_v40 = vrot.slane %v3123_v20, 1 }
  0xff   :  { %v2527_v16 = vrot.slane %v4086_v10, 1  ;;  %v1247_v37 = vsel %vm1227_vm2, %v1208_v23, %v5458_v26  ;;  %v1245_v5 = vsel %vm1227_vm2, %v1205_v36, %v5460_v63  ;;  %v1686_v23 = vld [vmem:[#allocation2 + $0x38] sm:$0x1] }
 0x100   :  { %1176 = vrot.lane.b32.xlu1 %v1145_v38, %s4601_s8  ;;  %1174 = vrot.lane.b32.xlu0 %v1138_v39, %s4601_s8  ;;  %v2336_v38 = vshrl.u32 %v4070_v41, 16  ;;  %v2338_v39 = vshll.u32 %v4070_v41, 16  ;;  %v3126_v17 = vor.u32 %v3125_v40, %v3121_v58  ;;  %v1687_v36 = vsel %vm5477_vm14, 0, %v1686_v23 }
 0x101   :  { %1688 = vst [vmem:[#allocation2 + $0x38] sm:$0x1] %v1687_v36 }
 0x102   :  { %v5472_v18 = vpop.permute.xlu1 %464  ;;  %v5474_v52 = vpop.permute.xlu0 %462  ;;  %v2340_v61 = vrot.slane %v2338_v39, 1  ;;  %v2118_v30 = vld [vmem:[#allocation2 + $0x50] sm:$0xf] }
 0x104   :  { %3005 = vrot.lane.b32.xlu1 %v4157_v44, %s4599_s12  ;;  %v2341_v55 = vor.u32 %v2340_v61, %v2336_v38  ;;  %v2134_v35 = vld [vmem:[#allocation2 + $0x54] sm:$0x1] }
 0x105   :  { %v4078_v21 = vcombine.low %v2118_v30, %v2134_v35 }
 0x106   :  { %v5481_v59 = vpop.permute.xlu1 %540  ;;  %v5483_v60 = vpop.permute.xlu0 %538  ;;  %2447 = vrot.lane.b32.xlu0 %v2341_v55, %s4594_s24 }
 0x107   :  { %v2392_v57 = vshrl.u32 %v4078_v21, 16  ;;  %v2394_v28 = vshll.u32 %v4078_v21, 16  ;;  %v1280_v47 = vsel %vm1260_vm3, %v1247_v37, %v5481_v59  ;;  %v1278_v41 = vsel %vm1260_vm3, %v1245_v5, %v5483_v60 }
 0x108   :  { %3197 = vrot.lane.b32.xlu1 %v3126_v17, %s4600_s29  ;;  %v1749_v37 = vsel %vm5487_vm15, 0, %v1748_v3 }
 0x109   :  { %v2396_v8 = vrot.slane %v2394_v28, 1  ;;  %1750 = vst [vmem:[#allocation2 + $0x3c] sm:$0x1] %v1749_v37 }
 0x10a   :  { %v5495_v54 = vpop.permute.xlu1 %544  ;;  %v5497_v62 = vpop.permute.xlu0 %542  ;;  %2543 = vrot.lane.b32.xlu0 %v2527_v16, %s4595_s18 }
 0x10b   :  { %v2397_v34 = vor.u32 %v2396_v8, %v2392_v57 }
 0x10c   :  { %3293 = vrot.lane.b32.xlu1 %v3270_v56, %s4601_s8 }
 0x10e   :  { %v5503_v7 = vpop.permute.xlu1 %620  ;;  %v5505_v31 = vpop.permute.xlu0 %618  ;;  %2463 = vrot.lane.b32.xlu0 %v2397_v34, %s4594_s24 }
 0x10f   :  { %v1313_v44 = vsel %vm1293_vm4, %v1280_v47, %v5503_v7  ;;  %v1311_v24 = vsel %vm1293_vm4, %v1278_v41, %v5505_v31  ;;  %v4578_v31 = vld [vmem:[%s6526_s0 + $0x138] sm:$0xf] }
 0x112   :  { %v5519_v6 = vpop.permute.xlu1 %624  ;;  %v5521_v50 = vpop.permute.xlu0 %622 }
 0x116   :  { %v813_v11 = vpop.permute.xlu1 %812  ;;  %v811_v13 = vpop.permute.xlu0 %810 }
 0x117   :  { %v1346_v20 = vsel %vm1326_vm5, %v1313_v44, %v813_v11  ;;  %v1344_v26 = vsel %vm1326_vm5, %v1311_v24, %v811_v13  ;;  %v1214_v11 = vsel %vm1178_vm1, %v4578_v31, %v5451_v42  ;;  %v4579_v13 = vld [vmem:[%s6526_s0 + $0x130] sm:$0xf]  ;;  %v1742_v44 = vld [vmem:[#allocation2 + $0x2c] sm:$0x1] }
 0x118   :  { %v1211_v40 = vsel %vm1178_vm1, %v4579_v13, %v5454_v0  ;;  %v1251_v10 = vsel %vm1227_vm2, %v1214_v11, %v5472_v18 }
 0x119   :  { %v1249_v17 = vsel %vm1227_vm2, %v1211_v40, %v5474_v52  ;;  %v1284_v55 = vsel %vm1260_vm3, %v1251_v10, %v5495_v54 }
 0x11a   :  { %v817_v2 = vpop.permute.xlu1 %816  ;;  %v815_v12 = vpop.permute.xlu0 %814  ;;  %v1282_v42 = vsel %vm1260_vm3, %v1249_v17, %v5497_v62  ;;  %v1317_v0 = vsel %vm1293_vm4, %v1284_v55, %v5519_v6 }
 0x11b   :  { %v1315_v18 = vsel %vm1293_vm4, %v1282_v42, %v5521_v50  ;;  %v1350_v52 = vsel %vm1326_vm5, %v1317_v0, %v817_v2 }
 0x11c   :  { %v1348_v16 = vsel %vm1326_vm5, %v1315_v18, %v815_v12 }
 0x11e   :  { %v893_v25 = vpop.permute.xlu1 %892  ;;  %v891_v27 = vpop.permute.xlu0 %890 }
 0x11f   :  { %v1379_v63 = vsel %vm1359_vm6, %v1346_v20, %v893_v25  ;;  %v1377_v38 = vsel %vm1359_vm6, %v1344_v26, %v891_v27 }
 0x122   :  { %v897_v14 = vpop.permute.xlu1 %896  ;;  %v895_v29 = vpop.permute.xlu0 %894 }
 0x123   :  { %v1383_v54 = vsel %vm1359_vm6, %v1350_v52, %v897_v14  ;;  %v1381_v62 = vsel %vm1359_vm6, %v1348_v16, %v895_v29 }
 0x126   :  { %v973_v32 = vpop.permute.xlu1 %972  ;;  %v971_v33 = vpop.permute.xlu0 %970 }
 0x127   :  { %v1412_v59 = vsel %vm1392_vm7, %v1379_v63, %v973_v32  ;;  %v1410_v60 = vsel %vm1392_vm7, %v1377_v38, %v971_v33  ;;  %v1743_v63 = vsel %vm5487_vm15, 0, %v1742_v44  ;;  %v1689_v38 = vld [vmem:[#allocation2 + $0x40] sm:$0x1] }
 0x128   :  { %1744 = vst [vmem:[#allocation2 + $0x2c] sm:$0x1] %v1743_v63 }
 0x12a   :  { %v977_v22 = vpop.permute.xlu1 %976  ;;  %v975_v43 = vpop.permute.xlu0 %974 }
 0x12b   :  { %v1416_v48 = vsel %vm1392_vm7, %v1383_v54, %v977_v22  ;;  %v1414_v35 = vsel %vm1392_vm7, %v1381_v62, %v975_v43  ;;  %v1680_v43 = vld [vmem:[#allocation2 + $0x28] sm:$0x1] }
 0x12c   :  { %v1681_v26 = vsel %vm5477_vm14, 0, %v1680_v43 }
 0x12d   :  { %1682 = vst [vmem:[#allocation2 + $0x28] sm:$0x1] %v1681_v26  ;;  %v1766_v26 = vld [vmem:[#allocation2 + $0x6c] sm:$0x1] }
 0x12e   :  { %v1165_v39 = vpop.permute.xlu1 %1164  ;;  %v1163_v49 = vpop.permute.xlu0 %1162 }
 0x12f   :  { %v1445_v58 = vsel %vm1425_vm8, %v1412_v59, %v1165_v39  ;;  %v1443_v7 = vsel %vm1425_vm8, %v1410_v60, %v1163_v49  ;;  %v1751_v59 = vld [vmem:[#allocation2 + $0x44] sm:$0x1]  ;;  %v1690_v60 = vsel %vm5477_vm14, 0, %v1689_v38  ;;  %v1683_v49 = vld [vmem:[#allocation2 + $0x30] sm:$0x1] }
 0x130   :  { %v4039_v61 = vcombine.low %v1443_v7, %v1445_v58  ;;  %v1752_v39 = vsel %vm5487_vm15, 0, %v1751_v59  ;;  %v1745_v58 = vld [vmem:[#allocation2 + $0x34] sm:$0x1]  ;;  %1691 = vst [vmem:[#allocation2 + $0x40] sm:$0x1] %v1690_v60  ;;  %v1684_v7 = vsel %vm5477_vm14, 0, %v1683_v49 }
 0x131   :  { %1753 = vst [vmem:[#allocation2 + $0x44] sm:$0x1] %v1752_v39  ;;  %v1746_v31 = vsel %vm5487_vm15, 0, %v1745_v58  ;;  %1685 = vst [vmem:[#allocation2 + $0x30] sm:$0x1] %v1684_v7  ;;  %v1767_v60 = vsel %vm5487_vm15, 0, %v1766_v26 }
 0x132   :  { %v5591_v15 = vpop.permute.xlu1 %244  ;;  %4270 = vmatprep.mubr.msk.bf16.mxu0 %vm1525_vm9, %v4039_v61  ;;  %v5594_v30 = vpop.permute.xlu0 %242  ;;  %1747 = vst [vmem:[#allocation2 + $0x34] sm:$0x1] %v1746_v31  ;;  %1768 = vst [vmem:[#allocation2 + $0x6c] sm:$0x1] %v1767_v60 }
 0x133   :  { %v1220_v55 = vsel %vm1178_vm1, %v5190_v9, %v5591_v15  ;;  %v1217_v42 = vsel %vm1178_vm1, %v5198_v4, %v5594_v30 }
 0x136   :  { %v1169_v21 = vpop.permute.xlu1 %1168  ;;  %v1167_v25 = vpop.permute.xlu0 %1166 }
 0x137   :  { %v1449_v27 = vsel %vm1425_vm8, %v1416_v48, %v1169_v21  ;;  %v1447_v6 = vsel %vm1425_vm8, %v1414_v35, %v1167_v25 }
 0x138   :  { %v4040_v56 = vcombine.low %v1447_v6, %v1449_v27 }
 0x13a   :  { %v249_v50 = vpop.permute.xlu1 %248  ;;  %4271 = vmatmul.mubr.msk.bf16.gmra.mrb[8].mxu0 %vm1525_vm9, %v4040_v56  ;;  %v247_v2 = vpop.permute.xlu0 %246 }
 0x13b   :  { %v1226_v9 = vsel %vm1178_vm1, %v5221_v1, %v249_v50  ;;  %v1223_v4 = vsel %vm1178_vm1, %v5229_v19, %v247_v2 }
 0x13e   :  { %v469_v12 = vpop.permute.xlu1 %468  ;;  %v467_v57 = vpop.permute.xlu0 %466 }
 0x13f   :  { %v1255_v0 = vsel %vm1227_vm2, %v1220_v55, %v469_v12  ;;  %v1253_v18 = vsel %vm1227_vm2, %v1217_v42, %v467_v57 }
 0x142   :  { %v473_v28 = vpop.permute.xlu1 %472  ;;  %v471_v8 = vpop.permute.xlu0 %470 }
 0x143   :  { %v1259_v21 = vsel %vm1227_vm2, %v1226_v9, %v473_v28  ;;  %v1257_v25 = vsel %vm1227_vm2, %v1223_v4, %v471_v8 }
 0x146   :  { %v549_v14 = vpop.permute.xlu1 %548  ;;  %v547_v29 = vpop.permute.xlu0 %546 }
 0x147   :  { %v1288_v52 = vsel %vm1260_vm3, %v1255_v0, %v549_v14  ;;  %v1286_v16 = vsel %vm1260_vm3, %v1253_v18, %v547_v29  ;;  %v2014_v0 = vld [vmem:[#allocation2 + $0x8] sm:$0xf] }
 0x14a   :  { %v553_v34 = vpop.permute.xlu1 %552  ;;  %v551_v32 = vpop.permute.xlu0 %550 }
 0x14b   :  { %v1292_v56 = vsel %vm1260_vm3, %v1259_v21, %v553_v34  ;;  %v1290_v12 = vsel %vm1260_vm3, %v1257_v25, %v551_v32  ;;  %v2035_v25 = vld [vmem:[#allocation2 + $0x24] sm:$0x1] }
 0x14e   :  { %v629_v33 = vpop.permute.xlu1 %628  ;;  %v627_v51 = vpop.permute.xlu0 %626 }
 0x14f   :  { %v1321_v48 = vsel %vm1293_vm4, %v1288_v52, %v629_v33  ;;  %v1319_v35 = vsel %vm1293_vm4, %v1286_v16, %v627_v51 }
 0x152   :  { %v633_v5 = vpop.permute.xlu1 %632  ;;  %v631_v47 = vpop.permute.xlu0 %630 }
 0x153   :  { %v1325_v57 = vsel %vm1293_vm4, %v1292_v56, %v633_v5  ;;  %v1323_v28 = vsel %vm1293_vm4, %v1290_v12, %v631_v47 }
 0x156   :  { %v821_v41 = vpop.permute.xlu1 %820  ;;  %v819_v22 = vpop.permute.xlu0 %818 }
 0x157   :  { %v1354_v15 = vsel %vm1326_vm5, %v1321_v48, %v821_v41  ;;  %v1352_v30 = vsel %vm1326_vm5, %v1319_v35, %v819_v22  ;;  %v5668_v22 = vld [vmem:[%s6528_s2] ss:$0 sm:$0xff] }
 0x15a   :  { %v825_v24 = vpop.permute.xlu1 %824  ;;  %v823_v20 = vpop.permute.xlu0 %822 }
 0x15b   :  { %v1358_v29 = vsel %vm1326_vm5, %v1325_v57, %v825_v24  ;;  %v1356_v34 = vsel %vm1326_vm5, %v1323_v28, %v823_v20  ;;  %v1704_v20 = vld [vmem:[#allocation2 + $0x68] sm:$0x1] }
 0x15c   :  { %v1705_v59 = vsel %vm5477_vm14, 0, %v1704_v20 }
 0x15d   :  { %1706 = vst [vmem:[#allocation2 + $0x68] sm:$0x1] %v1705_v59 }
 0x15e   :  { %v901_v11 = vpop.permute.xlu1 %900  ;;  %v899_v13 = vpop.permute.xlu0 %898 }
 0x15f   :  { %v1387_v27 = vsel %vm1359_vm6, %v1354_v15, %v901_v11  ;;  %v1385_v6 = vsel %vm1359_vm6, %v1352_v30, %v899_v13  ;;  %v2032_v15 = vld [vmem:[#allocation2 + $0x20] sm:$0xf] }
 0x162   :  { %v905_v40 = vpop.permute.xlu1 %904  ;;  %v903_v61 = vpop.permute.xlu0 %902 }
 0x163   :  { %v1391_v32 = vsel %vm1359_vm6, %v1358_v29, %v905_v40  ;;  %v1389_v51 = vsel %vm1359_vm6, %v1356_v34, %v903_v61  ;;  %v2026_v40 = vld [vmem:[#allocation2 + $0x18] sm:$0xf]  ;;  %v2029_v61 = vld [vmem:[#allocation2 + $0x1c] sm:$0x1] }
 0x164   :  { %v1698_v29 = vld [vmem:[#allocation2 + $0x58] sm:$0x1] }
 0x166   :  { %v981_v10 = vpop.permute.xlu1 %980  ;;  %v979_v17 = vpop.permute.xlu0 %978 }
 0x167   :  { %v1420_v1 = vsel %vm1392_vm7, %v1387_v27, %v981_v10  ;;  %v1418_v19 = vsel %vm1392_vm7, %v1385_v6, %v979_v17 }
 0x16a   :  { %v985_v54 = vpop.permute.xlu1 %984  ;;  %v983_v62 = vpop.permute.xlu0 %982 }
 0x16b   :  { %v1424_v23 = vsel %vm1392_vm7, %v1391_v32, %v985_v54  ;;  %v1422_v3 = vsel %vm1392_vm7, %v1389_v51, %v983_v62  ;;  %v2017_v54 = vld [vmem:[#allocation2 + $0xc] sm:$0x1]  ;;  %v1699_v32 = vsel %vm5477_vm14, 0, %v1698_v29  ;;  %v1760_v51 = vld [vmem:[#allocation2 + $0x5c] sm:$0x1] }
 0x16c   :  { %1700 = vst [vmem:[#allocation2 + $0x58] sm:$0x1] %v1699_v32 }
 0x16e   :  { %v1173_v50 = vpop.permute.xlu1 %1172  ;;  %v1171_v2 = vpop.permute.xlu0 %1170 }
 0x16f   :  { %v1453_v8 = vsel %vm1425_vm8, %v1420_v1, %v1173_v50  ;;  %v1451_v14 = vsel %vm1425_vm8, %v1418_v19, %v1171_v2  ;;  %v2020_v50 = vld [vmem:[#allocation2 + $0x10] sm:$0xf]  ;;  %v2023_v2 = vld [vmem:[#allocation2 + $0x14] sm:$0x1] }
 0x170   :  { %v4041_v33 = vcombine.low %v1451_v14, %v1453_v8 }
 0x172   :  { %v1177_v36 = vpop.permute.xlu1 %1176  ;;  %4274 = vmatprep.mubr.msk.bf16.mxu0 %vm1525_vm9, %v4041_v33  ;;  %v1175_v37 = vpop.permute.xlu0 %1174 }
 0x173   :  { %v1457_v5 = vsel %vm1425_vm8, %v1424_v23, %v1177_v36  ;;  %v1455_v47 = vsel %vm1425_vm8, %v1422_v3, %v1175_v37  ;;  %v1707_v23 = vld [vmem:[#allocation2 + $0x70] sm:$0x1]  ;;  %v1761_v37 = vsel %vm5487_vm15, 0, %v1760_v51 }
 0x174   :  { %v4042_v41 = vcombine.low %v1455_v47, %v1457_v5  ;;  %v1708_v5 = vsel %vm5477_vm14, 0, %v1707_v23  ;;  %v1769_v47 = vld [vmem:[#allocation2 + $0x74] sm:$0x1]  ;;  %1762 = vst [vmem:[#allocation2 + $0x5c] sm:$0x1] %v1761_v37 }
 0x175   :  { %1709 = vst [vmem:[#allocation2 + $0x70] sm:$0x1] %v1708_v5 }
 0x176   :  { %4275 = vmatmul.mubr.msk.bf16.gmra.mrb[12].mxu0 %vm1525_vm9, %v4042_v41  ;;  %v1701_v41 = vld [vmem:[#allocation2 + $0x60] sm:$0x1] }
 0x18d   :  { %v4264_v43 = vpop.f32.mrb[0].mxu0 }
 0x18e   :  { %v1597_v44 = vadd.f32 %v4264_v43, %v5668_v22  ;;  %v1588_v24 = vpop.f32.mrb[1].mxu0  ;;  %v1770_v43 = vsel %vm5487_vm15, 0, %v1769_v47 }
 0x18f   :  { %v1589_v63 = vadd.f32 %v5668_v22, %v1588_v24  ;;  %v4265_v38 = vpop.f32.mrb[2].mxu0  ;;  %v1763_v24 = vld [vmem:[#allocation2 + $0x64] sm:$0x1]  ;;  %1771 = vst [vmem:[#allocation2 + $0x74] sm:$0x1] %v1770_v43 }
 0x190   :  { %v4220_v39 = vpack.c.bf16 %v1597_v44, %v1597_v44  ;;  %v1600_v49 = vadd.f32 %v4265_v38, %v5668_v22  ;;  %v1591_v58 = vpop.f32.mrb[3].mxu0  ;;  %v1702_v44 = vsel %vm5477_vm14, 0, %v1701_v41  ;;  %v1764_v20 = vsel %vm5487_vm15, 0, %v1763_v24 }
 0x191   :  { %v4218_v7 = vpack.c.bf16 %v1589_v63, %v1589_v63  ;;  %v1592_v31 = vadd.f32 %v5668_v22, %v1591_v58  ;;  %1703 = vst [vmem:[#allocation2 + $0x60] sm:$0x1] %v1702_v44  ;;  %1765 = vst [vmem:[#allocation2 + $0x64] sm:$0x1] %v1764_v20 }
 0x192   :  { %v1868_v11 = vshrl.u32 %v4220_v39, 16  ;;  %v4221_v13 = vpack.c.bf16 %v1600_v49, %v1600_v49  ;;  %v1871_v42 = vshll.u32 %v4220_v39, 16 }
 0x193   :  { %v1852_v10 = vshrl.u32 %v4218_v7, 16  ;;  %v4219_v17 = vpack.c.bf16 %v1592_v31, %v1592_v31  ;;  %v1855_v16 = vshll.u32 %v4218_v7, 16 }
 0x194   :  { %v1870_v55 = vrot.slane %v1868_v11, 7  ;;  %v1876_v18 = vshrl.u32 %v4221_v13, 16  ;;  %v1879_v4 = vshll.u32 %v4221_v13, 16 }
 0x195   :  { %v1854_v52 = vrot.slane %v1852_v10, 7  ;;  %v1860_v62 = vshrl.u32 %v4219_v17, 16  ;;  %v1863_v6 = vshll.u32 %v4219_v17, 16 }
 0x196   :  { %v1873_v48 = vor.u32 %v1871_v42, %v1870_v55  ;;  %v1874_v35 = vrot.slane %v1870_v55, 4  ;;  %v1878_v9 = vrot.slane %v1876_v18, 7 }
 0x197   :  { %v1857_v30 = vor.u32 %v1855_v16, %v1854_v52  ;;  %v1858_v21 = vrot.slane %v1854_v52, 4  ;;  %v1862_v27 = vrot.slane %v1860_v62, 7 }
 0x198   :  { %v2027_v56 = vsel %vm5533_vm11, %v1873_v48, %v2026_v40  ;;  %v2030_v12 = vsel %vm5477_vm14, %v1874_v35, %v2029_v61  ;;  %v1881_v1 = vor.u32 %v1879_v4, %v1878_v9  ;;  %v1882_v19 = vrot.slane %v1878_v9, 4 }
 0x199   :  { %2028 = vst [vmem:[#allocation2 + $0x18] sm:$0xf] %v2027_v56  ;;  %2031 = vst [vmem:[#allocation2 + $0x1c] sm:$0x1] %v2030_v12  ;;  %v2015_v57 = vsel %vm5533_vm11, %v1857_v30, %v2014_v0  ;;  %v2018_v28 = vsel %vm5477_vm14, %v1858_v21, %v2017_v54  ;;  %v1865_v8 = vor.u32 %v1863_v6, %v1862_v27  ;;  %v1866_v14 = vrot.slane %v1862_v27, 4 }
 0x19a   :  { %2016 = vst [vmem:[#allocation2 + $0x8] sm:$0xf] %v2015_v57  ;;  %2019 = vst [vmem:[#allocation2 + $0xc] sm:$0x1] %v2018_v28  ;;  %v2033_v34 = vsel %vm5533_vm11, %v1881_v1, %v2032_v15  ;;  %v2036_v33 = vsel %vm5477_vm14, %v1882_v19, %v2035_v25 }
 0x19b   :  { %2034 = vst [vmem:[#allocation2 + $0x20] sm:$0xf] %v2033_v34  ;;  %2037 = vst [vmem:[#allocation2 + $0x24] sm:$0x1] %v2036_v33  ;;  %v2021_v3 = vsel %vm5533_vm11, %v1865_v8, %v2020_v50  ;;  %v2024_v36 = vsel %vm5477_vm14, %v1866_v14, %v2023_v2 }
 0x19c   :  { %2022 = vst [vmem:[#allocation2 + $0x10] sm:$0xf] %v2021_v3  ;;  %2025 = vst [vmem:[#allocation2 + $0x14] sm:$0x1] %v2024_v36 }
 0x1a0   :  { %v2208_v26 = vld [vmem:[#allocation2 + $0x18] sm:$0xf]  ;;  %v2129_v38 = vld [vmem:[#allocation2 + $0x1c] sm:$0x1] }
 0x1a1   :  { %v5706_v63 = vld [vmem:[#allocation2 + $0x18] sm:$0xf]  ;;  %v4151_v59 = vcombine.low %v2208_v26, %v2208_v26  ;;  %v5710_v58 = vld [vmem:[#allocation2 + $0x8] sm:$0xf]  ;;  %v2176_v7 = vld [vmem:[#allocation2 + $0x1c] sm:$0x1] }
 0x1a2   :  { %v4104_v60 = vcombine.low %v5706_v63, %v5706_v63  ;;  %v2145_v39 = vld [vmem:[#allocation2 + $0x18] sm:$0xe]  ;;  %v4102_v13 = vcombine.low %v5710_v58, %v5710_v58  ;;  %v5716_v61 = vld [vmem:[#allocation2 + $0x20] sm:$0xf]  ;;  %v2224_v10 = vld [vmem:[#allocation2 + $0x1c] sm:$0x1]  ;;  %v4120_v41 = vcombine.low %v5706_v63, %v2176_v7 }
 0x1a3   :  { %v4089_v49 = vcombine.low %v2145_v39, %v2129_v38  ;;  %v2192_v31 = vld [vmem:[#allocation2 + $0x18] sm:$0xe]  ;;  %2993 = vrot.lane.b32.xlu1 %v4151_v59, %s4599_s12  ;;  %v4105_v55 = vcombine.low %v5716_v61, %v5716_v61  ;;  %v5722_v18 = vld [vmem:[#allocation2 + $0x20] sm:$0xf]  ;;  %v2127_v52 = vld [vmem:[#allocation2 + $0xc] sm:$0x1]  ;;  %v4167_v33 = vcombine.low %v2208_v26, %v2224_v10 }
 0x1a4   :  { %2627 = vrot.lane.b32.xlu0 %v4104_v60, %s4596_s7  ;;  %v4136_v40 = vcombine.low %v2192_v31, %v2176_v7  ;;  %v2240_v17 = vld [vmem:[#allocation2 + $0x18] sm:$0xe]  ;;  %v2143_v16 = vld [vmem:[#allocation2 + $0x8] sm:$0xe]  ;;  %v2174_v54 = vld [vmem:[#allocation2 + $0xc] sm:$0x1]  ;;  %v4152_v35 = vcombine.low %v5722_v18, %v5722_v18 }
 0x1a5   :  { %v2530_v11 = vrot.slane %v4089_v49, 1  ;;  %v4183_v0 = vcombine.low %v2240_v17, %v2224_v10  ;;  %v2190_v62 = vld [vmem:[#allocation2 + $0x8] sm:$0xe]  ;;  %v4087_v9 = vcombine.low %v2143_v16, %v2127_v52  ;;  %v2113_v15 = vld [vmem:[#allocation2 + $0x18] sm:$0xf]  ;;  %v3081_v44 = vshll.u32 %v4167_v33, 16 }
 0x1a6   :  { %v2897_v42 = vrot.slane %v4136_v40, 1  ;;  %v4134_v4 = vcombine.low %v2190_v62, %v2174_v54  ;;  %v5730_v30 = vld [vmem:[#allocation2 + $0x10] sm:$0xf]  ;;  %v2177_v6 = vld [vmem:[#allocation2 + $0x24] sm:$0x1]  ;;  %v4073_v19 = vcombine.low %v2113_v15, %v2129_v38  ;;  %v4118_v49 = vcombine.low %v5710_v58, %v2174_v54 }
 0x1a7   :  { %2549 = vrot.lane.b32.xlu1 %v2530_v11, %s4595_s18  ;;  %v3264_v48 = vrot.slane %v4183_v0, 1  ;;  %v2528_v21 = vrot.slane %v4087_v9, 1  ;;  %v5732_v27 = vld [vmem:[#allocation2 + $0x10] sm:$0xf]  ;;  %v2193_v56 = vld [vmem:[#allocation2 + $0x20] sm:$0xe]  ;;  %v4103_v50 = vcombine.low %v5730_v30, %v5730_v30  ;;  %v4121_v31 = vcombine.low %v5716_v61, %v2177_v6 }
 0x1a8   :  { %2623 = vrot.lane.b32.xlu0 %v4102_v13, %s4596_s7  ;;  %v2895_v25 = vrot.slane %v4134_v4, 1  ;;  %v2225_v12 = vld [vmem:[#allocation2 + $0x24] sm:$0x1]  ;;  %v2241_v1 = vld [vmem:[#allocation2 + $0x20] sm:$0xe]  ;;  %v4150_v2 = vcombine.low %v5732_v27, %v5732_v27  ;;  %v4137_v57 = vcombine.low %v2193_v56, %v2177_v6  ;;  %v2359_v32 = vshll.u32 %v4073_v19, 16 }
 0x1a9   :  { %v4184_v28 = vcombine.low %v2241_v1, %v2225_v12  ;;  %v5740_v8 = vld [vmem:[#allocation2 + $0x14] sm:$0x1]  ;;  %v2191_v14 = vld [vmem:[#allocation2 + $0x10] sm:$0xe]  ;;  %v2130_v29 = vld [vmem:[#allocation2 + $0x24] sm:$0x1] }
 0x1aa   :  { %v2146_v34 = vld [vmem:[#allocation2 + $0x20] sm:$0xe]  ;;  %v2898_v51 = vrot.slane %v4137_v57, 1  ;;  %v4135_v3 = vcombine.low %v2191_v14, %v5740_v8  ;;  %v2111_v37 = vld [vmem:[#allocation2 + $0x8] sm:$0xf]  ;;  %v2361_v43 = vrot.slane %v2359_v32, 1 }
 0x1ab   :  { %2629 = vrot.lane.b32.xlu1 %v4105_v55, %s4596_s7  ;;  %v3265_v23 = vrot.slane %v4184_v28, 1  ;;  %v4090_v36 = vcombine.low %v2146_v34, %v2130_v29  ;;  %v5745_v5 = vld [vmem:[#allocation2 + $0x14] sm:$0x1]  ;;  %v2144_v47 = vld [vmem:[#allocation2 + $0x10] sm:$0xe]  ;;  %v4071_v24 = vcombine.low %v2111_v37, %v2127_v52  ;;  %v2357_v59 = vshrl.u32 %v4073_v19, 16 }
 0x1ac   :  { %2915 = vrot.lane.b32.xlu0 %v2897_v42, %s4598_s22  ;;  %v2896_v20 = vrot.slane %v4135_v3, 1  ;;  %v4088_v38 = vcombine.low %v2144_v47, %v5745_v5  ;;  %v5751_v60 = vld [vmem:[#allocation2 + $0x14] sm:$0x1]  ;;  %v2239_v39 = vld [vmem:[#allocation2 + $0x10] sm:$0xe]  ;;  %v3083_v7 = vrot.slane %v3081_v44, 1  ;;  %v4168_v55 = vcombine.low %v5722_v18, %v2225_v12 }
 0x1ad   :  { %v2531_v26 = vrot.slane %v4090_v36, 1  ;;  %v2362_v63 = vor.u32 %v2361_v43, %v2357_v59  ;;  %v4182_v13 = vcombine.low %v2239_v39, %v5751_v60  ;;  %v2345_v40 = vshll.u32 %v4071_v24, 16  ;;  %v2114_v42 = vld [vmem:[#allocation2 + $0x20] sm:$0xf]  ;;  %v1716_v6 = vld [vmem:[#allocation2 + $0x88] sm:$0x1] }
 0x1ae   :  { %v2529_v11 = vrot.slane %v4088_v38, 1  ;;  %v2720_v10 = vshll.u32 %v4120_v41, 16  ;;  %v3079_v17 = vshrl.u32 %v4167_v33, 16  ;;  %v2727_v52 = vshll.u32 %v4121_v31, 16  ;;  %v1778_v56 = vld [vmem:[#allocation2 + $0x8c] sm:$0x1] }
 0x1af   :  { %3281 = vrot.lane.b32.xlu1 %v3264_v48, %s4601_s8  ;;  %v3263_v58 = vrot.slane %v4182_v13, 1  ;;  %v2347_v16 = vrot.slane %v2345_v40, 1  ;;  %v2706_v54 = vshll.u32 %v4118_v49, 16  ;;  %v4074_v62 = vcombine.low %v2114_v42, %v2130_v29  ;;  %v2112_v38 = vld [vmem:[#allocation2 + $0x10] sm:$0xf] }
 0x1b0   :  { %2995 = vrot.lane.b32.xlu0 %v4152_v35, %s4599_s12  ;;  %v3084_v0 = vor.u32 %v3083_v7, %v3079_v17  ;;  %v2722_v61 = vrot.slane %v2720_v10, 1  ;;  %v2343_v48 = vshrl.u32 %v4071_v24, 16  ;;  %v2718_v35 = vshrl.u32 %v4120_v41, 16  ;;  %v2050_v59 = vld [vmem:[#allocation2 + $0x38] sm:$0xf] }
 0x1b1   :  { %v2729_v9 = vrot.slane %v2727_v52, 1  ;;  %v2725_v18 = vshrl.u32 %v4121_v31, 16  ;;  %v2704_v12 = vshrl.u32 %v4118_v49, 16  ;;  %v2366_v1 = vshll.u32 %v4074_v62, 16  ;;  %v2053_v39 = vld [vmem:[#allocation2 + $0x3c] sm:$0x1] }
 0x1b2   :  { %v2348_v4 = vor.u32 %v2347_v16, %v2343_v48  ;;  %v2723_v15 = vor.u32 %v2722_v61, %v2718_v35  ;;  %v1717_v19 = vsel %vm5477_vm14, 0, %v1716_v6  ;;  %v2364_v44 = vshrl.u32 %v4074_v62, 16  ;;  %v2038_v40 = vld [vmem:[#allocation2 + $0x28] sm:$0xf]  ;;  %v2041_v10 = vld [vmem:[#allocation2 + $0x2c] sm:$0x1] }
 0x1b3   :  { %2545 = vrot.lane.b32.xlu1 %v2528_v21, %s4595_s18  ;;  %v2708_v21 = vrot.slane %v2706_v54, 1  ;;  %1718 = vst [vmem:[#allocation2 + $0x88] sm:$0x1] %v1717_v19  ;;  %v2730_v57 = vor.u32 %v2729_v9, %v2725_v18  ;;  %v2059_v52 = vld [vmem:[#allocation2 + $0x44] sm:$0x1] }
 0x1b4   :  { %2911 = vrot.lane.b32.xlu0 %v2895_v25, %s4598_s22  ;;  %v3088_v25 = vshll.u32 %v4168_v55, 16  ;;  %v2044_v62 = vld [vmem:[#allocation2 + $0x30] sm:$0xf]  ;;  %v2047_v48 = vld [vmem:[#allocation2 + $0x34] sm:$0x1] }
 0x1b5   :  { %v2709_v28 = vor.u32 %v2708_v21, %v2704_v12  ;;  %v1710_v35 = vld [vmem:[#allocation2 + $0x78] sm:$0x1]  ;;  %v1772_v9 = vld [vmem:[#allocation2 + $0x7c] sm:$0x1]  ;;  %v1719_v18 = vld [vmem:[#allocation2 + $0x90] sm:$0x1] }
 0x1b6   :  { %v3090_v14 = vrot.slane %v3088_v25, 1  ;;  %v1711_v25 = vsel %vm5477_vm14, 0, %v1710_v35  ;;  %v1713_v19 = vld [vmem:[#allocation2 + $0x80] sm:$0x1] }
 0x1b7   :  { %2625 = vrot.lane.b32.xlu1 %v4103_v50, %s4596_s7  ;;  %v1779_v50 = vsel %vm5487_vm15, 0, %v1778_v56  ;;  %1712 = vst [vmem:[#allocation2 + $0x78] sm:$0x1] %v1711_v25 }
 0x1b8   :  { %2991 = vrot.lane.b32.xlu0 %v4150_v2, %s4599_s12  ;;  %1780 = vst [vmem:[#allocation2 + $0x8c] sm:$0x1] %v1779_v50 }
 0x1bb   :  { %2917 = vrot.lane.b32.xlu1 %v2898_v51, %s4598_s22  ;;  %v3086_v51 = vshrl.u32 %v4168_v55, 16 }
 0x1bc   :  { %3283 = vrot.lane.b32.xlu0 %v3265_v23, %s4601_s8  ;;  %v2368_v23 = vrot.slane %v2366_v1, 1  ;;  %v1781_v1 = vld [vmem:[#allocation2 + $0x94] sm:$0x1] }
 0x1bd   :  { %v3091_v43 = vor.u32 %v3090_v14, %v3086_v51  ;;  %v1775_v14 = vld [vmem:[#allocation2 + $0x84] sm:$0x1] }
 0x1bf   :  { %2913 = vrot.lane.b32.xlu1 %v2896_v20, %s4598_s22 }
 0x1c0   :  { %2551 = vrot.lane.b32.xlu0 %v2531_v26, %s4595_s18  ;;  %v5777_v26 = vcombine.low %v5730_v30, %v5740_v8 }
 0x1c3   :  { %2453 = vrot.lane.b32.xlu1 %v2362_v63, %s4594_s24  ;;  %v2369_v63 = vor.u32 %v2368_v23, %v2364_v44 }
 0x1c4   :  { %2547 = vrot.lane.b32.xlu0 %v2529_v11, %s4595_s18 }
 0x1c7   :  { %3185 = vrot.lane.b32.xlu1 %v3084_v0, %s4600_s29  ;;  %v2056_v0 = vld [vmem:[#allocation2 + $0x40] sm:$0xf] }
 0x1c8   :  { %3279 = vrot.lane.b32.xlu0 %v3263_v58, %s4601_s8  ;;  %v5781_v58 = vcombine.low %v2112_v38, %v5745_v5 }
 0x1cb   :  { %2449 = vrot.lane.b32.xlu1 %v2348_v4, %s4594_s24 }
 0x1cc   :  { %2819 = vrot.lane.b32.xlu0 %v2723_v15, %s4597_s19 }
 0x1cd   :  { %v4268_v2 = vpop.f32.mrb[4].mxu0 }
 0x1ce   :  { %v1613_v29 = vadd.f32 %v4268_v2, %v5668_v22  ;;  %v1604_v34 = vpop.f32.mrb[5].mxu0 }
 0x1cf   :  { %v1605_v33 = vadd.f32 %v5668_v22, %v1604_v34  ;;  %2821 = vrot.lane.b32.xlu1 %v2730_v57, %s4597_s19  ;;  %v4269_v32 = vpop.f32.mrb[6].mxu0 }
 0x1d0   :  { %2815 = vrot.lane.b32.xlu0 %v2709_v28, %s4597_s19  ;;  %v4224_v3 = vpack.c.bf16 %v1613_v29, %v1613_v29  ;;  %v1616_v36 = vadd.f32 %v4269_v32, %v5668_v22  ;;  %v1607_v37 = vpop.f32.mrb[7].mxu0  ;;  %v1720_v32 = vsel %vm5477_vm14, 0, %v1719_v18 }
 0x1d1   :  { %v4222_v47 = vpack.c.bf16 %v1605_v33, %v1605_v33  ;;  %v1608_v41 = vadd.f32 %v5668_v22, %v1607_v37  ;;  %v1773_v33 = vsel %vm5487_vm15, 0, %v1772_v9  ;;  %1721 = vst [vmem:[#allocation2 + $0x90] sm:$0x1] %v1720_v32  ;;  %v2713_v37 = vshll.u32 %v5777_v26, 16 }
 0x1d2   :  { %v1900_v24 = vshrl.u32 %v4224_v3, 16  ;;  %v4225_v20 = vpack.c.bf16 %v1616_v36, %v1616_v36  ;;  %v1903_v11 = vshll.u32 %v4224_v3, 16  ;;  %1774 = vst [vmem:[#allocation2 + $0x7c] sm:$0x1] %v1773_v33  ;;  %v1782_v3 = vsel %vm5487_vm15, 0, %v1781_v1 }
 0x1d3   :  { %v1884_v49 = vshrl.u32 %v4222_v47, 16  ;;  %v4223_v31 = vpack.c.bf16 %v1608_v41, %v1608_v41  ;;  %v1887_v13 = vshll.u32 %v4222_v47, 16  ;;  %v1714_v36 = vsel %vm5477_vm14, 0, %v1713_v19  ;;  %1783 = vst [vmem:[#allocation2 + $0x94] sm:$0x1] %v1782_v3 }
 0x1d4   :  { %3187 = vrot.lane.b32.xlu0 %v3091_v43, %s4600_s29  ;;  %v1902_v7 = vrot.slane %v1900_v24, 7  ;;  %v1908_v17 = vshrl.u32 %v4225_v20, 16  ;;  %v1911_v42 = vshll.u32 %v4225_v20, 16  ;;  %1715 = vst [vmem:[#allocation2 + $0x80] sm:$0x1] %v1714_v36  ;;  %v1776_v47 = vsel %vm5487_vm15, 0, %v1775_v14 }
 0x1d5   :  { %v1886_v55 = vrot.slane %v1884_v49, 7  ;;  %v1892_v30 = vshrl.u32 %v4223_v31, 16  ;;  %v1895_v8 = vshll.u32 %v4223_v31, 16  ;;  %v4166_v41 = vcombine.low %v5732_v27, %v5751_v60  ;;  %1777 = vst [vmem:[#allocation2 + $0x84] sm:$0x1] %v1776_v47 }
 0x1d6   :  { %v1905_v16 = vor.u32 %v1903_v11, %v1902_v7  ;;  %v1906_v61 = vrot.slane %v1902_v7, 4  ;;  %v1910_v54 = vrot.slane %v1908_v17, 7  ;;  %v2352_v43 = vshll.u32 %v5781_v58, 16 }
 0x1d7   :  { %v1889_v4 = vor.u32 %v1887_v13, %v1886_v55  ;;  %v1890_v15 = vrot.slane %v1886_v55, 4  ;;  %v1894_v21 = vrot.slane %v1892_v30, 7  ;;  %v2715_v20 = vrot.slane %v2713_v37, 1 }
 0x1d8   :  { %2455 = vrot.lane.b32.xlu0 %v2369_v63, %s4594_s24  ;;  %v2051_v5 = vsel %vm5533_vm11, %v1905_v16, %v2050_v59  ;;  %v2054_v6 = vsel %vm5477_vm14, %v1906_v61, %v2053_v39  ;;  %v1913_v56 = vor.u32 %v1911_v42, %v1910_v54  ;;  %v1914_v12 = vrot.slane %v1910_v54, 4 }
 0x1d9   :  { %2052 = vst [vmem:[#allocation2 + $0x38] sm:$0xf] %v2051_v5  ;;  %2055 = vst [vmem:[#allocation2 + $0x3c] sm:$0x1] %v2054_v6  ;;  %v2039_v50 = vsel %vm5533_vm11, %v1889_v4, %v2038_v40  ;;  %v2042_v2 = vsel %vm5477_vm14, %v1890_v15, %v2041_v10  ;;  %v1897_v57 = vor.u32 %v1895_v8, %v1894_v21  ;;  %v1898_v28 = vrot.slane %v1894_v21, 4 }
 0x1da   :  { %2040 = vst [vmem:[#allocation2 + $0x28] sm:$0xf] %v2039_v50  ;;  %2043 = vst [vmem:[#allocation2 + $0x2c] sm:$0x1] %v2042_v2  ;;  %v2057_v29 = vsel %vm5533_vm11, %v1913_v56, %v2056_v0  ;;  %v2060_v34 = vsel %vm5477_vm14, %v1914_v12, %v2059_v52  ;;  %v2354_v39 = vrot.slane %v2352_v43, 1  ;;  %v3074_v49 = vshll.u32 %v4166_v41, 16 }
 0x1db   :  { %2058 = vst [vmem:[#allocation2 + $0x40] sm:$0xf] %v2057_v29  ;;  %2061 = vst [vmem:[#allocation2 + $0x44] sm:$0x1] %v2060_v34  ;;  %v2045_v51 = vsel %vm5533_vm11, %v1897_v57, %v2044_v62  ;;  %v2048_v23 = vsel %vm5477_vm14, %v1898_v28, %v2047_v48  ;;  %v2711_v27 = vshrl.u32 %v5777_v26, 16  ;;  %v2350_v60 = vshrl.u32 %v5781_v58, 16 }
 0x1dc   :  { %2046 = vst [vmem:[#allocation2 + $0x30] sm:$0xf] %v2045_v51  ;;  %2049 = vst [vmem:[#allocation2 + $0x34] sm:$0x1] %v2048_v23  ;;  %v3076_v7 = vrot.slane %v3074_v49, 1  ;;  %v3072_v10 = vshrl.u32 %v4166_v41, 16 }
 0x1dd   :  { %v2716_v31 = vor.u32 %v2715_v20, %v2711_v27  ;;  %v2355_v63 = vor.u32 %v2354_v39, %v2350_v60  ;;  %v5862_v60 = vpop.permute.xlu1 %3005 }
 0x1de   :  { %v3077_v55 = vor.u32 %v3076_v7, %v3072_v10  ;;  %6539 = vst [vmem:[#allocation3_spill] sm:$0xff] %v5862_v60  ;;  %v2107_v60 = vld [vmem:[#allocation2 + $0x94] sm:$0x1] }
 0x1e0   :  { %v5816_v44 = vld [vmem:[#allocation2 + $0x38] sm:$0xf]  ;;  %v2133_v13 = vld [vmem:[#allocation2 + $0x3c] sm:$0x1] }
 0x1e1   :  { %v5818_v24 = vld [vmem:[#allocation2 + $0x38] sm:$0xf]  ;;  %v4155_v38 = vcombine.low %v5816_v44, %v5816_v44  ;;  %v5828_v11 = vld [vmem:[#allocation2 + $0x28] sm:$0xf]  ;;  %v2180_v0 = vld [vmem:[#allocation2 + $0x3c] sm:$0x1] }
 0x1e2   :  { %v4108_v59 = vcombine.low %v5818_v24, %v5818_v24  ;;  %v2149_v40 = vld [vmem:[#allocation2 + $0x38] sm:$0xe]  ;;  %v4153_v17 = vcombine.low %v5828_v11, %v5828_v11  ;;  %v5834_v26 = vld [vmem:[#allocation2 + $0x28] sm:$0xf]  ;;  %v5840_v16 = vld [vmem:[#allocation2 + $0x40] sm:$0xf]  ;;  %v4124_v20 = vcombine.low %v5818_v24, %v2180_v0 }
 0x1e3   :  { %3001 = vrot.lane.b32.xlu1 %v4155_v38, %s4599_s12  ;;  %v4093_v42 = vcombine.low %v2149_v40, %v2133_v13  ;;  %v2196_v52 = vld [vmem:[#allocation2 + $0x38] sm:$0xe]  ;;  %v4106_v8 = vcombine.low %v5834_v26, %v5834_v26  ;;  %v2228_v61 = vld [vmem:[#allocation2 + $0x3c] sm:$0x1]  ;;  %v4109_v62 = vcombine.low %v5840_v16, %v5840_v16  ;;  %v2213_v9 = vld [vmem:[#allocation2 + $0x40] sm:$0xf] }
 0x1e4   :  { %2635 = vrot.lane.b32.xlu0 %v4108_v59, %s4596_s7  ;;  %v4140_v58 = vcombine.low %v2196_v52, %v2180_v0  ;;  %v2244_v54 = vld [vmem:[#allocation2 + $0x38] sm:$0xe]  ;;  %v2226_v4 = vld [vmem:[#allocation2 + $0x2c] sm:$0x1]  ;;  %v2242_v15 = vld [vmem:[#allocation2 + $0x28] sm:$0xe]  ;;  %v4156_v5 = vcombine.low %v2213_v9, %v2213_v9  ;;  %v5860_v27 = vcombine.low %v5816_v44, %v2228_v61 }
 0x1e5   :  { %v2534_v30 = vrot.slane %v4093_v42, 1  ;;  %v4187_v35 = vcombine.low %v2244_v54, %v2228_v61  ;;  %v2178_v21 = vld [vmem:[#allocation2 + $0x2c] sm:$0x1]  ;;  %v2194_v25 = vld [vmem:[#allocation2 + $0x28] sm:$0xe]  ;;  %v4185_v6 = vcombine.low %v2242_v15, %v2226_v4  ;;  %v2748_v44 = vshll.u32 %v4124_v20, 16 }
 0x1e6   :  { %v2901_v48 = vrot.slane %v4140_v58, 1  ;;  %v4138_v56 = vcombine.low %v2194_v25, %v2178_v21  ;;  %v2131_v12 = vld [vmem:[#allocation2 + $0x2c] sm:$0x1]  ;;  %v2147_v1 = vld [vmem:[#allocation2 + $0x28] sm:$0xe]  ;;  %v4549_v42 = vld [vmem:[%s6529_s3] sm:$0xff]   ;;  %v5875_v0 = vcombine.low %v5828_v11, %v2226_v4 }
 0x1e7   :  { %2817 = vrot.lane.b32.xlu1 %v2716_v31, %s4597_s19  ;;  %v3268_v18 = vrot.slane %v4187_v35, 1  ;;  %v3266_v19 = vrot.slane %v4185_v6, 1  ;;  %v4091_v2 = vcombine.low %v2147_v1, %v2131_v12  ;;  %v5850_v57 = vld [vmem:[#allocation2 + $0x30] sm:$0xf]  ;;  %v2229_v28 = vld [vmem:[#allocation2 + $0x44] sm:$0x1]  ;;  %4278 = vmatprep.subr.bf16.mxu1 %v4549_v42 }
 0x1e8   :  { %2451 = vrot.lane.b32.xlu0 %v2355_v63, %s4594_s24  ;;  %v2899_v50 = vrot.slane %v4138_v56, 1  ;;  %v2245_v14 = vld [vmem:[#allocation2 + $0x40] sm:$0xe]  ;;  %v2117_v29 = vld [vmem:[#allocation2 + $0x38] sm:$0xf]  ;;  %v4154_v3 = vcombine.low %v5850_v57, %v5850_v57  ;;  %v3109_v58 = vshll.u32 %v5860_v27, 16  ;;  %4279 = vmatpush3.bf16.msra.mxu1 %v4549_v42 }
 0x1e9   :  { %v2181_v34 = vld [vmem:[#allocation2 + $0x44] sm:$0x1]  ;;  %v2197_v33 = vld [vmem:[#allocation2 + $0x40] sm:$0xe]  ;;  %v2132_v32 = vld [vmem:[#allocation2 + $0x34] sm:$0x1]  ;;  %v4188_v36 = vcombine.low %v2245_v14, %v2229_v28  ;;  %v4077_v47 = vcombine.low %v2117_v29, %v2133_v13  ;;  %v5865_v13 = vcombine.low %v5834_v26, %v2178_v21 }
 0x1ea   :  { %v2148_v51 = vld [vmem:[#allocation2 + $0x30] sm:$0xe]  ;;  %v2532_v23 = vrot.slane %v4091_v2, 1  ;;  %v4141_v41 = vcombine.low %v2197_v33, %v2181_v34  ;;  %v2115_v38 = vld [vmem:[#allocation2 + $0x28] sm:$0xf]  ;;  %v5889_v54 = vcombine.low %v5840_v16, %v2181_v34  ;;  %v2750_v25 = vrot.slane %v2748_v44, 1 }
 0x1eb   :  { %2997 = vrot.lane.b32.xlu1 %v4153_v17, %s4599_s12  ;;  %v2163_v37 = vld [vmem:[#allocation2 + $0x30] sm:$0xf]  ;;  %v4092_v43 = vcombine.low %v2148_v51, %v2132_v32  ;;  %v3269_v39 = vrot.slane %v4188_v36, 1  ;;  %v2179_v49 = vld [vmem:[#allocation2 + $0x34] sm:$0x1]  ;;  %v5869_v17 = vpop.permute.xlu0 %2447  ;;  %v2734_v61 = vshll.u32 %v5865_v13, 16 }
 0x1ec   :  { %3183 = vrot.lane.b32.xlu0 %v3077_v55, %s4600_s29  ;;  %v4107_v59 = vcombine.low %v2163_v37, %v2163_v37  ;;  %v2195_v31 = vld [vmem:[#allocation2 + $0x30] sm:$0xe]  ;;  %v2227_v63 = vld [vmem:[#allocation2 + $0x34] sm:$0x1]  ;;  %v2902_v24 = vrot.slane %v4141_v41, 1  ;;  %v2387_v55 = vshll.u32 %v4077_v47, 16 }
 0x1ed   :  { %v2243_v7 = vld [vmem:[#allocation2 + $0x30] sm:$0xe]  ;;  %v2533_v10 = vrot.slane %v4092_v43, 1  ;;  %v4139_v26 = vcombine.low %v2195_v31, %v2179_v49  ;;  %v4553_v11 = vld [vmem:[%s6529_s3 + $0x8] sm:$0xff]   ;;  %v2385_v35 = vshrl.u32 %v4077_v47, 16  ;;  %v5901_v16 = vcombine.low %v5850_v57, %v2227_v63 }
 0x1ee   :  { %v2116_v40 = vld [vmem:[#allocation2 + $0x30] sm:$0xf]  ;;  %v4186_v52 = vcombine.low %v2243_v7, %v2227_v63  ;;  %4280 = vmatprep.subr.bf16.mxu1 %v4553_v11  ;;  %v3107_v1 = vshrl.u32 %v5860_v27, 16  ;;  %v3093_v14 = vshrl.u32 %v5875_v0, 16  ;;  %v2755_v27 = vshll.u32 %v5889_v54, 16 }
 0x1ef   :  { %2557 = vrot.lane.b32.xlu1 %v2534_v30, %s4595_s18  ;;  %v5877_v30 = vcombine.low %v2115_v38, %v2131_v12  ;;  %v2900_v4 = vrot.slane %v4139_v26, 1  ;;  %v5895_v21 = vpop.permute.xlu0 %2543  ;;  %v2746_v12 = vshrl.u32 %v4124_v20, 16  ;;  %4281 = vmatpush3.bf16.msra.mxu1 %v4553_v11  ;;  %v4557_v29 = vld [vmem:[%s6529_s3 + $0x10] ss:$0 sps:$4 sm:$0x33]  }
 0x1f0   :  { %2631 = vrot.lane.b32.xlu0 %v4106_v8, %s4596_s7  ;;  %v5879_v8 = vcombine.low %v2213_v9, %v2229_v28  ;;  %v2389_v9 = vrot.slane %v2387_v55, 1  ;;  %v3267_v15 = vrot.slane %v4186_v52, 1  ;;  %v2732_v28 = vshrl.u32 %v5865_v13, 16  ;;  %4301 = vmatprep.subr.msk.bf16.mxu1 %vm1550_vm0, %v4557_v29 }
 0x1f1   :  { %v2373_v56 = vshll.u32 %v5877_v30, 16  ;;  %v2751_v33 = vor.u32 %v2750_v25, %v2746_v12  ;;  %v2371_v51 = vshrl.u32 %v5877_v30, 16  ;;  %v3675_v43 = vsel %vm1550_vm0, %v4557_v29, 0  ;;  %v2074_v30 = vld [vmem:[#allocation2 + $0x68] sm:$0xf] }
 0x1f2   :  { %v3116_v6 = vshll.u32 %v5879_v8, 16  ;;  %v2390_v2 = vor.u32 %v2389_v9, %v2385_v35  ;;  %v3114_v57 = vshrl.u32 %v5879_v8, 16  ;;  %v2077_v8 = vld [vmem:[#allocation2 + $0x6c] sm:$0x1]  ;;  %v2757_v11 = vrot.slane %v2755_v27, 1 }
 0x1f3   :  { %2637 = vrot.lane.b32.xlu1 %v4109_v62, %s4596_s7  ;;  %v5891_v62 = vcombine.low %v2116_v40, %v2132_v32  ;;  %v2375_v41 = vrot.slane %v2373_v56, 1  ;;  %4283 = vmatpush3.bf16.msra.mxu1 %v3675_v43  ;;  %v2080_v56 = vld [vmem:[#allocation2 + $0x70] sm:$0xf]  ;;  %v2083_v29 = vld [vmem:[#allocation2 + $0x74] sm:$0x1] }
 0x1f4   :  { %2923 = vrot.lane.b32.xlu0 %v2901_v48, %s4598_s22  ;;  %v5893_v48 = vpop.permute.xlu1 %3197  ;;  %v3118_v47 = vrot.slane %v3116_v6, 1  ;;  %v2068_v43 = vld [vmem:[#allocation2 + $0x60] sm:$0xf] }
 0x1f5   :  { %6540 = vst [vmem:[#allocation4_spill] sm:$0xff] %v5893_v48  ;;  %v2378_v13 = vshrl.u32 %v5891_v62, 16  ;;  %v2376_v52 = vor.u32 %v2375_v41, %v2371_v51 }
 0x1f6   :  { %v3119_v26 = vor.u32 %v3118_v47, %v3114_v57 }
 0x1f7   :  { %3289 = vrot.lane.b32.xlu1 %v3268_v18, %s4601_s8  ;;  %v3095_v18 = vshll.u32 %v5875_v0, 16 }
 0x1f8   :  { %3003 = vrot.lane.b32.xlu0 %v4156_v5, %s4599_s12  ;;  %v5898_v5 = vcombine.low %v2163_v37, %v2179_v49  ;;  %v5917_v37 = vpop.permute.xlu1 %3293 }
 0x1f9   :  { %v3097_v32 = vrot.slane %v3095_v18, 1  ;;  %6541 = vst [vmem:[#allocation5_spill] sm:$0xff] %v5917_v37 }
 0x1fb   :  { %3285 = vrot.lane.b32.xlu1 %v3266_v19, %s4601_s8  ;;  %v3111_v19 = vrot.slane %v3109_v58, 1  ;;  %v3098_v55 = vor.u32 %v3097_v32, %v3093_v14 }
 0x1fc   :  { %2919 = vrot.lane.b32.xlu0 %v2899_v50, %s4598_s22  ;;  %v2736_v50 = vrot.slane %v2734_v61, 1 }
 0x1fe   :  { %v2737_v49 = vor.u32 %v2736_v50, %v2732_v28 }
 0x1ff   :  { %2553 = vrot.lane.b32.xlu1 %v2532_v23, %s4595_s18  ;;  %v2380_v23 = vshll.u32 %v5891_v62, 16  ;;  %v2741_v62 = vshll.u32 %v5898_v5, 16 }
 0x200   :  { %2999 = vrot.lane.b32.xlu0 %v4154_v3, %s4599_s12 }
 0x201   :  { %v2382_v44 = vrot.slane %v2380_v23, 1  ;;  %v2150_v23 = vld [vmem:[#allocation2 + $0x50] sm:$0xe] }
 0x203   :  { %2633 = vrot.lane.b32.xlu1 %v4107_v59, %s4596_s7  ;;  %v5924_v59 = vpop.permute.xlu0 %2463  ;;  %v2383_v50 = vor.u32 %v2382_v44, %v2378_v13  ;;  %v2753_v44 = vshrl.u32 %v5889_v54, 16 }
 0x204   :  { %3291 = vrot.lane.b32.xlu0 %v3269_v39, %s4601_s8  ;;  %6542 = vst [vmem:[#allocation6_spill] sm:$0xff] %v5924_v59  ;;  %v3112_v39 = vor.u32 %v3111_v19, %v3107_v1 }
 0x207   :  { %2925 = vrot.lane.b32.xlu1 %v2902_v24, %s4598_s22  ;;  %v3102_v24 = vshll.u32 %v5901_v16, 16 }
 0x208   :  { %2555 = vrot.lane.b32.xlu0 %v2533_v10, %s4595_s18 }
 0x209   :  { %v3104_v25 = vrot.slane %v3102_v24, 1  ;;  %v4580_v24 = vld [vmem:[#allocation2 + $0x54] sm:$0x1] }
 0x20b   :  { %2921 = vrot.lane.b32.xlu1 %v2900_v4, %s4598_s22  ;;  %v2065_v4 = vld [vmem:[#allocation2 + $0x5c] sm:$0x1] }
 0x20c   :  { %3287 = vrot.lane.b32.xlu0 %v3267_v15, %s4601_s8 }
 0x20d   :  { %v4272_v34 = vpop.f32.mrb[8].mxu0 }
 0x20e   :  { %v1629_v3 = vadd.f32 %v4272_v34, %v5668_v22  ;;  %v1620_v36 = vpop.f32.mrb[9].mxu0 }
 0x20f   :  { %v1621_v20 = vadd.f32 %v5668_v22, %v1620_v36  ;;  %2461 = vrot.lane.b32.xlu1 %v2390_v2, %s4594_s24  ;;  %v4273_v38 = vpop.f32.mrb[10].mxu0 }
 0x210   :  { %2827 = vrot.lane.b32.xlu0 %v2751_v33, %s4597_s19  ;;  %v4228_v31 = vpack.c.bf16 %v1629_v3, %v1629_v3  ;;  %v1632_v63 = vadd.f32 %v4273_v38, %v5668_v22  ;;  %v1623_v7 = vpop.f32.mrb[11].mxu0 }
 0x211   :  { %v4226_v40 = vpack.c.bf16 %v1621_v20, %v1621_v20  ;;  %v1624_v10 = vadd.f32 %v5668_v22, %v1623_v7  ;;  %v2062_v22 = vld [vmem:[#allocation2 + $0x58] sm:$0xf]  ;;  %v2071_v20 = vld [vmem:[#allocation2 + $0x64] sm:$0x1] }
 0x212   :  { %v1932_v42 = vshrl.u32 %v4228_v31, 16  ;;  %v4229_v0 = vpack.c.bf16 %v1632_v63, %v1632_v63  ;;  %v1935_v9 = vshll.u32 %v4228_v31, 16 }
 0x213   :  { %v1916_v58 = vshrl.u32 %v4226_v40, 16  ;;  %v4227_v61 = vpack.c.bf16 %v1624_v10, %v1624_v10  ;;  %3193 = vrot.lane.b32.xlu1 %v3112_v39, %s4600_s29  ;;  %v1919_v6 = vshll.u32 %v4226_v40, 16  ;;  %v4094_v40 = vcombine.low %v2150_v23, %v4580_v24 }
 0x214   :  { %2823 = vrot.lane.b32.xlu0 %v2737_v49, %s4597_s19  ;;  %v1934_v35 = vrot.slane %v1932_v42, 7  ;;  %v1940_v15 = vshrl.u32 %v4229_v0, 16  ;;  %v1943_v57 = vshll.u32 %v4229_v0, 16  ;;  %v3100_v42 = vshrl.u32 %v5901_v16, 16 }
 0x215   :  { %v1918_v18 = vrot.slane %v1916_v58, 7  ;;  %v1924_v12 = vshrl.u32 %v4227_v61, 16  ;;  %v5934_v1 = vpop.permute.xlu1 %2993  ;;  %v1927_v51 = vshll.u32 %v4227_v61, 16  ;;  %v2743_v58 = vrot.slane %v2741_v62, 1 }
 0x216   :  { %v5936_v19 = vpop.permute.xlu0 %2627  ;;  %v1937_v2 = vor.u32 %v1935_v9, %v1934_v35  ;;  %v1938_v28 = vrot.slane %v1934_v35, 4  ;;  %v1942_v14 = vrot.slane %v1940_v15, 7  ;;  %v2535_v61 = vrot.slane %v4094_v40, 1 }
 0x217   :  { %v1921_v34 = vor.u32 %v1919_v6, %v1918_v18  ;;  %v1922_v33 = vrot.slane %v1918_v18, 4  ;;  %v1926_v32 = vrot.slane %v1924_v12, 7  ;;  %3189 = vrot.lane.b32.xlu1 %v3098_v55, %s4600_s29 }
 0x218   :  { %3195 = vrot.lane.b32.xlu0 %v3119_v26, %s4600_s29  ;;  %v2075_v3 = vsel %vm5533_vm11, %v1937_v2, %v2074_v30  ;;  %v2078_v36 = vsel %vm5477_vm14, %v1938_v28, %v2077_v8  ;;  %v1945_v47 = vor.u32 %v1943_v57, %v1942_v14  ;;  %v1946_v41 = vrot.slane %v1942_v14, 4 }
 0x219   :  { %2076 = vst [vmem:[#allocation2 + $0x68] sm:$0xf] %v2075_v3  ;;  %2079 = vst [vmem:[#allocation2 + $0x6c] sm:$0x1] %v2078_v36  ;;  %v2063_v38 = vsel %vm5533_vm11, %v1921_v34, %v2062_v22  ;;  %v2066_v39 = vsel %vm5477_vm14, %v1922_v33, %v2065_v4  ;;  %v1929_v49 = vor.u32 %v1927_v51, %v1926_v32  ;;  %v1930_v27 = vrot.slane %v1926_v32, 4  ;;  %v5948_v31 = vpop.permute.xlu1 %2549 }
 0x21a   :  { %v5950_v63 = vpop.permute.xlu0 %2623  ;;  %2064 = vst [vmem:[#allocation2 + $0x58] sm:$0xf] %v2063_v38  ;;  %2067 = vst [vmem:[#allocation2 + $0x5c] sm:$0x1] %v2066_v39  ;;  %v2081_v7 = vsel %vm5533_vm11, %v1945_v47, %v2080_v56  ;;  %v2084_v13 = vsel %vm5477_vm14, %v1946_v41, %v2083_v29  ;;  %v2758_v30 = vor.u32 %v2757_v11, %v2753_v44 }
 0x21b   :  { %2082 = vst [vmem:[#allocation2 + $0x70] sm:$0xf] %v2081_v7  ;;  %2085 = vst [vmem:[#allocation2 + $0x74] sm:$0x1] %v2084_v13  ;;  %v2069_v10 = vsel %vm5533_vm11, %v1929_v49, %v2068_v43  ;;  %v2072_v55 = vsel %vm5477_vm14, %v1930_v27, %v2071_v20  ;;  %2457 = vrot.lane.b32.xlu1 %v2376_v52, %s4594_s24  ;;  %v3105_v8 = vor.u32 %v3104_v25, %v3100_v42 }
 0x21c   :  { %2459 = vrot.lane.b32.xlu0 %v2383_v50, %s4594_s24  ;;  %2070 = vst [vmem:[#allocation2 + $0x60] sm:$0xf] %v2069_v10  ;;  %2073 = vst [vmem:[#allocation2 + $0x64] sm:$0x1] %v2072_v55  ;;  %v2739_v52 = vshrl.u32 %v5898_v5, 16 }
 0x21d   :  { %v5964_v0 = vpop.permute.xlu1 %2629 }
 0x21e   :  { %v5966_v26 = vpop.permute.xlu0 %2915  ;;  %v2744_v22 = vor.u32 %v2743_v58, %v2739_v52 }
 0x21f   :  { %2829 = vrot.lane.b32.xlu1 %v2758_v30, %s4597_s19 }
 0x220   :  { %3191 = vrot.lane.b32.xlu0 %v3105_v8, %s4600_s29  ;;  %v2121_v35 = vld [vmem:[#allocation2 + $0x68] sm:$0xf]  ;;  %v2137_v54 = vld [vmem:[#allocation2 + $0x6c] sm:$0x1] }
 0x221   :  { %v5971_v9 = vpop.permute.xlu1 %3281  ;;  %v4081_v4 = vcombine.low %v2121_v35, %v2137_v54  ;;  %v2119_v15 = vld [vmem:[#allocation2 + $0x58] sm:$0xf]  ;;  %v2135_v18 = vld [vmem:[#allocation2 + $0x5c] sm:$0x1]  ;;  %v2153_v49 = vld [vmem:[#allocation2 + $0x68] sm:$0xe] }
 0x222   :  { %v5973_v16 = vpop.permute.xlu0 %2995  ;;  %v4079_v11 = vcombine.low %v2119_v15, %v2135_v18  ;;  %v2151_v51 = vld [vmem:[#allocation2 + $0x58] sm:$0xe]  ;;  %v5984_v38 = vld [vmem:[#allocation2 + $0x5c] sm:$0x1]  ;;  %v4097_v40 = vcombine.low %v2153_v49, %v2137_v54  ;;  %v2168_v10 = vld [vmem:[#allocation2 + $0x68] sm:$0xf] }
 0x223   :  { %2825 = vrot.lane.b32.xlu1 %v2744_v22, %s4597_s19  ;;  %v2415_v62 = vshll.u32 %v4081_v4, 16  ;;  %v2120_v25 = vld [vmem:[#allocation2 + $0x60] sm:$0xf]  ;;  %v2136_v6 = vld [vmem:[#allocation2 + $0x64] sm:$0x1]  ;;  %v2413_v50 = vshrl.u32 %v4081_v4, 16  ;;  %v4095_v43 = vcombine.low %v2151_v51, %v2135_v18 }
 0x224   :  { %2559 = vrot.lane.b32.xlu0 %v2535_v61, %s4595_s18  ;;  %v4080_v5 = vcombine.low %v2120_v25, %v2136_v6  ;;  %v2401_v56 = vshll.u32 %v4079_v11, 16  ;;  %v2152_v34 = vld [vmem:[#allocation2 + $0x60] sm:$0xe]  ;;  %v2399_v3 = vshrl.u32 %v4079_v11, 16  ;;  %v2166_v20 = vld [vmem:[#allocation2 + $0x58] sm:$0xf] }
 0x225   :  { %v2417_v2 = vrot.slane %v2415_v62, 1  ;;  %v5979_v28 = vpop.permute.xlu1 %2545  ;;  %v4096_v47 = vcombine.low %v2152_v34, %v2136_v6  ;;  %v4126_v13 = vcombine.low %v2166_v20, %v5984_v38  ;;  %v2536_v24 = vrot.slane %v4095_v43, 1  ;;  %v5993_v55 = vld [vmem:[#allocation2 + $0x6c] sm:$0x1]  ;;  %v2167_v44 = vld [vmem:[#allocation2 + $0x60] sm:$0xf] }
 0x226   :  { %v5977_v12 = vpop.permute.xlu0 %2911  ;;  %v2408_v14 = vshll.u32 %v4080_v5, 16  ;;  %v2403_v29 = vrot.slane %v2401_v56, 1  ;;  %v2406_v33 = vshrl.u32 %v4080_v5, 16  ;;  %v5996_v42 = vld [vmem:[#allocation2 + $0x64] sm:$0x1]  ;;  %v4110_v58 = vcombine.low %v2166_v20, %v2166_v20 }
 0x227   :  { %v2418_v57 = vor.u32 %v2417_v2, %v2413_v50  ;;  %v2537_v7 = vrot.slane %v4096_v47, 1  ;;  %v4128_v52 = vcombine.low %v2168_v10, %v5993_v55  ;;  %v2762_v61 = vshll.u32 %v4126_v13, 16  ;;  %v1722_v22 = vld [vmem:[#allocation2 + $0x98] sm:$0x1]  ;;  %v2169_v4 = vld [vmem:[#allocation2 + $0x70] sm:$0xf] }
 0x228   :  { %v2410_v32 = vrot.slane %v2408_v14, 1  ;;  %v2404_v41 = vor.u32 %v2403_v29, %v2399_v3  ;;  %v2538_v35 = vrot.slane %v4097_v40, 1  ;;  %v4127_v54 = vcombine.low %v2167_v44, %v5996_v42  ;;  %v6006_v15 = vld [vmem:[#allocation2 + $0x74] sm:$0x1]  ;;  %v1784_v18 = vld [vmem:[#allocation2 + $0x9c] sm:$0x1] }
 0x229   :  { %2469 = vrot.lane.b32.xlu1 %v2418_v57, %s4594_s24  ;;  %v5986_v39 = vpop.permute.xlu1 %2625  ;;  %v4112_v62 = vcombine.low %v2168_v10, %v2168_v10  ;;  %v2764_v25 = vrot.slane %v2762_v61, 1  ;;  %v2776_v6 = vshll.u32 %v4128_v52, 16  ;;  %v1723_v5 = vsel %vm5477_vm14, 0, %v1722_v22  ;;  %v2200_v40 = vld [vmem:[#allocation2 + $0x68] sm:$0xe] }
 0x22a   :  { %v5982_v23 = vpop.permute.xlu0 %2991  ;;  %v2411_v36 = vor.u32 %v2410_v32, %v2406_v33  ;;  %v4111_v56 = vcombine.low %v2167_v44, %v2167_v44  ;;  %v4129_v50 = vcombine.low %v2169_v4, %v6006_v15  ;;  %v2769_v2 = vshll.u32 %v4127_v54, 16  ;;  %1724 = vst [vmem:[#allocation2 + $0x98] sm:$0x1] %v1723_v5  ;;  %v2199_v10 = vld [vmem:[#allocation2 + $0x60] sm:$0xe] }
 0x22b   :  { %v1785_v14 = vsel %vm5487_vm15, 0, %v1784_v18  ;;  %v2760_v29 = vshrl.u32 %v4126_v13, 16  ;;  %v2778_v32 = vrot.slane %v2776_v6, 1  ;;  %v4113_v51 = vcombine.low %v2169_v4, %v2169_v4  ;;  %v2215_v44 = vld [vmem:[#allocation2 + $0x60] sm:$0xf] }
 0x22c   :  { %2467 = vrot.lane.b32.xlu0 %v2411_v36, %s4594_s24  ;;  %1786 = vst [vmem:[#allocation2 + $0x9c] sm:$0x1] %v1785_v14  ;;  %v2771_v3 = vrot.slane %v2769_v2, 1  ;;  %v2198_v36 = vld [vmem:[#allocation2 + $0x58] sm:$0xe]  ;;  %v2783_v47 = vshll.u32 %v4129_v50, 16  ;;  %v4143_v4 = vcombine.low %v2199_v10, %v5996_v42 }
 0x22d   :  { %2465 = vrot.lane.b32.xlu1 %v2404_v41, %s4594_s24  ;;  %v6001_v8 = vpop.permute.xlu1 %2917  ;;  %v2765_v33 = vor.u32 %v2764_v25, %v2760_v29  ;;  %v2774_v46 = vshrl.u32 %v4128_v52, 16  ;;  %v2767_v41 = vshrl.u32 %v4127_v54, 16  ;;  %v4142_v49 = vcombine.low %v2198_v36, %v5984_v38  ;;  %v4581_v54 = vld [vmem:[#allocation2] sm:$0xf]  ;;  %v2201_v25 = vld [vmem:[#allocation2 + $0x70] sm:$0xe] }
 0x22e   :  { %v5990_v27 = vpop.permute.xlu0 %3283  ;;  %v2781_v52 = vshrl.u32 %v4129_v50, 16  ;;  %v3313_v38 = vsel %vm1178_vm1, %v4581_v54, %v5869_v17  ;;  %v2217_v6 = vld [vmem:[#allocation2 + $0x70] sm:$0xf]  ;;  %v6041_v5 = vld [vmem:[#allocation2 + $0x74] sm:$0x1]  ;;  %v2904_v50 = vrot.slane %v4143_v4, 1  ;;  %v4145_v42 = vcombine.low %v2201_v25, %v6006_v15 }
 0x22f   :  { %6543 = vst [vmem:[#allocation7_spill] sm:$0xff] %v5990_v27  ;;  %v2779_v20 = vor.u32 %v2778_v32, %v2774_v46  ;;  %v2772_v13 = vor.u32 %v2771_v3, %v2767_v41  ;;  %v2903_v61 = vrot.slane %v4142_v49, 1  ;;  %v3360_v17 = vsel %vm1227_vm2, %v3313_v38, %v5895_v21  ;;  %v2216_v29 = vld [vmem:[#allocation2 + $0x68] sm:$0xf]  ;;  %v6054_v32 = vld [vmem:[#allocation2 + $0x70] sm:$0xf] }
 0x230   :  { %2563 = vrot.lane.b32.xlu0 %v2537_v7, %s4595_s18  ;;  %v6050_v2 = vcombine.low %v2217_v6, %v6041_v5  ;;  %6545 = vst [vmem:[#allocation9_spill] sm:$0xff] %v6054_v32  ;;  %v6060_v21 = vsel %vm1260_vm3, %v3360_v17, %v5950_v63  ;;  %v4582_v15 = vld [vmem:[%s6528_s2] ss:$0 sm:$0xff]  ;;  %v4158_v46 = vcombine.low %v2215_v44, %v2215_v44 }
 0x231   :  { %2561 = vrot.lane.b32.xlu1 %v2536_v24, %s4595_s18  ;;  %v6016_v57 = vpop.permute.xlu1 %2913  ;;  %v2785_v24 = vrot.slane %v2783_v47, 1  ;;  %v4160_v41 = vcombine.low %v2217_v6, %v2217_v6  ;;  %v4159_v38 = vcombine.low %v2216_v29, %v2216_v29 }
 0x232   :  { %v5999_v30 = vpop.permute.xlu0 %2551  ;;  %v3144_v63 = vshll.u32 %v6050_v2, 16 }
 0x233   :  { %6544 = vst [vmem:[#allocation8_spill] sm:$0xff] %v5999_v30  ;;  %v2786_v22 = vor.u32 %v2785_v24, %v2781_v52  ;;  %v6070_v52 = vld [vmem:[#allocation2 + $0x60] sm:$0xe] }
 0x234   :  { %2639 = vrot.lane.b32.xlu0 %v4110_v58, %s4596_s7  ;;  %v6030_v58 = vld [vmem:[#allocation2 + $0x64] sm:$0x1] }
 0x235   :  { %2565 = vrot.lane.b32.xlu1 %v2538_v35, %s4595_s18  ;;  %v6024_v43 = vpop.permute.xlu1 %2453  ;;  %v4144_v35 = vcombine.low %v2200_v40, %v5993_v55  ;;  %v4174_v18 = vcombine.low %v2215_v44, %v6030_v58  ;;  %v2906_v40 = vrot.slane %v4145_v42, 1  ;;  %v6547_v53 = vcombine.low %v6070_v52, %v6030_v58 }
 0x236   :  { %v6009_v11 = vpop.permute.xlu0 %2547 }
 0x237   :  { %v2905_v55 = vrot.slane %v4144_v35, 1  ;;  %v3130_v14 = vshll.u32 %v4174_v18, 16  ;;  %v3128_v6 = vshrl.u32 %v4174_v18, 16 }
 0x238   :  { %2643 = vrot.lane.b32.xlu0 %v4112_v62, %s4596_s7 }
 0x239   :  { %2641 = vrot.lane.b32.xlu1 %v4111_v56, %s4596_s7  ;;  %v6038_v62 = vpop.permute.xlu1 %3185  ;;  %v3132_v10 = vrot.slane %v3130_v14, 1  ;;  %v2098_v14 = vld [vmem:[#allocation2 + $0x88] sm:$0xf] }
 0x23a   :  { %v6020_v34 = vpop.permute.xlu0 %3279 }
 0x23c   :  { %2831 = vrot.lane.b32.xlu0 %v2765_v33, %s4597_s19 }
 0x23d   :  { %2645 = vrot.lane.b32.xlu1 %v4113_v51, %s4596_s7  ;;  %v6056_v51 = vld [vmem:[#allocation2 + $0x74] sm:$0x1]  ;;  %v2450_v3 = vpop.permute.xlu1 %2449 }
 0x23e   :  { %v6027_v7 = vpop.permute.xlu0 %2819  ;;  %v6075_v44 = vcombine.low %v6054_v32, %v6056_v51 }
 0x240   :  { %2835 = vrot.lane.b32.xlu0 %v2779_v20, %s4597_s19  ;;  %v6065_v20 = vld [vmem:[#allocation2 + $0x6c] sm:$0x1]  ;;  %v2422_v18 = vshll.u32 %v6075_v44, 16 }
 0x241   :  { %2833 = vrot.lane.b32.xlu1 %v2772_v13, %s4597_s19  ;;  %v6079_v25 = vcombine.low %v2216_v29, %v6065_v20  ;;  %v4583_v29 = vld [vmem:[#allocation2 + $0x8] sm:$0xf] }
 0x242   :  { %v6043_v56 = vpop.permute.xlu0 %2815 }
 0x244   :  { %2927 = vrot.lane.b32.xlu0 %v2903_v61, %s4598_s22 }
 0x245   :  { %2837 = vrot.lane.b32.xlu1 %v2786_v22, %s4597_s19 }
 0x246   :  { %v6067_v49 = vpop.permute.xlu0 %3187 }
 0x248   :  { %2931 = vrot.lane.b32.xlu0 %v2905_v55, %s4598_s22 }
 0x249   :  { %2929 = vrot.lane.b32.xlu1 %v2904_v50, %s4598_s22  ;;  %v4276_v33 = vpop.f32.mrb[12].mxu0  ;;  %v3142_v50 = vshrl.u32 %v6050_v2, 16  ;;  %v3316_v2 = vsel %vm1178_vm1, %v4583_v29, %v2450_v3 }
 0x24a   :  { %v1645_v36 = vadd.f32 %v4582_v15, %v4276_v33  ;;  %v1636_v47 = vpop.f32.mrb[13].mxu0  ;;  %v2101_v33 = vld [vmem:[#allocation2 + $0x8c] sm:$0x1]  ;;  %v6089_v42 = vpop.permute.xlu0 %2455 }
 0x24b   :  { %v1637_v13 = vadd.f32 %v4582_v15, %v1636_v47  ;;  %v4277_v24 = vpop.f32.mrb[14].mxu0  ;;  %6546 = vst [vmem:[#allocation10_spill] sm:$0xff] %v6089_v42  ;;  %v2092_v42 = vld [vmem:[#allocation2 + $0x80] sm:$0xf] }
 0x24c   :  { %v4232_v61 = vpack.c.bf16 %v1645_v36, %v1645_v36  ;;  %v1648_v35 = vadd.f32 %v4582_v15, %v4277_v24  ;;  %3007 = vrot.lane.b32.xlu0 %v4158_v46, %s4599_s12  ;;  %v1639_v54 = vpop.f32.mrb[15].mxu0  ;;  %v3133_v46 = vor.u32 %v3132_v10, %v3128_v6 }
 0x24d   :  { %v4230_v22 = vpack.c.bf16 %v1637_v13, %v1637_v13  ;;  %v1640_v4 = vadd.f32 %v4582_v15, %v1639_v54  ;;  %2933 = vrot.lane.b32.xlu1 %v2906_v40, %s4598_s22  ;;  %v3146_v13 = vrot.slane %v3144_v63, 1  ;;  %v2086_v40 = vld [vmem:[#allocation2 + $0x78] sm:$0xf] }
 0x24e   :  { %v1964_v17 = vshrl.u32 %v4232_v61, 16  ;;  %v4233_v55 = vpack.c.bf16 %v1648_v35, %v1648_v35  ;;  %v1967_v24 = vshll.u32 %v4232_v61, 16  ;;  %v6087_v35 = vpop.permute.xlu1 %2821 }
 0x24f   :  { %v1948_v36 = vshrl.u32 %v4230_v22, 16  ;;  %v4231_v47 = vpack.c.bf16 %v1640_v4, %v1640_v4  ;;  %v1951_v59 = vshll.u32 %v4230_v22, 16  ;;  %v2089_v4 = vld [vmem:[#allocation2 + $0x7c] sm:$0x1] }
 0x250   :  { %v1966_v15 = vrot.slane %v1964_v17, 7  ;;  %v1972_v54 = vshrl.u32 %v4233_v55, 16  ;;  %3011 = vrot.lane.b32.xlu0 %v4160_v41, %s4599_s12  ;;  %v1975_v17 = vshll.u32 %v4233_v55, 16  ;;  %v2104_v41 = vld [vmem:[#allocation2 + $0x90] sm:$0xf] }
 0x251   :  { %v1950_v32 = vrot.slane %v1948_v36, 7  ;;  %v1956_v10 = vshrl.u32 %v4231_v47, 16  ;;  %3009 = vrot.lane.b32.xlu1 %v4159_v38, %s4599_s12  ;;  %v1959_v3 = vshll.u32 %v4231_v47, 16  ;;  %v2095_v38 = vld [vmem:[#allocation2 + $0x84] sm:$0x1] }
 0x252   :  { %v1969_v63 = vor.u32 %v1967_v24, %v1966_v15  ;;  %v1970_v61 = vrot.slane %v1966_v15, 4  ;;  %v1974_v6 = vrot.slane %v1972_v54, 7  ;;  %v3147_v24 = vor.u32 %v3146_v13, %v3142_v50 }
 0x253   :  { %v1953_v37 = vor.u32 %v1951_v59, %v1950_v32  ;;  %v1954_v48 = vrot.slane %v1950_v32, 4  ;;  %v1958_v30 = vrot.slane %v1956_v10, 7  ;;  %v2424_v13 = vrot.slane %v2422_v18, 1 }
 0x254   :  { %v2099_v29 = vsel %vm5533_vm11, %v1969_v63, %v2098_v14  ;;  %v2102_v22 = vsel %vm5477_vm14, %v1970_v61, %v2101_v33  ;;  %v1977_v36 = vor.u32 %v1975_v17, %v1974_v6  ;;  %v1978_v27 = vrot.slane %v1974_v6, 4  ;;  %3199 = vrot.lane.b32.xlu0 %v3133_v46, %s4600_s29 }
 0x255   :  { %2100 = vst [vmem:[#allocation2 + $0x88] sm:$0xf] %v2099_v29  ;;  %2103 = vst [vmem:[#allocation2 + $0x8c] sm:$0x1] %v2102_v22  ;;  %v2087_v59 = vsel %vm5533_vm11, %v1953_v37, %v2086_v40  ;;  %v2090_v32 = vsel %vm5477_vm14, %v1954_v48, %v2089_v4  ;;  %v1961_v55 = vor.u32 %v1959_v3, %v1958_v30  ;;  %v1962_v47 = vrot.slane %v1958_v30, 4  ;;  %v6101_v14 = vpop.permute.xlu1 %3001 }
 0x256   :  { %v6103_v15 = vpop.permute.xlu0 %2635  ;;  %v3362_v33 = vsel %vm1227_vm2, %v3316_v2, %v5979_v28  ;;  %2088 = vst [vmem:[#allocation2 + $0x78] sm:$0xf] %v2087_v59  ;;  %2091 = vst [vmem:[#allocation2 + $0x7c] sm:$0x1] %v2090_v32  ;;  %v2105_v46 = vsel %vm5533_vm11, %v1977_v36, %v2104_v41  ;;  %v2108_v37 = vsel %vm5477_vm14, %v1978_v27, %v2107_v60  ;;  %v2249_v40 = vld [vmem:[#allocation2 + $0x70] sm:$0xe] }
 0x257   :  { %v3424_v48 = vsel %vm1293_vm4, %v6060_v21, %v6043_v56  ;;  %2106 = vst [vmem:[#allocation2 + $0x90] sm:$0xf] %v2105_v46  ;;  %2109 = vst [vmem:[#allocation2 + $0x94] sm:$0x1] %v2108_v37  ;;  %v2093_v30 = vsel %vm5533_vm11, %v1961_v55, %v2092_v42  ;;  %v2096_v28 = vsel %vm5477_vm14, %v1962_v47, %v2095_v38  ;;  %v3137_v56 = vshll.u32 %v6079_v25, 16 }
 0x258   :  { %2094 = vst [vmem:[#allocation2 + $0x80] sm:$0xf] %v2093_v30  ;;  %2097 = vst [vmem:[#allocation2 + $0x84] sm:$0x1] %v2096_v28  ;;  %3203 = vrot.lane.b32.xlu0 %v3147_v24, %s4600_s29  ;;  %v3394_v60 = vsel %vm1260_vm3, %v3362_v33, %v5986_v39  ;;  %v3456_v21 = vsel %vm1326_vm5, %v3424_v48, %v5977_v12  ;;  %v3271_v42 = vrot.slane %v6547_v53, 1  ;;  %v2420_v2 = vshrl.u32 %v6075_v44, 16 }
 0x259   :  { %v2818_v27 = vpop.permute.xlu1 %2817  ;;  %v3488_v12 = vsel %vm1359_vm6, %v3456_v21, %v5982_v23  ;;  %v3139_v6 = vrot.slane %v3137_v56, 1  ;;  %v3135_v22 = vshrl.u32 %v6079_v25, 16  ;;  %v2248_v47 = vld [vmem:[#allocation2 + $0x68] sm:$0xe]  ;;  %v2154_v37 = vld [vmem:[#allocation2 + $0x70] sm:$0xe] }
 0x25a   :  { %v6121_v50 = vpop.permute.xlu0 %2451  ;;  %v3426_v45 = vsel %vm1293_vm4, %v3394_v60, %v2818_v27  ;;  %v2425_v63 = vor.u32 %v2424_v13, %v2420_v2  ;;  %v4191_v60 = vcombine.low %v2248_v47, %v6065_v20  ;;  %v4098_v21 = vcombine.low %v2154_v37, %v6056_v51 }
 0x25b   :  { %v3458_v54 = vsel %vm1326_vm5, %v3426_v45, %v6016_v57  ;;  %v4192_v57 = vcombine.low %v2249_v40, %v6041_v5 }
 0x25c   :  { %v3490_v39 = vsel %vm1359_vm6, %v3458_v54, %v5934_v1  ;;  %3295 = vrot.lane.b32.xlu0 %v3271_v42, %s4601_s8  ;;  %v6176_v42 = vld [vmem:[#allocation2 + $0x88] sm:$0xf]  ;;  %v6178_v13 = vld [vmem:[#allocation2 + $0x8c] sm:$0x1]  ;;  %v3272_v20 = vrot.slane %v4191_v60, 1  ;;  %v2539_v2 = vrot.slane %v4098_v21, 1 }
 0x25d   :  { %v6136_v4 = vpop.permute.xlu1 %2997  ;;  %v2218_v58 = vld [vmem:[#allocation2 + $0x78] sm:$0xf]  ;;  %v6140_v52 = vld [vmem:[#allocation2 + $0x7c] sm:$0x1]  ;;  %v3522_v18 = vsel %vm1392_vm7, %v3490_v39, %v6038_v62  ;;  %v3273_v32 = vrot.slane %v4192_v57, 1  ;;  %v4085_v51 = vcombine.low %v6176_v42, %v6178_v13 }
 0x25e   :  { %v3184_v10 = vpop.permute.xlu0 %3183  ;;  %v4161_v61 = vcombine.low %v2218_v58, %v2218_v58  ;;  %v6146_v44 = vld [vmem:[#allocation2 + $0x78] sm:$0xf]  ;;  %v4177_v17 = vcombine.low %v2218_v58, %v6140_v52  ;;  %v3554_v41 = vsel %vm1425_vm8, %v3522_v18, %v5971_v9  ;;  %v6155_v29 = vld [vmem:[#allocation2 + $0x7c] sm:$0x1]  ;;  %v3140_v9 = vor.u32 %v3139_v6, %v3135_v22  ;;  %v4584_v22 = vld [vmem:[#allocation2 + $0x10] sm:$0xf] }
 0x25f   :  { %v3520_v1 = vsel %vm1392_vm7, %v3488_v12, %v3184_v10  ;;  %v6153_v3 = vld [vmem:[#allocation2 + $0x80] sm:$0xf]  ;;  %v2140_v62 = vld [vmem:[#allocation2 + $0x84] sm:$0x1]  ;;  %v4083_v33 = vcombine.low %v6146_v44, %v6155_v29  ;;  %v2250_v10 = vld [vmem:[#allocation2 + $0x78] sm:$0xe] }
 0x260   :  { %v3552_v23 = vsel %vm1425_vm8, %v3520_v1, %v6020_v34  ;;  %2471 = vrot.lane.b32.xlu0 %v2425_v63, %s4594_s24  ;;  %3013 = vrot.lane.b32.xlu1 %v4161_v61, %s4599_s12  ;;  %v4084_v36 = vcombine.low %v6153_v3, %v2140_v62  ;;  %v3151_v59 = vshll.u32 %v4177_v17, 16  ;;  %v3149_v25 = vshrl.u32 %v4177_v17, 16  ;;  %v2156_v53 = vld [vmem:[#allocation2 + $0x80] sm:$0xe]  ;;  %v2170_v58 = vld [vmem:[#allocation2 + $0x78] sm:$0xf] }
 0x261   :  { %v4199_v5 = vcombine.low %v3552_v23, %v3554_v41  ;;  %v6161_v38 = vpop.permute.xlu1 %2557  ;;  %v2429_v45 = vshll.u32 %v4083_v33, 16  ;;  %v4100_v39 = vcombine.low %v2156_v53, %v2140_v62  ;;  %v6188_v18 = vld [vmem:[#allocation2 + $0x7c] sm:$0x1]  ;;  %v2427_v57 = vshrl.u32 %v4083_v33, 16  ;;  %v2172_v62 = vld [vmem:[#allocation2 + $0x88] sm:$0xf] }
 0x262   :  { %v6163_v34 = vpop.permute.xlu0 %2631  ;;  %v2436_v55 = vshll.u32 %v4084_v36, 16  ;;  %v3153_v46 = vrot.slane %v3151_v59, 1  ;;  %v2434_v24 = vshrl.u32 %v4084_v36, 16  ;;  %v4193_v17 = vcombine.low %v2250_v10, %v6140_v52  ;;  %v2171_v10 = vld [vmem:[#allocation2 + $0x80] sm:$0xf] }
 0x263   :  { %4284 = vmatprep.mubr.msk.bf16.mxu1 %vm1525_vm9, %v4199_v5  ;;  %v2431_v12 = vrot.slane %v2429_v45, 1  ;;  %v2541_v61 = vrot.slane %v4100_v39, 1  ;;  %v4130_v23 = vcombine.low %v2170_v58, %v6188_v18  ;;  %v2443_v41 = vshll.u32 %v4085_v51, 16  ;;  %v6198_v5 = vld [vmem:[#allocation2 + $0x8c] sm:$0x1] }
 0x264   :  { %3201 = vrot.lane.b32.xlu1 %v3140_v9, %s4600_s29  ;;  %3299 = vrot.lane.b32.xlu0 %v3273_v32, %s4601_s8  ;;  %v2438_v48 = vrot.slane %v2436_v55, 1  ;;  %v3154_v27 = vor.u32 %v3153_v46, %v3149_v25  ;;  %v3319_v36 = vsel %vm1178_vm1, %v4584_v22, %v6121_v50  ;;  %v4114_v32 = vcombine.low %v2170_v58, %v2170_v58  ;;  %v2155_v46 = vld [vmem:[#allocation2 + $0x78] sm:$0xe]  ;;  %v2157_v45 = vld [vmem:[#allocation2 + $0x88] sm:$0xe] }
 0x265   :  { %v6170_v30 = vpop.permute.xlu1 %2637  ;;  %v2432_v6 = vor.u32 %v2431_v12, %v2427_v57  ;;  %v3274_v52 = vrot.slane %v4193_v17, 1  ;;  %v2445_v55 = vrot.slane %v2443_v41, 1  ;;  %v4132_v47 = vcombine.low %v2172_v62, %v6198_v5  ;;  %v6227_v58 = vld [vmem:[#allocation2 + $0x84] sm:$0x1]  ;;  %v2202_v57 = vld [vmem:[#allocation2 + $0x78] sm:$0xe] }
 0x266   :  { %v6172_v28 = vpop.permute.xlu0 %2923  ;;  %v2439_v56 = vor.u32 %v2438_v48, %v2434_v24  ;;  %v2790_v33 = vshll.u32 %v4130_v23, 16  ;;  %v2441_v37 = vshrl.u32 %v4085_v51, 16  ;;  %v3364_v25 = vsel %vm1227_vm2, %v3319_v36, %v6009_v11 }
 0x267   :  { %v4116_v48 = vcombine.low %v2172_v62, %v2172_v62  ;;  %v2804_v21 = vshll.u32 %v4132_v47, 16  ;;  %v2788_v53 = vshrl.u32 %v4130_v23, 16  ;;  %v3396_v39 = vsel %vm1260_vm3, %v3364_v25, %v5936_v19 }
 0x268   :  { %3205 = vrot.lane.b32.xlu1 %v3154_v27, %s4600_s29  ;;  %2475 = vrot.lane.b32.xlu0 %v2439_v56, %s4594_s24  ;;  %v2446_v60 = vor.u32 %v2445_v55, %v2441_v37  ;;  %v4099_v27 = vcombine.low %v2155_v46, %v6155_v29  ;;  %v2792_v56 = vrot.slane %v2790_v33, 1  ;;  %v4101_v51 = vcombine.low %v2157_v45, %v6178_v13  ;;  %v2204_v55 = vld [vmem:[#allocation2 + $0x88] sm:$0xe] }
 0x269   :  { %v6182_v40 = vpop.permute.xlu1 %3289  ;;  %v2806_v29 = vrot.slane %v2804_v21, 1  ;;  %v3428_v17 = vsel %vm1293_vm4, %v3396_v39, %v6027_v7  ;;  %v4131_v22 = vcombine.low %v2171_v10, %v6227_v58  ;;  %v4146_v36 = vcombine.low %v2202_v57, %v6188_v18  ;;  %v6548_v57 = vld [vmem:[#allocation10_spill] sm:$0xff] }
 0x26a   :  { %v6184_v54 = vpop.permute.xlu0 %3003  ;;  %v2793_v12 = vor.u32 %v2792_v56, %v2788_v53  ;;  %v2542_v41 = vrot.slane %v4101_v51, 1  ;;  %v3460_v7 = vsel %vm1326_vm5, %v3428_v17, %v5966_v26  ;;  %v4115_v46 = vcombine.low %v2171_v10, %v2171_v10  ;;  %v2221_v53 = vld [vmem:[#allocation2 + $0x90] sm:$0xf]  ;;  %v6266_v51 = vld [vmem:[#allocation2 + $0x94] sm:$0x1] }
 0x26b   :  { %v2907_v37 = vrot.slane %v4146_v36, 1  ;;  %v4148_v25 = vcombine.low %v2204_v55, %v6198_v5  ;;  %v3492_v5 = vsel %vm1359_vm6, %v3460_v7, %v5973_v16  ;;  %v2795_v10 = vshrl.u32 %v4131_v22, 16  ;;  %v4586_v16 = vld [vmem:[#allocation2 + $0x20] sm:$0xf] }
 0x26c   :  { %3297 = vrot.lane.b32.xlu1 %v3272_v20, %s4601_s8  ;;  %2567 = vrot.lane.b32.xlu0 %v2539_v2, %s4595_s18  ;;  %v2540_v2 = vrot.slane %v4099_v27, 1  ;;  %v6253_v27 = vld [vmem:[#allocation2 + $0x84] sm:$0x1]  ;;  %v2203_v55 = vld [vmem:[#allocation2 + $0x80] sm:$0xe] }
 0x26d   :  { %v6192_v1 = vpop.permute.xlu1 %3285  ;;  %v2909_v39 = vrot.slane %v4148_v25, 1  ;;  %v6549_v7 = vld [vmem:[#allocation7_spill] sm:$0xff] }
 0x26e   :  { %v6194_v63 = vpop.permute.xlu0 %2919 }
 0x270   :  { %2473 = vrot.lane.b32.xlu1 %v2432_v6, %s4594_s24  ;;  %2571 = vrot.lane.b32.xlu0 %v2541_v61, %s4595_s18  ;;  %v2802_v61 = vshrl.u32 %v4132_v47, 16  ;;  %v4585_v6 = vld [vmem:[#allocation2 + $0x18] sm:$0xf] }
 0x271   :  { %v6204_v59 = vpop.permute.xlu1 %2553  ;;  %v3322_v19 = vsel %vm1178_vm1, %v4585_v6, %v6024_v43 }
 0x272   :  { %v6206_v9 = vpop.permute.xlu0 %2999  ;;  %v2807_v62 = vor.u32 %v2806_v29, %v2802_v61  ;;  %v3366_v43 = vsel %vm1227_vm2, %v3322_v19, %v5948_v31  ;;  %v3325_v61 = vsel %vm1178_vm1, %v4586_v16, %v6548_v57 }
 0x273   :  { %v3398_v56 = vsel %vm1260_vm3, %v3366_v43, %v5964_v0 }
 0x274   :  { %3301 = vrot.lane.b32.xlu1 %v3274_v52, %s4601_s8  ;;  %2647 = vrot.lane.b32.xlu0 %v4114_v32, %s4596_s7  ;;  %v2173_v32 = vld [vmem:[#allocation2 + $0x90] sm:$0xf]  ;;  %v6241_v52 = vld [vmem:[#allocation2 + $0x94] sm:$0x1]  ;;  %v3430_v31 = vsel %vm1293_vm4, %v3398_v56, %v6087_v35  ;;  %v3524_v35 = vsel %vm1392_vm7, %v3492_v5, %v6067_v49 }
 0x275   :  { %v6213_v50 = vpop.permute.xlu1 %2633  ;;  %v4133_v18 = vcombine.low %v2173_v32, %v6241_v52  ;;  %v4117_v45 = vcombine.low %v2173_v32, %v2173_v32  ;;  %v3462_v29 = vsel %vm1326_vm5, %v3430_v31, %v6001_v8  ;;  %v4180_v8 = vcombine.low %v2221_v53, %v6266_v51  ;;  %v2205_v5 = vld [vmem:[#allocation2 + $0x90] sm:$0xe] }
 0x276   :  { %v6215_v24 = vpop.permute.xlu0 %3291  ;;  %v3494_v6 = vsel %vm1359_vm6, %v3462_v29, %v6136_v4 }
 0x277   :  { %v2811_v0 = vshll.u32 %v4133_v18, 16  ;;  %v2809_v25 = vshrl.u32 %v4133_v18, 16 }
 0x278   :  { %2477 = vrot.lane.b32.xlu1 %v2446_v60, %s4594_s24  ;;  %2651 = vrot.lane.b32.xlu0 %v4116_v48, %s4596_s7  ;;  %v2797_v48 = vshll.u32 %v4131_v22, 16  ;;  %v2219_v60 = vld [vmem:[#allocation2 + $0x80] sm:$0xf]  ;;  %v4587_v22 = vld [vmem:[#allocation2 + $0x38] sm:$0xf] }
 0x279   :  { %v6222_v11 = vpop.permute.xlu1 %2925  ;;  %v2813_v32 = vrot.slane %v2811_v0, 1 }
 0x27a   :  { %v6224_v20 = vpop.permute.xlu0 %2555 }
 0x27b   :  { %v2814_v29 = vor.u32 %v2813_v32, %v2809_v25  ;;  %v2251_v32 = vld [vmem:[#allocation2 + $0x80] sm:$0xe] }
 0x27c   :  { %2569 = vrot.lane.b32.xlu1 %v2540_v2, %s4595_s18  ;;  %2839 = vrot.lane.b32.xlu0 %v2793_v12, %s4597_s19  ;;  %v2799_v2 = vrot.slane %v2797_v48, 1  ;;  %v4178_v12 = vcombine.low %v2219_v60, %v6253_v27  ;;  %v6550_v48 = vld [vmem:[#allocation8_spill] sm:$0xff] }
 0x27d   :  { %v6235_v23 = vpop.permute.xlu1 %2921 }
 0x27e   :  { %v6237_v13 = vpop.permute.xlu0 %3287  ;;  %v2800_v36 = vor.u32 %v2799_v2, %v2795_v10  ;;  %v3158_v49 = vshll.u32 %v4178_v12, 16  ;;  %v4589_v10 = vld [vmem:[#allocation2 + $0x28] sm:$0xf]  ;;  %v3156_v57 = vshrl.u32 %v4178_v12, 16 }
 0x280   :  { %2573 = vrot.lane.b32.xlu1 %v2542_v41, %s4595_s18  ;;  %2843 = vrot.lane.b32.xlu0 %v2807_v62, %s4597_s19  ;;  %v4162_v41 = vcombine.low %v2219_v60, %v2219_v60  ;;  %v3368_v60 = vsel %vm1227_vm2, %v3325_v61, %v6550_v48  ;;  %v3160_v18 = vrot.slane %v3158_v49, 1  ;;  %v4149_v61 = vcombine.low %v2205_v5, %v6241_v52  ;;  %v6316_v52 = vld [vmem:[#allocation2 + $0x8c] sm:$0x1]  ;;  %v6551_v49 = vld [vmem:[#allocation3_spill] sm:$0xff] }
 0x281   :  { %v2462_v47 = vpop.permute.xlu1 %2461 }
 0x282   :  { %v6249_v33 = vpop.permute.xlu0 %2827  ;;  %v3334_v43 = vsel %vm1178_vm1, %v4587_v22, %v2462_v47  ;;  %v4147_v47 = vcombine.low %v2203_v55, %v6227_v58  ;;  %v3161_v12 = vor.u32 %v3160_v18, %v3156_v57  ;;  %v3170_v55 = vshrl.u32 %v4180_v8, 16 }
 0x283   :  { %v3374_v2 = vsel %vm1227_vm2, %v3334_v43, %v6161_v38  ;;  %v2910_v43 = vrot.slane %v4149_v61, 1 }
 0x284   :  { %2649 = vrot.lane.b32.xlu1 %v4115_v46, %s4596_s7  ;;  %2935 = vrot.lane.b32.xlu0 %v2907_v37, %s4598_s22  ;;  %v3556_v46 = vsel %vm1425_vm8, %v3524_v35, %v6549_v7  ;;  %v3400_v35 = vsel %vm1260_vm3, %v3368_v60, %v6163_v34 }
 0x285   :  { %v6261_v26 = vpop.permute.xlu1 %3193 }
 0x286   :  { %v2824_v21 = vpop.permute.xlu0 %2823 }
 0x287   :  { %v3432_v16 = vsel %vm1293_vm4, %v3400_v35, %v2824_v21 }
 0x288   :  { %2653 = vrot.lane.b32.xlu1 %v4117_v45, %s4596_s7  ;;  %2939 = vrot.lane.b32.xlu0 %v2909_v39, %s4598_s22  ;;  %v4164_v45 = vcombine.low %v2221_v53, %v2221_v53  ;;  %v3172_v39 = vshll.u32 %v4180_v8, 16  ;;  %v4194_v8 = vcombine.low %v2251_v32, %v6253_v27 }
 0x289   :  { %v3190_v19 = vpop.permute.xlu1 %3189 }
 0x28a   :  { %v6278_v17 = vpop.permute.xlu0 %3195  ;;  %v3526_v62 = vsel %vm1392_vm7, %v3494_v6, %v3190_v19  ;;  %v3406_v6 = vsel %vm1260_vm3, %v3374_v2, %v6170_v30 }
 0x28b   :  { %v3558_v4 = vsel %vm1425_vm8, %v3526_v62, %v6192_v1  ;;  %v4588_v1 = vld [vmem:[#allocation2 + $0x30] sm:$0xf] }
 0x28c   :  { %v4200_v37 = vcombine.low %v3556_v46, %v3558_v4  ;;  %2841 = vrot.lane.b32.xlu1 %v2800_v36, %s4597_s19  ;;  %3015 = vrot.lane.b32.xlu0 %v4162_v41, %s4599_s12  ;;  %v3174_v41 = vrot.slane %v3172_v39, 1  ;;  %v2220_v36 = vld [vmem:[#allocation2 + $0x88] sm:$0xf]  ;;  %v2238_v4 = vld [vmem:[#allocation2 + $0x9c] sm:$0x1]  ;;  %v6553_v39 = vld [vmem:[#allocation5_spill] sm:$0xff] }
 0x28d   :  { %v2458_v56 = vpop.permute.xlu1 %2457 }
 0x28e   :  { %v2460_v31 = vpop.permute.xlu0 %2459  ;;  %4285 = vmatmul.mubr.msk.bf16.vlgmr.msra.gmra.mrb[0].mxu1 %vm1525_vm9, %v4200_v37  ;;  %v3328_v53 = vsel %vm1178_vm1, %v4589_v10, %v2458_v56  ;;  %v3175_v46 = vor.u32 %v3174_v41, %v3170_v55  ;;  %v2253_v56 = vld [vmem:[#allocation2 + $0x90] sm:$0xe]  ;;  %v2254_v41 = vld [vmem:[#allocation2 + $0x98] sm:$0xe] }
 0x28f   :  { %v3331_v0 = vsel %vm1178_vm1, %v4588_v1, %v2460_v31  ;;  %v3370_v21 = vsel %vm1227_vm2, %v3328_v53, %v6204_v59 }
 0x290   :  { %v3372_v58 = vsel %vm1227_vm2, %v3331_v0, %v6224_v20  ;;  %2845 = vrot.lane.b32.xlu1 %v2814_v29, %s4597_s19  ;;  %3019 = vrot.lane.b32.xlu0 %v4164_v45, %s4599_s12  ;;  %v2908_v20 = vrot.slane %v4147_v47, 1  ;;  %v3402_v7 = vsel %vm1260_vm3, %v3370_v21, %v6213_v50  ;;  %v2222_v45 = vld [vmem:[#allocation2 + $0x98] sm:$0xf]  ;;  %v3275_v0 = vrot.slane %v4194_v8, 1 }
 0x291   :  { %v3404_v38 = vsel %vm1260_vm3, %v3372_v58, %v6103_v15  ;;  %v2830_v19 = vpop.permute.xlu1 %2829  ;;  %v4181_v47 = vcombine.low %v2222_v45, %v2238_v4  ;;  %v4165_v10 = vcombine.low %v2222_v45, %v2222_v45 }
 0x292   :  { %v3436_v34 = vsel %vm1293_vm4, %v3404_v38, %v6249_v33  ;;  %v3438_v62 = vsel %vm1293_vm4, %v3406_v6, %v2830_v19  ;;  %v3464_v33 = vsel %vm1326_vm5, %v3432_v16, %v6194_v63  ;;  %v3192_v22 = vpop.permute.xlu0 %3191  ;;  %v2252_v19 = vld [vmem:[#allocation2 + $0x88] sm:$0xe] }
 0x293   :  { %v3468_v15 = vsel %vm1326_vm5, %v3436_v34, %v6172_v28  ;;  %v3470_v30 = vsel %vm1326_vm5, %v3438_v62, %v6222_v11  ;;  %v4179_v11 = vcombine.low %v2220_v36, %v6316_v52  ;;  %v3496_v25 = vsel %vm1359_vm6, %v3464_v33, %v6206_v9 }
 0x294   :  { %v3500_v59 = vsel %vm1359_vm6, %v3468_v15, %v6184_v54  ;;  %v3502_v28 = vsel %vm1359_vm6, %v3470_v30, %v6551_v49  ;;  %2937 = vrot.lane.b32.xlu1 %v2908_v20, %s4598_s22  ;;  %3207 = vrot.lane.b32.xlu0 %v3161_v12, %s4600_s29  ;;  %v6552_v54 = vld [vmem:[#allocation4_spill] sm:$0xff]  ;;  %v3528_v50 = vsel %vm1392_vm7, %v3496_v25, %v3192_v22  ;;  %v3177_v38 = vshrl.u32 %v4181_v47, 16 }
 0x295   :  { %v2826_v63 = vpop.permute.xlu1 %2825  ;;  %v3534_v37 = vsel %vm1392_vm7, %v3502_v28, %v6552_v54  ;;  %v3532_v60 = vsel %vm1392_vm7, %v3500_v59, %v6278_v17  ;;  %v4163_v9 = vcombine.low %v2220_v36, %v2220_v36  ;;  %v3165_v18 = vshll.u32 %v4179_v11, 16 }
 0x296   :  { %v3434_v48 = vsel %vm1293_vm4, %v3402_v7, %v2826_v63  ;;  %v3564_v17 = vsel %vm1425_vm8, %v3532_v60, %v6215_v24  ;;  %v3566_v2 = vsel %vm1425_vm8, %v3534_v37, %v6553_v39  ;;  %v6355_v1 = vpop.permute.xlu0 %2559  ;;  %v3163_v16 = vshrl.u32 %v4179_v11, 16 }
 0x297   :  { %v3466_v31 = vsel %vm1326_vm5, %v3434_v48, %v6235_v23  ;;  %v4196_v23 = vcombine.low %v2253_v56, %v6266_v51  ;;  %v4202_v24 = vcombine.low %v3564_v17, %v3566_v2  ;;  %v3179_v51 = vshll.u32 %v4181_v47, 16 }
 0x298   :  { %v3498_v27 = vsel %vm1359_vm6, %v3466_v31, %v6101_v14  ;;  %2941 = vrot.lane.b32.xlu1 %v2910_v43, %s4598_s22  ;;  %3211 = vrot.lane.b32.xlu0 %v3175_v46, %s4600_s29  ;;  %v3560_v14 = vsel %vm1425_vm8, %v3528_v50, %v6237_v13  ;;  %v3167_v58 = vrot.slane %v3165_v18, 1  ;;  %v4195_v15 = vcombine.low %v2252_v19, %v6316_v52  ;;  %v4590_v50 = vld [vmem:[#allocation2 + $0x50] sm:$0xf]  ;;  %v6554_v31 = vld [vmem:[#allocation6_spill] sm:$0xff] }
 0x299   :  { %v3530_v5 = vsel %vm1392_vm7, %v3498_v27, %v6261_v26  ;;  %v3277_v53 = vrot.slane %v4196_v23, 1  ;;  %v3181_v57 = vrot.slane %v3179_v51, 1  ;;  %v4197_v12 = vcombine.low %v2254_v41, %v2238_v4  ;;  %v4591_v27 = vld [vmem:[#allocation2 + $0x58] sm:$0xf] }
 0x29a   :  { %v3562_v29 = vsel %vm1425_vm8, %v3530_v5, %v6182_v40  ;;  %v3168_v34 = vor.u32 %v3167_v58, %v3163_v16  ;;  %v3276_v32 = vrot.slane %v4195_v15, 1  ;;  %v3337_v45 = vsel %vm1178_vm1, %v4590_v50, %v6554_v31  ;;  %v4592_v16 = vld [vmem:[#allocation2 + $0x68] sm:$0xf] }
 0x29b   :  { %v6359_v35 = vpop.permute.xlu1 %2469  ;;  %v4201_v26 = vcombine.low %v3560_v14, %v3562_v29  ;;  %v3182_v20 = vor.u32 %v3181_v57, %v3177_v38  ;;  %v3278_v30 = vrot.slane %v4197_v12, 1  ;;  %v3376_v47 = vsel %vm1227_vm2, %v3337_v45, %v6355_v1  ;;  %v4593_v57 = vld [vmem:[#allocation2 + $0x60] sm:$0xf] }
 0x29c   :  { %3017 = vrot.lane.b32.xlu1 %v4163_v9, %s4599_s12  ;;  %3303 = vrot.lane.b32.xlu0 %v3275_v0, %s4601_s8  ;;  %v3346_v38 = vsel %vm1178_vm1, %v4592_v16, %v6359_v35 }
 0x29d   :  { %4288 = vmatprep.mubr.msk.bf16.mxu1 %vm1525_vm9, %v4201_v26 }
 0x29e   :  { %4289 = vmatmul.mubr.msk.bf16.gmra.mrb[4].mxu1 %vm1525_vm9, %v4202_v24  ;;  %v6365_v13 = vpop.permute.xlu0 %2467 }
 0x29f   :  { %v2466_v40 = vpop.permute.xlu1 %2465 }
 0x2a0   :  { %3021 = vrot.lane.b32.xlu1 %v4165_v10, %s4599_s12  ;;  %3307 = vrot.lane.b32.xlu0 %v3277_v53, %s4601_s8  ;;  %v3340_v9 = vsel %vm1178_vm1, %v4591_v27, %v2466_v40 }
 0x2a2   :  { %v6369_v61 = vpop.permute.xlu0 %2563 }
 0x2a3   :  { %v2562_v6 = vpop.permute.xlu1 %2561 }
 0x2a4   :  { %3209 = vrot.lane.b32.xlu1 %v3168_v34, %s4600_s29  ;;  %v3378_v5 = vsel %vm1227_vm2, %v3340_v9, %v2562_v6  ;;  %v3343_v34 = vsel %vm1178_vm1, %v4593_v57, %v6365_v13 }
 0x2a5   :  { %v3380_v19 = vsel %vm1227_vm2, %v3343_v34, %v6369_v61 }
 0x2a6   :  { %v2640_v21 = vpop.permute.xlu0 %2639 }
 0x2a7   :  { %v2566_v62 = vpop.permute.xlu1 %2565  ;;  %v3408_v17 = vsel %vm1260_vm3, %v3376_v47, %v2640_v21 }
 0x2a8   :  { %3213 = vrot.lane.b32.xlu1 %v3182_v20, %s4600_s29  ;;  %v3382_v20 = vsel %vm1227_vm2, %v3346_v38, %v2566_v62 }
 0x2aa   :  { %v2644_v36 = vpop.permute.xlu0 %2643 }
 0x2ab   :  { %v2642_v33 = vpop.permute.xlu1 %2641  ;;  %v3412_v41 = vsel %vm1260_vm3, %v3380_v19, %v2644_v36 }
 0x2ac   :  { %3305 = vrot.lane.b32.xlu1 %v3276_v32, %s4601_s8  ;;  %v3410_v39 = vsel %vm1260_vm3, %v3378_v5, %v2642_v33 }
 0x2ae   :  { %v2832_v55 = vpop.permute.xlu0 %2831 }
 0x2af   :  { %v2646_v59 = vpop.permute.xlu1 %2645  ;;  %v3440_v14 = vsel %vm1293_vm4, %v3408_v17, %v2832_v55 }
 0x2b0   :  { %3309 = vrot.lane.b32.xlu1 %v3278_v30, %s4601_s8  ;;  %v3414_v21 = vsel %vm1260_vm3, %v3382_v20, %v2646_v59 }
 0x2b2   :  { %v2836_v49 = vpop.permute.xlu0 %2835 }
 0x2b3   :  { %v2834_v28 = vpop.permute.xlu1 %2833  ;;  %v3444_v35 = vsel %vm1293_vm4, %v3412_v41, %v2836_v49 }
 0x2b4   :  { %v3442_v0 = vsel %vm1293_vm4, %v3410_v39, %v2834_v28  ;;  %v6555_v39 = vld [vmem:[#allocation9_spill] sm:$0xff] }
 0x2b6   :  { %v2928_v22 = vpop.permute.xlu0 %2927 }
 0x2b7   :  { %v2838_v7 = vpop.permute.xlu1 %2837  ;;  %v3472_v29 = vsel %vm1326_vm5, %v3440_v14, %v2928_v22 }
 0x2b8   :  { %v3446_v32 = vsel %vm1293_vm4, %v3414_v21, %v2838_v7 }
 0x2ba   :  { %v2932_v43 = vpop.permute.xlu0 %2931 }
 0x2bb   :  { %v2930_v63 = vpop.permute.xlu1 %2929  ;;  %v3476_v13 = vsel %vm1326_vm5, %v3444_v35, %v2932_v43 }
 0x2bc   :  { %v3474_v18 = vsel %vm1326_vm5, %v3442_v0, %v2930_v63 }
 0x2be   :  { %v3008_v52 = vpop.permute.xlu0 %3007 }
 0x2bf   :  { %v2934_v8 = vpop.permute.xlu1 %2933  ;;  %v3504_v26 = vsel %vm1359_vm6, %v3472_v29, %v3008_v52 }
 0x2c0   :  { %v3478_v33 = vsel %vm1326_vm5, %v3446_v32, %v2934_v8 }
 0x2c2   :  { %v3012_v46 = vpop.permute.xlu0 %3011 }
 0x2c3   :  { %v3010_v54 = vpop.permute.xlu1 %3009  ;;  %v3508_v61 = vsel %vm1359_vm6, %v3476_v13, %v3012_v46 }
 0x2c4   :  { %v3506_v1 = vsel %vm1359_vm6, %v3474_v18, %v3010_v54 }
 0x2c6   :  { %v3200_v11 = vpop.permute.xlu0 %3199 }
 0x2c7   :  { %v3536_v24 = vsel %vm1392_vm7, %v3504_v26, %v3200_v11 }
 0x2ca   :  { %v3204_v4 = vpop.permute.xlu0 %3203 }
 0x2cb   :  { %v3540_v36 = vsel %vm1392_vm7, %v3508_v61, %v3204_v4 }
 0x2ce   :  { %v3296_v37 = vpop.permute.xlu0 %3295 }
 0x2cf   :  { %v3568_v58 = vsel %vm1425_vm8, %v3536_v24, %v3296_v37 }
 0x2d2   :  { %v3014_v25 = vpop.permute.xlu1 %3013  ;;  %v6376_v48 = vpop.permute.xlu0 %2471 }
 0x2d3   :  { %v3510_v62 = vsel %vm1359_vm6, %v3478_v33, %v3014_v25 }
 0x2d6   :  { %v3202_v60 = vpop.permute.xlu1 %3201  ;;  %v3300_v56 = vpop.permute.xlu0 %3299 }
 0x2d7   :  { %v3538_v10 = vsel %vm1392_vm7, %v3506_v1, %v3202_v60  ;;  %v3572_v28 = vsel %vm1425_vm8, %v3540_v36, %v3300_v56 }
 0x2da   :  { %v3206_v2 = vpop.permute.xlu1 %3205  ;;  %v6386_v23 = vpop.permute.xlu0 %2475 }
 0x2db   :  { %v3542_v30 = vsel %vm1392_vm7, %v3510_v62, %v3206_v2  ;;  %v3349_v2 = vsel %vm1178_vm1, %v6555_v39, %v6376_v48  ;;  %v3355_v48 = vsel %vm1178_vm1, %v6153_v3, %v6386_v23 }
 0x2de   :  { %v3298_v51 = vpop.permute.xlu1 %3297  ;;  %v2568_v53 = vpop.permute.xlu0 %2567 }
 0x2df   :  { %v3570_v40 = vsel %vm1425_vm8, %v3538_v10, %v3298_v51  ;;  %v3384_v0 = vsel %vm1227_vm2, %v3349_v2, %v2568_v53 }
 0x2e0   :  { %v4203_v6 = vcombine.low %v3568_v58, %v3570_v40 }
 0x2e2   :  { %v2474_v15 = vpop.permute.xlu1 %2473  ;;  %4292 = vmatprep.mubr.msk.bf16.mxu1 %vm1525_vm9, %v4203_v6  ;;  %v2572_v12 = vpop.permute.xlu0 %2571 }
 0x2e3   :  { %v3352_v14 = vsel %vm1178_vm1, %v6146_v44, %v2474_v15  ;;  %v3388_v40 = vsel %vm1227_vm2, %v3355_v48, %v2572_v12 }
 0x2e6   :  { %v3302_v55 = vpop.permute.xlu1 %3301  ;;  %v2648_v59 = vpop.permute.xlu0 %2647 }
 0x2e7   :  { %v3574_v49 = vsel %vm1425_vm8, %v3542_v30, %v3302_v55  ;;  %v3416_v18 = vsel %vm1260_vm3, %v3384_v0, %v2648_v59 }
 0x2e8   :  { %v4204_v22 = vcombine.low %v3572_v28, %v3574_v49  ;;  %v4198_v28 = vld [vmem:[%s6530_s4] ss:$0 sm:$0xff] }
 0x2ea   :  { %v2478_v7 = vpop.permute.xlu1 %2477  ;;  %4293 = vmatmul.mubr.msk.bf16.gmra.mrb[8].mxu1 %vm1525_vm9, %v4204_v22  ;;  %v2652_v43 = vpop.permute.xlu0 %2651 }
 0x2eb   :  { %v3358_v44 = vsel %vm1178_vm1, %v6176_v42, %v2478_v7  ;;  %v3420_v34 = vsel %vm1260_vm3, %v3388_v40, %v2652_v43 }
 0x2ee   :  { %v2570_v52 = vpop.permute.xlu1 %2569  ;;  %v2840_v63 = vpop.permute.xlu0 %2839 }
 0x2ef   :  { %v3386_v29 = vsel %vm1227_vm2, %v3352_v14, %v2570_v52  ;;  %v3448_v10 = vsel %vm1293_vm4, %v3416_v18, %v2840_v63 }
 0x2f2   :  { %v2574_v46 = vpop.permute.xlu1 %2573  ;;  %v2844_v11 = vpop.permute.xlu0 %2843 }
 0x2f3   :  { %v3390_v16 = vsel %vm1227_vm2, %v3358_v44, %v2574_v46  ;;  %v3452_v19 = vsel %vm1293_vm4, %v3420_v34, %v2844_v11 }
 0x2f6   :  { %v2650_v8 = vpop.permute.xlu1 %2649  ;;  %v2936_v54 = vpop.permute.xlu0 %2935 }
 0x2f7   :  { %v3418_v26 = vsel %vm1260_vm3, %v3386_v29, %v2650_v8  ;;  %v3480_v53 = vsel %vm1326_vm5, %v3448_v10, %v2936_v54 }
 0x2fa   :  { %v2654_v4 = vpop.permute.xlu1 %2653  ;;  %v2940_v37 = vpop.permute.xlu0 %2939 }
 0x2fb   :  { %v3422_v6 = vsel %vm1260_vm3, %v3390_v16, %v2654_v4  ;;  %v3484_v15 = vsel %vm1326_vm5, %v3452_v19, %v2940_v37 }
 0x2fe   :  { %v2842_v25 = vpop.permute.xlu1 %2841  ;;  %v3016_v60 = vpop.permute.xlu0 %3015 }
 0x2ff   :  { %v3450_v51 = vsel %vm1293_vm4, %v3418_v26, %v2842_v25  ;;  %v3512_v38 = vsel %vm1359_vm6, %v3480_v53, %v3016_v60 }
 0x302   :  { %v2846_v50 = vpop.permute.xlu1 %2845  ;;  %v3020_v56 = vpop.permute.xlu0 %3019 }
 0x303   :  { %v3454_v20 = vsel %vm1293_vm4, %v3422_v6, %v2846_v50  ;;  %v3516_v13 = vsel %vm1359_vm6, %v3484_v15, %v3020_v56 }
 0x306   :  { %v2938_v31 = vpop.permute.xlu1 %2937  ;;  %v3208_v27 = vpop.permute.xlu0 %3207 }
 0x307   :  { %v3482_v58 = vsel %vm1326_vm5, %v3450_v51, %v2938_v31  ;;  %v3544_v3 = vsel %vm1392_vm7, %v3512_v38, %v3208_v27 }
 0x30a   :  { %v2942_v45 = vpop.permute.xlu1 %2941  ;;  %v3212_v5 = vpop.permute.xlu0 %3211 }
 0x30b   :  { %v3486_v12 = vsel %vm1326_vm5, %v3454_v20, %v2942_v45  ;;  %v3548_v61 = vsel %vm1392_vm7, %v3516_v13, %v3212_v5 }
 0x30e   :  { %v3018_v9 = vpop.permute.xlu1 %3017  ;;  %v3304_v1 = vpop.permute.xlu0 %3303 }
 0x30f   :  { %v3514_v57 = vsel %vm1359_vm6, %v3482_v58, %v3018_v9  ;;  %v3576_v41 = vsel %vm1425_vm8, %v3544_v3, %v3304_v1 }
 0x312   :  { %v3022_v47 = vpop.permute.xlu1 %3021  ;;  %v3308_v35 = vpop.permute.xlu0 %3307 }
 0x313   :  { %v3518_v33 = vsel %vm1359_vm6, %v3486_v12, %v3022_v47  ;;  %v3580_v30 = vsel %vm1425_vm8, %v3548_v61, %v3308_v35 }
 0x316   :  { %v3210_v17 = vpop.permute.xlu1 %3209 }
 0x317   :  { %v3546_v42 = vsel %vm1392_vm7, %v3514_v57, %v3210_v17 }
 0x31a   :  { %v3214_v24 = vpop.permute.xlu1 %3213 }
 0x31b   :  { %v3550_v62 = vsel %vm1392_vm7, %v3518_v33, %v3214_v24 }
 0x31e   :  { %v3306_v23 = vpop.permute.xlu1 %3305 }
 0x31f   :  { %v3578_v21 = vsel %vm1425_vm8, %v3546_v42, %v3306_v23 }
 0x320   :  { %v4205_v32 = vcombine.low %v3576_v41, %v3578_v21 }
 0x322   :  { %v3310_v36 = vpop.permute.xlu1 %3309  ;;  %4296 = vmatprep.mubr.msk.bf16.mxu1 %vm1525_vm9, %v4205_v32 }
 0x323   :  { %v3582_v55 = vsel %vm1425_vm8, %v3550_v62, %v3310_v36 }
 0x324   :  { %v4206_v59 = vcombine.low %v3580_v30, %v3582_v55 }
 0x326   :  { %4297 = vmatmul.mubr.msk.bf16.gmra.mrb[12].mxu1 %vm1525_vm9, %v4206_v59 }
 0x361   :  { %v4286_v49 = vpop.f32.mrb[0].mxu1 }
 0x362   :  { %v3720_v22 = vadd.f32 %v4286_v49, %v4198_v28  ;;  %v3711_v7 = vpop.f32.mrb[1].mxu1 }
 0x363   :  { %v3712_v43 = vadd.f32 %v4198_v28, %v3711_v7  ;;  %v4287_v52 = vpop.f32.mrb[2].mxu1 }
 0x364   :  { %3776 = vst.msk [vmem:[%s6531_s5 + $0x10] sm:$0xff] %vm1227_vm2, %v3720_v22  ;;  %v3723_v63 = vadd.f32 %v4287_v52, %v4198_v28  ;;  %v3714_v46 = vpop.f32.mrb[3].mxu1 }
 0x365   :  { %3774 = vst.msk [vmem:[%s6531_s5] sm:$0xff] %vm1227_vm2, %v3712_v43  ;;  %v3715_v11 = vadd.f32 %v4198_v28, %v3714_v46 }
 0x366   :  { %3777 = vst.msk [vmem:[%s6531_s5 + $0x18] sm:$0xff] %vm1227_vm2, %v3723_v63 }
 0x367   :  { %3775 = vst.msk [vmem:[%s6531_s5 + $0x8] sm:$0xff] %vm1227_vm2, %v3715_v11 }
 0x371   :  { %v4290_v8 = vpop.f32.mrb[4].mxu1 }
 0x372   :  { %v3736_v54 = vadd.f32 %v4290_v8, %v4198_v28  ;;  %v3727_v4 = vpop.f32.mrb[5].mxu1 }
 0x373   :  { %v3728_v37 = vadd.f32 %v4198_v28, %v3727_v4  ;;  %v4291_v25 = vpop.f32.mrb[6].mxu1 }
 0x374   :  { %3780 = vst.msk [vmem:[%s6531_s5 + $0x30] sm:$0xff] %vm1227_vm2, %v3736_v54  ;;  %v3739_v60 = vadd.f32 %v4291_v25, %v4198_v28  ;;  %v3730_v50 = vpop.f32.mrb[7].mxu1 }
 0x375   :  { %3778 = vst.msk [vmem:[%s6531_s5 + $0x20] sm:$0xff] %vm1227_vm2, %v3728_v37  ;;  %v3731_v31 = vadd.f32 %v4198_v28, %v3730_v50 }
 0x376   :  { %3781 = vst.msk [vmem:[%s6531_s5 + $0x38] sm:$0xff] %vm1227_vm2, %v3739_v60 }
 0x377   :  { %3779 = vst.msk [vmem:[%s6531_s5 + $0x28] sm:$0xff] %vm1227_vm2, %v3731_v31 }
 0x3bd   :  { %v4294_v56 = vpop.f32.mrb[8].mxu1 }
 0x3be   :  { %v3752_v45 = vadd.f32 %v4294_v56, %v4198_v28  ;;  %v3743_v27 = vpop.f32.mrb[9].mxu1 }
 0x3bf   :  { %v3744_v9 = vadd.f32 %v4198_v28, %v3743_v27  ;;  %v4295_v47 = vpop.f32.mrb[10].mxu1 }
 0x3c0   :  { %3784 = vst.msk [vmem:[%s6531_s5 + $0x50] sm:$0xff] %vm1227_vm2, %v3752_v45  ;;  %v3755_v5 = vadd.f32 %v4295_v47, %v4198_v28  ;;  %v3746_v17 = vpop.f32.mrb[11].mxu1 }
 0x3c1   :  { %3782 = vst.msk [vmem:[%s6531_s5 + $0x40] sm:$0xff] %vm1227_vm2, %v3744_v9  ;;  %v3747_v39 = vadd.f32 %v4198_v28, %v3746_v17 }
 0x3c2   :  { %3785 = vst.msk [vmem:[%s6531_s5 + $0x58] sm:$0xff] %vm1227_vm2, %v3755_v5 }
 0x3c3   :  { %3783 = vst.msk [vmem:[%s6531_s5 + $0x48] sm:$0xff] %vm1227_vm2, %v3747_v39 }
 0x3f9   :  { %v4298_v2 = vpop.f32.mrb[12].mxu1 }
 0x3fa   :  { %v3768_v14 = vadd.f32 %v4298_v2, %v4198_v28  ;;  %v3759_v0 = vpop.f32.mrb[13].mxu1 }
 0x3fb   :  { %v3760_v29 = vadd.f32 %v4198_v28, %v3759_v0  ;;  %v4299_v18 = vpop.f32.mrb[14].mxu1 }
 0x3fc   :  { %3788 = vst.msk [vmem:[%s6531_s5 + $0x70] sm:$0xff] %vm1227_vm2, %v3768_v14  ;;  %v3771_v26 = vadd.f32 %v4299_v18, %v4198_v28  ;;  %v3762_v1 = vpop.f32.mrb[15].mxu1 }
 0x3fd   :  { %3786 = vst.msk [vmem:[%s6531_s5 + $0x60] sm:$0xff] %vm1227_vm2, %v3760_v29  ;;  %v3763_v24 = vadd.f32 %v4198_v28, %v3762_v1 }
 0x3fe   :  { %3789 = vst.msk [vmem:[%s6531_s5 + $0x78] sm:$0xff] %vm1227_vm2, %v3771_v26 }
 0x3ff   :  { %3787 = vst.msk [vmem:[%s6531_s5 + $0x68] sm:$0xff] %vm1227_vm2, %v3763_v24 }

</bundles_post_ra>
